<compile_context>
chip_gen: v5e
topology: v5e:2x2
jax: 0.10.0
libtpu: 0.0.40
codegen_flags: <defaults>
</compile_context>

<pallas_src>
import functools

import numpy as np
import jax
import jax.numpy as jnp
from jax import lax
from jax.experimental import pallas as pl
from jax.experimental.pallas import tpu as pltpu

_LN_EPS = 1e-6


# ----------------------------------------------------------------------------
# Fused embedding kernel: gather(emb, tok) + pos_enc + LayerNorm
#   grid = (B,): token ids in SMEM (scalar prefetch), embedding table in VMEM,
#   per-batch dense [L, D] output write.
# ----------------------------------------------------------------------------
def _embed_kernel(tok_ref, e_ref, p_ref, g_ref, b_ref, o_ref, *, eps):
    b = pl.program_id(0)
    L, _ = p_ref.shape
    # In-kernel row gather: static unroll over the (short) sequence, one
    # dynamic (1, D) slice of the VMEM-resident embedding table per token.
    rows = [e_ref[pl.ds(tok_ref[b, j], 1), :] for j in range(L)]
    x = jnp.concatenate(rows, axis=0)                       # [L, D]
    y = x + p_ref[...]                                      # + positional enc
    mu = jnp.mean(y, axis=-1, keepdims=True)
    var = jnp.mean((y - mu) ** 2, axis=-1, keepdims=True)
    o_ref[0] = (y - mu) * lax.rsqrt(var + eps) * g_ref[...] + b_ref[...]


def fused_embed(seq, emb_w, pos_table, ln_g, ln_b):
    """LayerNorm(Embedding(seq) + pos_table[:L]) -> [B, L, D]."""
    B, L = seq.shape
    V, D = emb_w.shape
    tok = seq.astype(jnp.int32)                             # [B, L] -> SMEM
    return pl.pallas_call(
        functools.partial(_embed_kernel, eps=_LN_EPS),
        grid_spec=pltpu.PrefetchScalarGridSpec(
            num_scalar_prefetch=1,
            grid=(B,),
            in_specs=[
                pl.BlockSpec((V, D), lambda b, tok: (0, 0)),     # emb table
                pl.BlockSpec((L, D), lambda b, tok: (0, 0)),     # pos enc
                pl.BlockSpec((1, D), lambda b, tok: (0, 0)),     # ln gamma
                pl.BlockSpec((1, D), lambda b, tok: (0, 0)),     # ln beta
            ],
            out_specs=pl.BlockSpec((1, L, D), lambda b, tok: (b, 0, 0)),
        ),
        out_shape=jax.ShapeDtypeStruct((B, L, D), jnp.float32),
        compiler_params=pltpu.CompilerParams(dimension_semantics=("parallel",)),
    )(tok, emb_w, pos_table[:L], ln_g.reshape(1, D), ln_b.reshape(1, D))


# ----------------------------------------------------------------------------
# Fused multi-head-attention sublayer kernel
#   qkv-proj -> per-head softmax attention -> out-proj -> +residual -> LN
# ----------------------------------------------------------------------------
def _mha_kernel(x_ref, kv_ref, pm_ref, wq_ref, wkv_ref, wfc_ref, g_ref, b_ref,
                o_ref, *, n_head, d_k, d_v, causal, eps):
    x = x_ref[0]                                  # [Lq, D]  (also the residual)
    src = kv_ref[0]                               # [Lk, D]
    Lq = x.shape[0]
    Lk = src.shape[0]

    # 1/temperature folded into q so the [Lq, Lk] score tensor is never scaled.
    scale = 1.0 / (float(d_k) ** 0.5)
    q = jnp.dot(x, wq_ref[...], preferred_element_type=jnp.float32) * scale   # [Lq, H*dk]
    kvp = jnp.dot(src, wkv_ref[...], preferred_element_type=jnp.float32)      # [Lk, H*(dk+dv)]

    # Masks: pad mask comes in as [1, 1, Lk]; causal mask built in-kernel.
    keep = jnp.broadcast_to(pm_ref[0] != 0, (Lq, Lk))             # [Lq, Lk] bool
    if causal:
        row = lax.broadcasted_iota(jnp.int32, (Lq, Lk), 0)
        col = lax.broadcasted_iota(jnp.int32, (Lq, Lk), 1)
        keep = jnp.logical_and(keep, col <= row)

    k_off = n_head * d_k
    heads = []
    for h in range(n_head):                       # static unroll over heads
        qh = q[:, h * d_k:(h + 1) * d_k]          # [Lq, dk]
        kh = kvp[:, h * d_k:(h + 1) * d_k]        # [Lk, dk]
        vh = kvp[:, k_off + h * d_v:k_off + (h + 1) * d_v]        # [Lk, dv]
        s = lax.dot_general(qh, kh, (((1,), (1,)), ((), ())),
                            preferred_element_type=jnp.float32)   # [Lq, Lk]
        s = jnp.where(keep, s, -1e9)
        mx = jnp.max(s, axis=-1, keepdims=True)
        e = jnp.exp(s - mx)
        p = e * pl.reciprocal(jnp.sum(e, axis=-1, keepdims=True), approx=True)
        heads.append(jnp.dot(p, vh, preferred_element_type=jnp.float32))      # [Lq, dv]
    ctx = jnp.concatenate(heads, axis=-1)                          # [Lq, H*dv]

    y = jnp.dot(ctx, wfc_ref[...], preferred_element_type=jnp.float32) + x
    mu = jnp.mean(y, axis=-1, keepdims=True)
    var = jnp.mean((y - mu) ** 2, axis=-1, keepdims=True)
    o_ref[0] = (y - mu) * lax.rsqrt(var + eps) * g_ref[...] + b_ref[...]


def fused_mha(q_in, kv_in, pad_mask, p, n_head, d_k, d_v, causal):
    """One full MHA sublayer. q_in:[B,Lq,D], kv_in:[B,Lk,D], pad_mask:[B,1,Lk]."""
    B, Lq, D = q_in.shape
    Lk = kv_in.shape[1]
    pm = pad_mask.astype(jnp.int32)
    return pl.pallas_call(
        functools.partial(_mha_kernel, n_head=n_head, d_k=d_k, d_v=d_v,
                          causal=causal, eps=_LN_EPS),
        grid=(B,),
        out_shape=jax.ShapeDtypeStruct((B, Lq, D), jnp.float32),
        in_specs=[
            pl.BlockSpec((1, Lq, D), lambda b: (b, 0, 0)),
            pl.BlockSpec((1, Lk, D), lambda b: (b, 0, 0)),
            pl.BlockSpec((1, 1, Lk), lambda b: (b, 0, 0)),
            pl.BlockSpec((D, n_head * d_k), lambda b: (0, 0)),
            pl.BlockSpec((D, n_head * (d_k + d_v)), lambda b: (0, 0)),
            pl.BlockSpec((n_head * d_v, D), lambda b: (0, 0)),
            pl.BlockSpec((1, D), lambda b: (0, 0)),
            pl.BlockSpec((1, D), lambda b: (0, 0)),
        ],
        out_specs=pl.BlockSpec((1, Lq, D), lambda b: (b, 0, 0)),
        compiler_params=pltpu.CompilerParams(dimension_semantics=("parallel",)),
    )(q_in, kv_in, pm, p["wq"], p["wkv"], p["wfc"],
      p["ln_g"].reshape(1, D), p["ln_b"].reshape(1, D))


# ----------------------------------------------------------------------------
# Fused position-wise FFN sublayer kernel: w1 -> ReLU -> w2 -> +residual -> LN
# ----------------------------------------------------------------------------
def _ffn_kernel(x_ref, w1_ref, b1_ref, w2_ref, b2_ref, g_ref, b_ref, o_ref, *, eps):
    x = x_ref[0]                                                   # [L, D]
    h = jnp.dot(x, w1_ref[...], preferred_element_type=jnp.float32) + b1_ref[...]
    h = jnp.maximum(h, 0.0)
    y = jnp.dot(h, w2_ref[...], preferred_element_type=jnp.float32) + b2_ref[...]
    y = y + x
    mu = jnp.mean(y, axis=-1, keepdims=True)
    var = jnp.mean((y - mu) ** 2, axis=-1, keepdims=True)
    o_ref[0] = (y - mu) * lax.rsqrt(var + eps) * g_ref[...] + b_ref[...]


def fused_ffn(x, p):
    B, L, D = x.shape
    Di = p["w1"].shape[1]
    return pl.pallas_call(
        functools.partial(_ffn_kernel, eps=_LN_EPS),
        grid=(B,),
        out_shape=jax.ShapeDtypeStruct((B, L, D), jnp.float32),
        in_specs=[
            pl.BlockSpec((1, L, D), lambda b: (b, 0, 0)),
            pl.BlockSpec((D, Di), lambda b: (0, 0)),
            pl.BlockSpec((1, Di), lambda b: (0, 0)),
            pl.BlockSpec((Di, D), lambda b: (0, 0)),
            pl.BlockSpec((1, D), lambda b: (0, 0)),
            pl.BlockSpec((1, D), lambda b: (0, 0)),
            pl.BlockSpec((1, D), lambda b: (0, 0)),
        ],
        out_specs=pl.BlockSpec((1, L, D), lambda b: (b, 0, 0)),
        compiler_params=pltpu.CompilerParams(dimension_semantics=("parallel",)),
    )(x, p["w1"], p["b1"].reshape(1, Di), p["w2"], p["b2"].reshape(1, D),
      p["ln_g"].reshape(1, D), p["ln_b"].reshape(1, D))


# ----------------------------------------------------------------------------
# Output projection kernel: logits = dec_out @ emb^T * d_model**-0.5
# (transpose expressed via dot_general contraction dims; scale fused in)
# ----------------------------------------------------------------------------
def _proj_kernel(x_ref, w_ref, o_ref, *, scale):
    x = x_ref[0]                                                   # [Lt, D]
    o_ref[0] = lax.dot_general(x, w_ref[...], (((1,), (1,)), ((), ())),
                               preferred_element_type=jnp.float32) * scale


def output_projection(dec_out, emb_w, scale):
    B, Lt, D = dec_out.shape
    V = emb_w.shape[0]
    out = pl.pallas_call(
        functools.partial(_proj_kernel, scale=scale),
        grid=(B,),
        out_shape=jax.ShapeDtypeStruct((B, Lt, V), jnp.float32),
        in_specs=[
            pl.BlockSpec((1, Lt, D), lambda b: (b, 0, 0)),
            pl.BlockSpec((V, D), lambda b: (0, 0)),
        ],
        out_specs=pl.BlockSpec((1, Lt, V), lambda b: (b, 0, 0)),
        compiler_params=pltpu.CompilerParams(dimension_semantics=("parallel",)),
    )(dec_out, emb_w)
    return out.reshape(B * Lt, V)


# ----------------------------------------------------------------------------
# Model glue
# ----------------------------------------------------------------------------
def sinusoid_table(n_position, d_hid):
    pos = np.arange(n_position)[:, None].astype(np.float64)
    hid = np.arange(d_hid)[None, :]
    angle = pos / np.power(10000, 2 * (hid // 2) / d_hid)
    table = np.zeros_like(angle)
    table[:, 0::2] = np.sin(angle[:, 0::2])
    table[:, 1::2] = np.cos(angle[:, 1::2])
    return jnp.asarray(table, dtype=jnp.float32)   # [n_position, d_hid]


def encoder_fwd(src_seq, src_pad_mask, params, cfg, pos_table):
    x = fused_embed(src_seq, params["emb"], pos_table,
                    params["enc_ln_g"], params["enc_ln_b"])
    for lp in params["enc_layers"]:
        x = fused_mha(x, x, src_pad_mask, lp["slf"],
                      cfg["H"], cfg["dk"], cfg["dv"], causal=False)
        x = fused_ffn(x, lp["ffn"])
    return x


def decoder_fwd(trg_seq, trg_pad_mask, enc_out, src_pad_mask, params, cfg, pos_table):
    x = fused_embed(trg_seq, params["emb"], pos_table,
                    params["dec_ln_g"], params["dec_ln_b"])
    for lp in params["dec_layers"]:
        x = fused_mha(x, x, trg_pad_mask, lp["slf"],
                      cfg["H"], cfg["dk"], cfg["dv"], causal=True)
        x = fused_mha(x, enc_out, src_pad_mask, lp["enc"],
                      cfg["H"], cfg["dk"], cfg["dv"], causal=False)
        x = fused_ffn(x, lp["ffn"])
    return x


def transformer_forward(src_seq, trg_seq, params, cfg, pos_table):
    # get_pad_mask; the subsequent (causal) mask is generated inside the kernel.
    src_pad = (src_seq != cfg["src_pad_idx"])[:, None, :]          # [B,1,Ls]
    trg_pad = (trg_seq != cfg["trg_pad_idx"])[:, None, :]          # [B,1,Lt]

    enc_out = encoder_fwd(src_seq, src_pad, params, cfg, pos_table)
    dec_out = decoder_fwd(trg_seq, trg_pad, enc_out, src_pad, params, cfg, pos_table)

    # trg_word_prj shares the embedding weight (bias=False); scale_prj fused.
    return output_projection(dec_out, params["emb"], float(cfg["D"]) ** -0.5)


# ----------------------------------------------------------------------------
# Deterministic parameter initialisation (xavier-uniform-like)
# ----------------------------------------------------------------------------
def init_params(key, cfg):
    V, D, Di, H, dk, dv, nl = (cfg["V"], cfg["D"], cfg["Di"], cfg["H"],
                               cfg["dk"], cfg["dv"], cfg["nl"])
    keys = iter(jax.random.split(key, 512))

    def xav(shape):
        lim = float(np.sqrt(6.0 / (shape[0] + shape[1])))
        return jax.random.uniform(next(keys), shape, jnp.float32, -lim, lim)

    def mha_p():
        return {
            "wq": xav((D, H * dk)),
            # wk and wv concatenated -> single MXU matmul for the kv projection
            "wkv": jnp.concatenate([xav((D, H * dk)), xav((D, H * dv))], axis=1),
            "wfc": xav((H * dv, D)),
            "ln_g": jnp.ones((D,), jnp.float32), "ln_b": jnp.zeros((D,), jnp.float32),
        }

    def ffn_p():
        return {
            "w1": xav((D, Di)), "b1": jnp.zeros((Di,), jnp.float32),
            "w2": xav((Di, D)), "b2": jnp.zeros((D,), jnp.float32),
            "ln_g": jnp.ones((D,), jnp.float32), "ln_b": jnp.zeros((D,), jnp.float32),
        }

    params = {
        # shared src-emb / trg-emb / output-projection weight (weight sharing on)
        "emb": xav((V, D)),
        "enc_ln_g": jnp.ones((D,), jnp.float32), "enc_ln_b": jnp.zeros((D,), jnp.float32),
        "dec_ln_g": jnp.ones((D,), jnp.float32), "dec_ln_b": jnp.zeros((D,), jnp.float32),
        "enc_layers": [{"slf": mha_p(), "ffn": ffn_p()} for _ in range(nl)],
        "dec_layers": [{"slf": mha_p(), "enc": mha_p(), "ffn": ffn_p()} for _ in range(nl)],
    }
    return params


# ----------------------------------------------------------------------------
if __name__ == "__main__":
    cfg = dict(V=32, D=32, Di=64, H=4, dk=8, dv=8, nl=2,
               n_position=200, src_pad_idx=0, trg_pad_idx=0)
    B, Ls, Lt = 2, 10, 8

    root = jax.random.PRNGKey(0)
    k_par, k_src, k_trg = jax.random.split(root, 3)

    params = init_params(k_par, cfg)
    pos_table = sinusoid_table(cfg["n_position"], cfg["D"])

    src_seq = jax.random.randint(k_src, (B, Ls), 1, cfg["V"], dtype=jnp.int32)
    trg_seq = jax.random.randint(k_trg, (B, Lt), 1, cfg["V"], dtype=jnp.int32)
    # add some padding at the tail of the second sequence to exercise the masks
    src_seq = src_seq.at[1, -3:].set(cfg["src_pad_idx"])
    trg_seq = trg_seq.at[1, -2:].set(cfg["trg_pad_idx"])

    fwd = jax.jit(functools.partial(transformer_forward, cfg=cfg, pos_table=pos_table))
    logits = fwd(src_seq, trg_seq, params)
    jax.block_until_ready(logits)

    assert logits.shape == (B * Lt, cfg["V"])
    assert bool(jnp.all(jnp.isfinite(logits)))
    print("KERNEL_OK")
</pallas_src>

<mosaic_0001>
module attributes {stable_mosaic.version = 11 : i64} {
  func.func @_mha_kernel(%arg0: i32, %arg1: memref<1x10x32xf32, #tpu.memory_space<vmem>>, %arg2: memref<1x10x32xf32, #tpu.memory_space<vmem>>, %arg3: memref<1x1x10xi32, #tpu.memory_space<vmem>>, %arg4: memref<32x32xf32, #tpu.memory_space<vmem>>, %arg5: memref<32x64xf32, #tpu.memory_space<vmem>>, %arg6: memref<32x32xf32, #tpu.memory_space<vmem>>, %arg7: memref<1x32xf32, #tpu.memory_space<vmem>>, %arg8: memref<1x32xf32, #tpu.memory_space<vmem>>, %arg9: memref<1x10x32xf32, #tpu.memory_space<vmem>>) attributes {dimension_semantics = [#tpu.dimension_semantics<parallel>], iteration_bounds = array<i64: 2>, scalar_prefetch = 0 : i64, scratch_operands = 0 : i64, tpu.core_type = #tpu.core_type<tc>, window_params = [{transform_indices = @transform_0, window_bounds = array<i64: 1, 10, 32>}, {transform_indices = @transform_1, window_bounds = array<i64: 1, 10, 32>}, {transform_indices = @transform_2, window_bounds = array<i64: 1, 1, 10>}, {pipeline_mode = #tpu.pipeline_mode<synchronous>, transform_indices = @transform_3, window_bounds = array<i64: 32, 32>}, {pipeline_mode = #tpu.pipeline_mode<synchronous>, transform_indices = @transform_4, window_bounds = array<i64: 32, 64>}, {pipeline_mode = #tpu.pipeline_mode<synchronous>, transform_indices = @transform_5, window_bounds = array<i64: 32, 32>}, {pipeline_mode = #tpu.pipeline_mode<synchronous>, transform_indices = @transform_6, window_bounds = array<i64: 1, 32>}, {pipeline_mode = #tpu.pipeline_mode<synchronous>, transform_indices = @transform_7, window_bounds = array<i64: 1, 32>}, {transform_indices = @transform_8, window_bounds = array<i64: 1, 10, 32>}]} {
    %c0 = arith.constant 0 : index
    %c0_0 = arith.constant 0 : index
    %c0_1 = arith.constant 0 : index
    %0 = vector.load %arg1[%c0, %c0_0, %c0_1] : memref<1x10x32xf32, #tpu.memory_space<vmem>>, vector<1x10x32xf32>
    %1 = vector.shape_cast %0 : vector<1x10x32xf32> to vector<10x32xf32>
    %c0_2 = arith.constant 0 : index
    %c0_3 = arith.constant 0 : index
    %c0_4 = arith.constant 0 : index
    %2 = vector.load %arg2[%c0_2, %c0_3, %c0_4] : memref<1x10x32xf32, #tpu.memory_space<vmem>>, vector<1x10x32xf32>
    %3 = vector.shape_cast %2 : vector<1x10x32xf32> to vector<10x32xf32>
    %c0_5 = arith.constant 0 : index
    %c0_6 = arith.constant 0 : index
    %4 = vector.load %arg4[%c0_5, %c0_6] : memref<32x32xf32, #tpu.memory_space<vmem>>, vector<32x32xf32>
    %cst = arith.constant dense<0.000000e+00> : vector<10x32xf32>
    %5 = tpu.matmul %1, %4, %cst {dimension_numbers = #tpu.dot_dimension_numbers<[1], [0], [0], [1], [0, 0, 1, 1], [], []>} : vector<10x32xf32>, vector<32x32xf32>, vector<10x32xf32> -> vector<10x32xf32>
    %cst_7 = arith.constant 0.353553385 : f32
    %6 = vector.broadcast %cst_7 : f32 to vector<10x32xf32>
    %7 = arith.mulf %5, %6 : vector<10x32xf32>
    %c0_8 = arith.constant 0 : index
    %c0_9 = arith.constant 0 : index
    %8 = vector.load %arg5[%c0_8, %c0_9] : memref<32x64xf32, #tpu.memory_space<vmem>>, vector<32x64xf32>
    %cst_10 = arith.constant dense<0.000000e+00> : vector<10x64xf32>
    %9 = tpu.matmul %3, %8, %cst_10 {dimension_numbers = #tpu.dot_dimension_numbers<[1], [0], [0], [1], [0, 0, 1, 1], [], []>} : vector<10x32xf32>, vector<32x64xf32>, vector<10x64xf32> -> vector<10x64xf32>
    %c0_11 = arith.constant 0 : index
    %c0_12 = arith.constant 0 : index
    %c0_13 = arith.constant 0 : index
    %10 = vector.load %arg3[%c0_11, %c0_12, %c0_13] : memref<1x1x10xi32, #tpu.memory_space<vmem>>, vector<1x1x10xi32>
    %11 = vector.shape_cast %10 : vector<1x1x10xi32> to vector<1x10xi32>
    %c0_i32 = arith.constant 0 : i32
    %12 = vector.broadcast %c0_i32 : i32 to vector<1x10xi32>
    %13 = arith.cmpi ne, %11, %12 : vector<1x10xi32>
    %14 = vector.shape_cast %13 : vector<1x10xi1> to vector<1x10xi1>
    %15 = vector.broadcast %14 : vector<1x10xi1> to vector<10x10xi1>
    %16 = vector.extract_strided_slice %7 {offsets = [0, 0], sizes = [10, 8], strides = [1, 1]} : vector<10x32xf32> to vector<10x8xf32>
    %17 = vector.extract_strided_slice %9 {offsets = [0, 0], sizes = [10, 8], strides = [1, 1]} : vector<10x64xf32> to vector<10x8xf32>
    %18 = vector.extract_strided_slice %9 {offsets = [0, 32], sizes = [10, 8], strides = [1, 1]} : vector<10x64xf32> to vector<10x8xf32>
    %cst_14 = arith.constant dense<0.000000e+00> : vector<10x10xf32>
    %19 = tpu.matmul %16, %17, %cst_14 {dimension_numbers = #tpu.dot_dimension_numbers<[1], [1], [0], [0], [0, 0, 1, 0], [], []>} : vector<10x8xf32>, vector<10x8xf32>, vector<10x10xf32> -> vector<10x10xf32>
    %cst_15 = arith.constant -1.000000e+09 : f32
    %20 = vector.broadcast %cst_15 : f32 to vector<10x10xf32>
    %21 = arith.select %15, %19, %20 : vector<10x10xi1>, vector<10x10xf32>
    %cst_16 = arith.constant dense<0xFF800000> : vector<10xf32>
    %22 = vector.multi_reduction <maximumf>, %21, %cst_16 [1] : vector<10x10xf32> to vector<10xf32>
    %23 = vector.shape_cast %22 : vector<10xf32> to vector<10x1xf32>
    %24 = vector.broadcast %23 : vector<10x1xf32> to vector<10x10xf32>
    %25 = arith.subf %21, %24 : vector<10x10xf32>
    %26 = math.exp %25 : vector<10x10xf32>
    %cst_17 = arith.constant dense<0.000000e+00> : vector<10xf32>
    %27 = vector.multi_reduction <add>, %26, %cst_17 [1] : vector<10x10xf32> to vector<10xf32>
    %28 = vector.shape_cast %27 : vector<10xf32> to vector<10x1xf32>
    %29 = tpu.reciprocal %28 {approx = true} : vector<10x1xf32> -> vector<10x1xf32>
    %30 = vector.broadcast %29 : vector<10x1xf32> to vector<10x10xf32>
    %31 = arith.mulf %26, %30 : vector<10x10xf32>
    %cst_18 = arith.constant dense<0.000000e+00> : vector<10x8xf32>
    %32 = tpu.matmul %31, %18, %cst_18 {dimension_numbers = #tpu.dot_dimension_numbers<[1], [0], [0], [1], [0, 0, 1, 1], [], []>} : vector<10x10xf32>, vector<10x8xf32>, vector<10x8xf32> -> vector<10x8xf32>
    %33 = vector.extract_strided_slice %7 {offsets = [0, 8], sizes = [10, 8], strides = [1, 1]} : vector<10x32xf32> to vector<10x8xf32>
    %34 = vector.extract_strided_slice %9 {offsets = [0, 8], sizes = [10, 8], strides = [1, 1]} : vector<10x64xf32> to vector<10x8xf32>
    %35 = vector.extract_strided_slice %9 {offsets = [0, 40], sizes = [10, 8], strides = [1, 1]} : vector<10x64xf32> to vector<10x8xf32>
    %cst_19 = arith.constant dense<0.000000e+00> : vector<10x10xf32>
    %36 = tpu.matmul %33, %34, %cst_19 {dimension_numbers = #tpu.dot_dimension_numbers<[1], [1], [0], [0], [0, 0, 1, 0], [], []>} : vector<10x8xf32>, vector<10x8xf32>, vector<10x10xf32> -> vector<10x10xf32>
    %cst_20 = arith.constant -1.000000e+09 : f32
    %37 = vector.broadcast %cst_20 : f32 to vector<10x10xf32>
    %38 = arith.select %15, %36, %37 : vector<10x10xi1>, vector<10x10xf32>
    %cst_21 = arith.constant dense<0xFF800000> : vector<10xf32>
    %39 = vector.multi_reduction <maximumf>, %38, %cst_21 [1] : vector<10x10xf32> to vector<10xf32>
    %40 = vector.shape_cast %39 : vector<10xf32> to vector<10x1xf32>
    %41 = vector.broadcast %40 : vector<10x1xf32> to vector<10x10xf32>
    %42 = arith.subf %38, %41 : vector<10x10xf32>
    %43 = math.exp %42 : vector<10x10xf32>
    %cst_22 = arith.constant dense<0.000000e+00> : vector<10xf32>
    %44 = vector.multi_reduction <add>, %43, %cst_22 [1] : vector<10x10xf32> to vector<10xf32>
    %45 = vector.shape_cast %44 : vector<10xf32> to vector<10x1xf32>
    %46 = tpu.reciprocal %45 {approx = true} : vector<10x1xf32> -> vector<10x1xf32>
    %47 = vector.broadcast %46 : vector<10x1xf32> to vector<10x10xf32>
    %48 = arith.mulf %43, %47 : vector<10x10xf32>
    %cst_23 = arith.constant dense<0.000000e+00> : vector<10x8xf32>
    %49 = tpu.matmul %48, %35, %cst_23 {dimension_numbers = #tpu.dot_dimension_numbers<[1], [0], [0], [1], [0, 0, 1, 1], [], []>} : vector<10x10xf32>, vector<10x8xf32>, vector<10x8xf32> -> vector<10x8xf32>
    %50 = vector.extract_strided_slice %7 {offsets = [0, 16], sizes = [10, 8], strides = [1, 1]} : vector<10x32xf32> to vector<10x8xf32>
    %51 = vector.extract_strided_slice %9 {offsets = [0, 16], sizes = [10, 8], strides = [1, 1]} : vector<10x64xf32> to vector<10x8xf32>
    %52 = vector.extract_strided_slice %9 {offsets = [0, 48], sizes = [10, 8], strides = [1, 1]} : vector<10x64xf32> to vector<10x8xf32>
    %cst_24 = arith.constant dense<0.000000e+00> : vector<10x10xf32>
    %53 = tpu.matmul %50, %51, %cst_24 {dimension_numbers = #tpu.dot_dimension_numbers<[1], [1], [0], [0], [0, 0, 1, 0], [], []>} : vector<10x8xf32>, vector<10x8xf32>, vector<10x10xf32> -> vector<10x10xf32>
    %cst_25 = arith.constant -1.000000e+09 : f32
    %54 = vector.broadcast %cst_25 : f32 to vector<10x10xf32>
    %55 = arith.select %15, %53, %54 : vector<10x10xi1>, vector<10x10xf32>
    %cst_26 = arith.constant dense<0xFF800000> : vector<10xf32>
    %56 = vector.multi_reduction <maximumf>, %55, %cst_26 [1] : vector<10x10xf32> to vector<10xf32>
    %57 = vector.shape_cast %56 : vector<10xf32> to vector<10x1xf32>
    %58 = vector.broadcast %57 : vector<10x1xf32> to vector<10x10xf32>
    %59 = arith.subf %55, %58 : vector<10x10xf32>
    %60 = math.exp %59 : vector<10x10xf32>
    %cst_27 = arith.constant dense<0.000000e+00> : vector<10xf32>
    %61 = vector.multi_reduction <add>, %60, %cst_27 [1] : vector<10x10xf32> to vector<10xf32>
    %62 = vector.shape_cast %61 : vector<10xf32> to vector<10x1xf32>
    %63 = tpu.reciprocal %62 {approx = true} : vector<10x1xf32> -> vector<10x1xf32>
    %64 = vector.broadcast %63 : vector<10x1xf32> to vector<10x10xf32>
    %65 = arith.mulf %60, %64 : vector<10x10xf32>
    %cst_28 = arith.constant dense<0.000000e+00> : vector<10x8xf32>
    %66 = tpu.matmul %65, %52, %cst_28 {dimension_numbers = #tpu.dot_dimension_numbers<[1], [0], [0], [1], [0, 0, 1, 1], [], []>} : vector<10x10xf32>, vector<10x8xf32>, vector<10x8xf32> -> vector<10x8xf32>
    %67 = vector.extract_strided_slice %7 {offsets = [0, 24], sizes = [10, 8], strides = [1, 1]} : vector<10x32xf32> to vector<10x8xf32>
    %68 = vector.extract_strided_slice %9 {offsets = [0, 24], sizes = [10, 8], strides = [1, 1]} : vector<10x64xf32> to vector<10x8xf32>
    %69 = vector.extract_strided_slice %9 {offsets = [0, 56], sizes = [10, 8], strides = [1, 1]} : vector<10x64xf32> to vector<10x8xf32>
    %cst_29 = arith.constant dense<0.000000e+00> : vector<10x10xf32>
    %70 = tpu.matmul %67, %68, %cst_29 {dimension_numbers = #tpu.dot_dimension_numbers<[1], [1], [0], [0], [0, 0, 1, 0], [], []>} : vector<10x8xf32>, vector<10x8xf32>, vector<10x10xf32> -> vector<10x10xf32>
    %cst_30 = arith.constant -1.000000e+09 : f32
    %71 = vector.broadcast %cst_30 : f32 to vector<10x10xf32>
    %72 = arith.select %15, %70, %71 : vector<10x10xi1>, vector<10x10xf32>
    %cst_31 = arith.constant dense<0xFF800000> : vector<10xf32>
    %73 = vector.multi_reduction <maximumf>, %72, %cst_31 [1] : vector<10x10xf32> to vector<10xf32>
    %74 = vector.shape_cast %73 : vector<10xf32> to vector<10x1xf32>
    %75 = vector.broadcast %74 : vector<10x1xf32> to vector<10x10xf32>
    %76 = arith.subf %72, %75 : vector<10x10xf32>
    %77 = math.exp %76 : vector<10x10xf32>
    %cst_32 = arith.constant dense<0.000000e+00> : vector<10xf32>
    %78 = vector.multi_reduction <add>, %77, %cst_32 [1] : vector<10x10xf32> to vector<10xf32>
    %79 = vector.shape_cast %78 : vector<10xf32> to vector<10x1xf32>
    %80 = tpu.reciprocal %79 {approx = true} : vector<10x1xf32> -> vector<10x1xf32>
    %81 = vector.broadcast %80 : vector<10x1xf32> to vector<10x10xf32>
    %82 = arith.mulf %77, %81 : vector<10x10xf32>
    %cst_33 = arith.constant dense<0.000000e+00> : vector<10x8xf32>
    %83 = tpu.matmul %82, %69, %cst_33 {dimension_numbers = #tpu.dot_dimension_numbers<[1], [0], [0], [1], [0, 0, 1, 1], [], []>} : vector<10x10xf32>, vector<10x8xf32>, vector<10x8xf32> -> vector<10x8xf32>
    %84 = tpu.concatenate %32, %49, %66, %83 in 1 : vector<10x8xf32>, vector<10x8xf32>, vector<10x8xf32>, vector<10x8xf32> -> vector<10x32xf32>
    %c0_34 = arith.constant 0 : index
    %c0_35 = arith.constant 0 : index
    %85 = vector.load %arg6[%c0_34, %c0_35] : memref<32x32xf32, #tpu.memory_space<vmem>>, vector<32x32xf32>
    %cst_36 = arith.constant dense<0.000000e+00> : vector<10x32xf32>
    %86 = tpu.matmul %84, %85, %cst_36 {dimension_numbers = #tpu.dot_dimension_numbers<[1], [0], [0], [1], [0, 0, 1, 1], [], []>} : vector<10x32xf32>, vector<32x32xf32>, vector<10x32xf32> -> vector<10x32xf32>
    %87 = arith.addf %86, %1 : vector<10x32xf32>
    %cst_37 = arith.constant dense<0.000000e+00> : vector<10xf32>
    %88 = vector.multi_reduction <add>, %87, %cst_37 [1] : vector<10x32xf32> to vector<10xf32>
    %89 = vector.shape_cast %88 : vector<10xf32> to vector<10x1xf32>
    %cst_38 = arith.constant 3.200000e+01 : f32
    %90 = vector.broadcast %cst_38 : f32 to vector<10x1xf32>
    %91 = arith.divf %89, %90 : vector<10x1xf32>
    %92 = vector.broadcast %91 : vector<10x1xf32> to vector<10x32xf32>
    %93 = arith.subf %87, %92 : vector<10x32xf32>
    %94 = arith.mulf %93, %93 : vector<10x32xf32>
    %cst_39 = arith.constant dense<0.000000e+00> : vector<10xf32>
    %95 = vector.multi_reduction <add>, %94, %cst_39 [1] : vector<10x32xf32> to vector<10xf32>
    %96 = vector.shape_cast %95 : vector<10xf32> to vector<10x1xf32>
    %cst_40 = arith.constant 3.200000e+01 : f32
    %97 = vector.broadcast %cst_40 : f32 to vector<10x1xf32>
    %98 = arith.divf %96, %97 : vector<10x1xf32>
    %99 = vector.broadcast %91 : vector<10x1xf32> to vector<10x32xf32>
    %100 = arith.subf %87, %99 : vector<10x32xf32>
    %cst_41 = arith.constant 9.99999997E-7 : f32
    %101 = vector.broadcast %cst_41 : f32 to vector<10x1xf32>
    %102 = arith.addf %98, %101 : vector<10x1xf32>
    %103 = math.rsqrt %102 : vector<10x1xf32>
    %104 = vector.broadcast %103 : vector<10x1xf32> to vector<10x32xf32>
    %105 = arith.mulf %100, %104 : vector<10x32xf32>
    %c0_42 = arith.constant 0 : index
    %c0_43 = arith.constant 0 : index
    %106 = vector.load %arg7[%c0_42, %c0_43] : memref<1x32xf32, #tpu.memory_space<vmem>>, vector<1x32xf32>
    %107 = vector.broadcast %106 : vector<1x32xf32> to vector<10x32xf32>
    %108 = arith.mulf %105, %107 : vector<10x32xf32>
    %c0_44 = arith.constant 0 : index
    %c0_45 = arith.constant 0 : index
    %109 = vector.load %arg8[%c0_44, %c0_45] : memref<1x32xf32, #tpu.memory_space<vmem>>, vector<1x32xf32>
    %110 = vector.broadcast %109 : vector<1x32xf32> to vector<10x32xf32>
    %111 = arith.addf %108, %110 : vector<10x32xf32>
    %c0_46 = arith.constant 0 : index
    %c0_47 = arith.constant 0 : index
    %c0_48 = arith.constant 0 : index
    %112 = vector.load %arg9[%c0_46, %c0_47, %c0_48] : memref<1x10x32xf32, #tpu.memory_space<vmem>>, vector<1x10x32xf32>
    %113 = vector.shape_cast %112 : vector<1x10x32xf32> to vector<10x32xf32>
    %114 = vector.shape_cast %111 : vector<10x32xf32> to vector<1x10x32xf32>
    tpu.vector_store %arg9[%c0_46, %c0_47, %c0_48], %114 {strides = array<i32>} : memref<1x10x32xf32, #tpu.memory_space<vmem>>, vector<1x10x32xf32>,
    return
  }
  func.func @transform_0(%arg0: i32) -> (i32, i32, i32) {
    %c0_i32 = arith.constant 0 : i32
    %c0_i32_0 = arith.constant 0 : i32
    %c0_i32_1 = arith.constant 0 : i32
    return %arg0, %c0_i32, %c0_i32_0 : i32, i32, i32
  }
  func.func @transform_1(%arg0: i32) -> (i32, i32, i32) {
    %c0_i32 = arith.constant 0 : i32
    %c0_i32_0 = arith.constant 0 : i32
    %c0_i32_1 = arith.constant 0 : i32
    return %arg0, %c0_i32, %c0_i32_0 : i32, i32, i32
  }
  func.func @transform_2(%arg0: i32) -> (i32, i32, i32) {
    %c0_i32 = arith.constant 0 : i32
    %c0_i32_0 = arith.constant 0 : i32
    %c0_i32_1 = arith.constant 0 : i32
    return %arg0, %c0_i32, %c0_i32_0 : i32, i32, i32
  }
  func.func @transform_3(%arg0: i32) -> (i32, i32) {
    %c0_i32 = arith.constant 0 : i32
    %c0_i32_0 = arith.constant 0 : i32
    %c0_i32_1 = arith.constant 0 : i32
    return %c0_i32, %c0_i32_0 : i32, i32
  }
  func.func @transform_4(%arg0: i32) -> (i32, i32) {
    %c0_i32 = arith.constant 0 : i32
    %c0_i32_0 = arith.constant 0 : i32
    %c0_i32_1 = arith.constant 0 : i32
    return %c0_i32, %c0_i32_0 : i32, i32
  }
  func.func @transform_5(%arg0: i32) -> (i32, i32) {
    %c0_i32 = arith.constant 0 : i32
    %c0_i32_0 = arith.constant 0 : i32
    %c0_i32_1 = arith.constant 0 : i32
    return %c0_i32, %c0_i32_0 : i32, i32
  }
  func.func @transform_6(%arg0: i32) -> (i32, i32) {
    %c0_i32 = arith.constant 0 : i32
    %c0_i32_0 = arith.constant 0 : i32
    %c0_i32_1 = arith.constant 0 : i32
    return %c0_i32, %c0_i32_0 : i32, i32
  }
  func.func @transform_7(%arg0: i32) -> (i32, i32) {
    %c0_i32 = arith.constant 0 : i32
    %c0_i32_0 = arith.constant 0 : i32
    %c0_i32_1 = arith.constant 0 : i32
    return %c0_i32, %c0_i32_0 : i32, i32
  }
  func.func @transform_8(%arg0: i32) -> (i32, i32, i32) {
    %c0_i32 = arith.constant 0 : i32
    %c0_i32_0 = arith.constant 0 : i32
    %c0_i32_1 = arith.constant 0 : i32
    return %arg0, %c0_i32, %c0_i32_0 : i32, i32, i32
  }
}

module attributes {stable_mosaic.version = 11 : i64} {
  func.func @_embed_kernel(%arg0: i32, %arg1: memref<2x10xi32, #tpu.memory_space<smem>>, %arg2: memref<32x32xf32, #tpu.memory_space<vmem>>, %arg3: memref<10x32xf32, #tpu.memory_space<vmem>>, %arg4: memref<1x32xf32, #tpu.memory_space<vmem>>, %arg5: memref<1x32xf32, #tpu.memory_space<vmem>>, %arg6: memref<1x10x32xf32, #tpu.memory_space<vmem>>) attributes {dimension_semantics = [#tpu.dimension_semantics<parallel>], iteration_bounds = array<i64: 2>, scalar_prefetch = 1 : i64, scratch_operands = 0 : i64, tpu.core_type = #tpu.core_type<tc>, window_params = [{pipeline_mode = #tpu.pipeline_mode<synchronous>, transform_indices = @transform_0, window_bounds = array<i64: 32, 32>}, {pipeline_mode = #tpu.pipeline_mode<synchronous>, transform_indices = @transform_1, window_bounds = array<i64: 10, 32>}, {pipeline_mode = #tpu.pipeline_mode<synchronous>, transform_indices = @transform_2, window_bounds = array<i64: 1, 32>}, {pipeline_mode = #tpu.pipeline_mode<synchronous>, transform_indices = @transform_3, window_bounds = array<i64: 1, 32>}, {transform_indices = @transform_4, window_bounds = array<i64: 1, 10, 32>}]} {
    %0 = arith.index_cast %arg0 : i32 to index
    %c0 = arith.constant 0 : index
    %1 = memref.load %arg1[%0, %c0] : memref<2x10xi32, #tpu.memory_space<smem>>
    %2 = arith.index_cast %1 : i32 to index
    %c0_0 = arith.constant 0 : index
    %3 = vector.load %arg2[%2, %c0_0] : memref<32x32xf32, #tpu.memory_space<vmem>>, vector<1x32xf32>
    %4 = arith.index_cast %arg0 : i32 to index
    %c1 = arith.constant 1 : index
    %5 = memref.load %arg1[%4, %c1] : memref<2x10xi32, #tpu.memory_space<smem>>
    %6 = arith.index_cast %5 : i32 to index
    %c0_1 = arith.constant 0 : index
    %7 = vector.load %arg2[%6, %c0_1] : memref<32x32xf32, #tpu.memory_space<vmem>>, vector<1x32xf32>
    %8 = arith.index_cast %arg0 : i32 to index
    %c2 = arith.constant 2 : index
    %9 = memref.load %arg1[%8, %c2] : memref<2x10xi32, #tpu.memory_space<smem>>
    %10 = arith.index_cast %9 : i32 to index
    %c0_2 = arith.constant 0 : index
    %11 = vector.load %arg2[%10, %c0_2] : memref<32x32xf32, #tpu.memory_space<vmem>>, vector<1x32xf32>
    %12 = arith.index_cast %arg0 : i32 to index
    %c3 = arith.constant 3 : index
    %13 = memref.load %arg1[%12, %c3] : memref<2x10xi32, #tpu.memory_space<smem>>
    %14 = arith.index_cast %13 : i32 to index
    %c0_3 = arith.constant 0 : index
    %15 = vector.load %arg2[%14, %c0_3] : memref<32x32xf32, #tpu.memory_space<vmem>>, vector<1x32xf32>
    %16 = arith.index_cast %arg0 : i32 to index
    %c4 = arith.constant 4 : index
    %17 = memref.load %arg1[%16, %c4] : memref<2x10xi32, #tpu.memory_space<smem>>
    %18 = arith.index_cast %17 : i32 to index
    %c0_4 = arith.constant 0 : index
    %19 = vector.load %arg2[%18, %c0_4] : memref<32x32xf32, #tpu.memory_space<vmem>>, vector<1x32xf32>
    %20 = arith.index_cast %arg0 : i32 to index
    %c5 = arith.constant 5 : index
    %21 = memref.load %arg1[%20, %c5] : memref<2x10xi32, #tpu.memory_space<smem>>
    %22 = arith.index_cast %21 : i32 to index
    %c0_5 = arith.constant 0 : index
    %23 = vector.load %arg2[%22, %c0_5] : memref<32x32xf32, #tpu.memory_space<vmem>>, vector<1x32xf32>
    %24 = arith.index_cast %arg0 : i32 to index
    %c6 = arith.constant 6 : index
    %25 = memref.load %arg1[%24, %c6] : memref<2x10xi32, #tpu.memory_space<smem>>
    %26 = arith.index_cast %25 : i32 to index
    %c0_6 = arith.constant 0 : index
    %27 = vector.load %arg2[%26, %c0_6] : memref<32x32xf32, #tpu.memory_space<vmem>>, vector<1x32xf32>
    %28 = arith.index_cast %arg0 : i32 to index
    %c7 = arith.constant 7 : index
    %29 = memref.load %arg1[%28, %c7] : memref<2x10xi32, #tpu.memory_space<smem>>
    %30 = arith.index_cast %29 : i32 to index
    %c0_7 = arith.constant 0 : index
    %31 = vector.load %arg2[%30, %c0_7] : memref<32x32xf32, #tpu.memory_space<vmem>>, vector<1x32xf32>
    %32 = arith.index_cast %arg0 : i32 to index
    %c8 = arith.constant 8 : index
    %33 = memref.load %arg1[%32, %c8] : memref<2x10xi32, #tpu.memory_space<smem>>
    %34 = arith.index_cast %33 : i32 to index
    %c0_8 = arith.constant 0 : index
    %35 = vector.load %arg2[%34, %c0_8] : memref<32x32xf32, #tpu.memory_space<vmem>>, vector<1x32xf32>
    %36 = arith.index_cast %arg0 : i32 to index
    %c9 = arith.constant 9 : index
    %37 = memref.load %arg1[%36, %c9] : memref<2x10xi32, #tpu.memory_space<smem>>
    %38 = arith.index_cast %37 : i32 to index
    %c0_9 = arith.constant 0 : index
    %39 = vector.load %arg2[%38, %c0_9] : memref<32x32xf32, #tpu.memory_space<vmem>>, vector<1x32xf32>
    %40 = tpu.concatenate %3, %7, %11, %15, %19, %23, %27, %31, %35, %39 in 0 : vector<1x32xf32>, vector<1x32xf32>, vector<1x32xf32>, vector<1x32xf32>, vector<1x32xf32>, vector<1x32xf32>, vector<1x32xf32>, vector<1x32xf32>, vector<1x32xf32>, vector<1x32xf32> -> vector<10x32xf32>
    %c0_10 = arith.constant 0 : index
    %c0_11 = arith.constant 0 : index
    %41 = vector.load %arg3[%c0_10, %c0_11] : memref<10x32xf32, #tpu.memory_space<vmem>>, vector<10x32xf32>
    %42 = arith.addf %40, %41 : vector<10x32xf32>
    %cst = arith.constant dense<0.000000e+00> : vector<10xf32>
    %43 = vector.multi_reduction <add>, %42, %cst [1] : vector<10x32xf32> to vector<10xf32>
    %44 = vector.shape_cast %43 : vector<10xf32> to vector<10x1xf32>
    %cst_12 = arith.constant 3.200000e+01 : f32
    %45 = vector.broadcast %cst_12 : f32 to vector<10x1xf32>
    %46 = arith.divf %44, %45 : vector<10x1xf32>
    %47 = vector.broadcast %46 : vector<10x1xf32> to vector<10x32xf32>
    %48 = arith.subf %42, %47 : vector<10x32xf32>
    %49 = arith.mulf %48, %48 : vector<10x32xf32>
    %cst_13 = arith.constant dense<0.000000e+00> : vector<10xf32>
    %50 = vector.multi_reduction <add>, %49, %cst_13 [1] : vector<10x32xf32> to vector<10xf32>
    %51 = vector.shape_cast %50 : vector<10xf32> to vector<10x1xf32>
    %cst_14 = arith.constant 3.200000e+01 : f32
    %52 = vector.broadcast %cst_14 : f32 to vector<10x1xf32>
    %53 = arith.divf %51, %52 : vector<10x1xf32>
    %54 = vector.broadcast %46 : vector<10x1xf32> to vector<10x32xf32>
    %55 = arith.subf %42, %54 : vector<10x32xf32>
    %cst_15 = arith.constant 9.99999997E-7 : f32
    %56 = vector.broadcast %cst_15 : f32 to vector<10x1xf32>
    %57 = arith.addf %53, %56 : vector<10x1xf32>
    %58 = math.rsqrt %57 : vector<10x1xf32>
    %59 = vector.broadcast %58 : vector<10x1xf32> to vector<10x32xf32>
    %60 = arith.mulf %55, %59 : vector<10x32xf32>
    %c0_16 = arith.constant 0 : index
    %c0_17 = arith.constant 0 : index
    %61 = vector.load %arg4[%c0_16, %c0_17] : memref<1x32xf32, #tpu.memory_space<vmem>>, vector<1x32xf32>
    %62 = vector.broadcast %61 : vector<1x32xf32> to vector<10x32xf32>
    %63 = arith.mulf %60, %62 : vector<10x32xf32>
    %c0_18 = arith.constant 0 : index
    %c0_19 = arith.constant 0 : index
    %64 = vector.load %arg5[%c0_18, %c0_19] : memref<1x32xf32, #tpu.memory_space<vmem>>, vector<1x32xf32>
    %65 = vector.broadcast %64 : vector<1x32xf32> to vector<10x32xf32>
    %66 = arith.addf %63, %65 : vector<10x32xf32>
    %c0_20 = arith.constant 0 : index
    %c0_21 = arith.constant 0 : index
    %c0_22 = arith.constant 0 : index
    %67 = vector.load %arg6[%c0_20, %c0_21, %c0_22] : memref<1x10x32xf32, #tpu.memory_space<vmem>>, vector<1x10x32xf32>
    %68 = vector.shape_cast %67 : vector<1x10x32xf32> to vector<10x32xf32>
    %69 = vector.shape_cast %66 : vector<10x32xf32> to vector<1x10x32xf32>
    tpu.vector_store %arg6[%c0_20, %c0_21, %c0_22], %69 {strides = array<i32>} : memref<1x10x32xf32, #tpu.memory_space<vmem>>, vector<1x10x32xf32>,
    return
  }
  func.func @transform_0(%arg0: i32, %arg1: memref<2x10xi32, #tpu.memory_space<smem>>) -> (i32, i32) {
    %c0_i32 = arith.constant 0 : i32
    %c0_i32_0 = arith.constant 0 : i32
    %c0_i32_1 = arith.constant 0 : i32
    return %c0_i32, %c0_i32_0 : i32, i32
  }
  func.func @transform_1(%arg0: i32, %arg1: memref<2x10xi32, #tpu.memory_space<smem>>) -> (i32, i32) {
    %c0_i32 = arith.constant 0 : i32
    %c0_i32_0 = arith.constant 0 : i32
    %c0_i32_1 = arith.constant 0 : i32
    return %c0_i32, %c0_i32_0 : i32, i32
  }
  func.func @transform_2(%arg0: i32, %arg1: memref<2x10xi32, #tpu.memory_space<smem>>) -> (i32, i32) {
    %c0_i32 = arith.constant 0 : i32
    %c0_i32_0 = arith.constant 0 : i32
    %c0_i32_1 = arith.constant 0 : i32
    return %c0_i32, %c0_i32_0 : i32, i32
  }
  func.func @transform_3(%arg0: i32, %arg1: memref<2x10xi32, #tpu.memory_space<smem>>) -> (i32, i32) {
    %c0_i32 = arith.constant 0 : i32
    %c0_i32_0 = arith.constant 0 : i32
    %c0_i32_1 = arith.constant 0 : i32
    return %c0_i32, %c0_i32_0 : i32, i32
  }
  func.func @transform_4(%arg0: i32, %arg1: memref<2x10xi32, #tpu.memory_space<smem>>) -> (i32, i32, i32) {
    %c0_i32 = arith.constant 0 : i32
    %c0_i32_0 = arith.constant 0 : i32
    %c0_i32_1 = arith.constant 0 : i32
    return %arg0, %c0_i32, %c0_i32_0 : i32, i32, i32
  }
}

module attributes {stable_mosaic.version = 11 : i64} {
  func.func @_ffn_kernel(%arg0: i32, %arg1: memref<1x10x32xf32, #tpu.memory_space<vmem>>, %arg2: memref<32x64xf32, #tpu.memory_space<vmem>>, %arg3: memref<1x64xf32, #tpu.memory_space<vmem>>, %arg4: memref<64x32xf32, #tpu.memory_space<vmem>>, %arg5: memref<1x32xf32, #tpu.memory_space<vmem>>, %arg6: memref<1x32xf32, #tpu.memory_space<vmem>>, %arg7: memref<1x32xf32, #tpu.memory_space<vmem>>, %arg8: memref<1x10x32xf32, #tpu.memory_space<vmem>>) attributes {dimension_semantics = [#tpu.dimension_semantics<parallel>], iteration_bounds = array<i64: 2>, scalar_prefetch = 0 : i64, scratch_operands = 0 : i64, tpu.core_type = #tpu.core_type<tc>, window_params = [{transform_indices = @transform_0, window_bounds = array<i64: 1, 10, 32>}, {pipeline_mode = #tpu.pipeline_mode<synchronous>, transform_indices = @transform_1, window_bounds = array<i64: 32, 64>}, {pipeline_mode = #tpu.pipeline_mode<synchronous>, transform_indices = @transform_2, window_bounds = array<i64: 1, 64>}, {pipeline_mode = #tpu.pipeline_mode<synchronous>, transform_indices = @transform_3, window_bounds = array<i64: 64, 32>}, {pipeline_mode = #tpu.pipeline_mode<synchronous>, transform_indices = @transform_4, window_bounds = array<i64: 1, 32>}, {pipeline_mode = #tpu.pipeline_mode<synchronous>, transform_indices = @transform_5, window_bounds = array<i64: 1, 32>}, {pipeline_mode = #tpu.pipeline_mode<synchronous>, transform_indices = @transform_6, window_bounds = array<i64: 1, 32>}, {transform_indices = @transform_7, window_bounds = array<i64: 1, 10, 32>}]} {
    %c0 = arith.constant 0 : index
    %c0_0 = arith.constant 0 : index
    %c0_1 = arith.constant 0 : index
    %0 = vector.load %arg1[%c0, %c0_0, %c0_1] : memref<1x10x32xf32, #tpu.memory_space<vmem>>, vector<1x10x32xf32>
    %1 = vector.shape_cast %0 : vector<1x10x32xf32> to vector<10x32xf32>
    %c0_2 = arith.constant 0 : index
    %c0_3 = arith.constant 0 : index
    %2 = vector.load %arg2[%c0_2, %c0_3] : memref<32x64xf32, #tpu.memory_space<vmem>>, vector<32x64xf32>
    %cst = arith.constant dense<0.000000e+00> : vector<10x64xf32>
    %3 = tpu.matmul %1, %2, %cst {dimension_numbers = #tpu.dot_dimension_numbers<[1], [0], [0], [1], [0, 0, 1, 1], [], []>} : vector<10x32xf32>, vector<32x64xf32>, vector<10x64xf32> -> vector<10x64xf32>
    %c0_4 = arith.constant 0 : index
    %c0_5 = arith.constant 0 : index
    %4 = vector.load %arg3[%c0_4, %c0_5] : memref<1x64xf32, #tpu.memory_space<vmem>>, vector<1x64xf32>
    %5 = vector.broadcast %4 : vector<1x64xf32> to vector<10x64xf32>
    %6 = arith.addf %3, %5 : vector<10x64xf32>
    %cst_6 = arith.constant 0.000000e+00 : f32
    %7 = vector.broadcast %cst_6 : f32 to vector<10x64xf32>
    %8 = arith.maximumf %6, %7 : vector<10x64xf32>
    %c0_7 = arith.constant 0 : index
    %c0_8 = arith.constant 0 : index
    %9 = vector.load %arg4[%c0_7, %c0_8] : memref<64x32xf32, #tpu.memory_space<vmem>>, vector<64x32xf32>
    %cst_9 = arith.constant dense<0.000000e+00> : vector<10x32xf32>
    %10 = tpu.matmul %8, %9, %cst_9 {dimension_numbers = #tpu.dot_dimension_numbers<[1], [0], [0], [1], [0, 0, 1, 1], [], []>} : vector<10x64xf32>, vector<64x32xf32>, vector<10x32xf32> -> vector<10x32xf32>
    %c0_10 = arith.constant 0 : index
    %c0_11 = arith.constant 0 : index
    %11 = vector.load %arg5[%c0_10, %c0_11] : memref<1x32xf32, #tpu.memory_space<vmem>>, vector<1x32xf32>
    %12 = vector.broadcast %11 : vector<1x32xf32> to vector<10x32xf32>
    %13 = arith.addf %10, %12 : vector<10x32xf32>
    %14 = arith.addf %13, %1 : vector<10x32xf32>
    %cst_12 = arith.constant dense<0.000000e+00> : vector<10xf32>
    %15 = vector.multi_reduction <add>, %14, %cst_12 [1] : vector<10x32xf32> to vector<10xf32>
    %16 = vector.shape_cast %15 : vector<10xf32> to vector<10x1xf32>
    %cst_13 = arith.constant 3.200000e+01 : f32
    %17 = vector.broadcast %cst_13 : f32 to vector<10x1xf32>
    %18 = arith.divf %16, %17 : vector<10x1xf32>
    %19 = vector.broadcast %18 : vector<10x1xf32> to vector<10x32xf32>
    %20 = arith.subf %14, %19 : vector<10x32xf32>
    %21 = arith.mulf %20, %20 : vector<10x32xf32>
    %cst_14 = arith.constant dense<0.000000e+00> : vector<10xf32>
    %22 = vector.multi_reduction <add>, %21, %cst_14 [1] : vector<10x32xf32> to vector<10xf32>
    %23 = vector.shape_cast %22 : vector<10xf32> to vector<10x1xf32>
    %cst_15 = arith.constant 3.200000e+01 : f32
    %24 = vector.broadcast %cst_15 : f32 to vector<10x1xf32>
    %25 = arith.divf %23, %24 : vector<10x1xf32>
    %26 = vector.broadcast %18 : vector<10x1xf32> to vector<10x32xf32>
    %27 = arith.subf %14, %26 : vector<10x32xf32>
    %cst_16 = arith.constant 9.99999997E-7 : f32
    %28 = vector.broadcast %cst_16 : f32 to vector<10x1xf32>
    %29 = arith.addf %25, %28 : vector<10x1xf32>
    %30 = math.rsqrt %29 : vector<10x1xf32>
    %31 = vector.broadcast %30 : vector<10x1xf32> to vector<10x32xf32>
    %32 = arith.mulf %27, %31 : vector<10x32xf32>
    %c0_17 = arith.constant 0 : index
    %c0_18 = arith.constant 0 : index
    %33 = vector.load %arg6[%c0_17, %c0_18] : memref<1x32xf32, #tpu.memory_space<vmem>>, vector<1x32xf32>
    %34 = vector.broadcast %33 : vector<1x32xf32> to vector<10x32xf32>
    %35 = arith.mulf %32, %34 : vector<10x32xf32>
    %c0_19 = arith.constant 0 : index
    %c0_20 = arith.constant 0 : index
    %36 = vector.load %arg7[%c0_19, %c0_20] : memref<1x32xf32, #tpu.memory_space<vmem>>, vector<1x32xf32>
    %37 = vector.broadcast %36 : vector<1x32xf32> to vector<10x32xf32>
    %38 = arith.addf %35, %37 : vector<10x32xf32>
    %c0_21 = arith.constant 0 : index
    %c0_22 = arith.constant 0 : index
    %c0_23 = arith.constant 0 : index
    %39 = vector.load %arg8[%c0_21, %c0_22, %c0_23] : memref<1x10x32xf32, #tpu.memory_space<vmem>>, vector<1x10x32xf32>
    %40 = vector.shape_cast %39 : vector<1x10x32xf32> to vector<10x32xf32>
    %41 = vector.shape_cast %38 : vector<10x32xf32> to vector<1x10x32xf32>
    tpu.vector_store %arg8[%c0_21, %c0_22, %c0_23], %41 {strides = array<i32>} : memref<1x10x32xf32, #tpu.memory_space<vmem>>, vector<1x10x32xf32>,
    return
  }
  func.func @transform_0(%arg0: i32) -> (i32, i32, i32) {
    %c0_i32 = arith.constant 0 : i32
    %c0_i32_0 = arith.constant 0 : i32
    %c0_i32_1 = arith.constant 0 : i32
    return %arg0, %c0_i32, %c0_i32_0 : i32, i32, i32
  }
  func.func @transform_1(%arg0: i32) -> (i32, i32) {
    %c0_i32 = arith.constant 0 : i32
    %c0_i32_0 = arith.constant 0 : i32
    %c0_i32_1 = arith.constant 0 : i32
    return %c0_i32, %c0_i32_0 : i32, i32
  }
  func.func @transform_2(%arg0: i32) -> (i32, i32) {
    %c0_i32 = arith.constant 0 : i32
    %c0_i32_0 = arith.constant 0 : i32
    %c0_i32_1 = arith.constant 0 : i32
    return %c0_i32, %c0_i32_0 : i32, i32
  }
  func.func @transform_3(%arg0: i32) -> (i32, i32) {
    %c0_i32 = arith.constant 0 : i32
    %c0_i32_0 = arith.constant 0 : i32
    %c0_i32_1 = arith.constant 0 : i32
    return %c0_i32, %c0_i32_0 : i32, i32
  }
  func.func @transform_4(%arg0: i32) -> (i32, i32) {
    %c0_i32 = arith.constant 0 : i32
    %c0_i32_0 = arith.constant 0 : i32
    %c0_i32_1 = arith.constant 0 : i32
    return %c0_i32, %c0_i32_0 : i32, i32
  }
  func.func @transform_5(%arg0: i32) -> (i32, i32) {
    %c0_i32 = arith.constant 0 : i32
    %c0_i32_0 = arith.constant 0 : i32
    %c0_i32_1 = arith.constant 0 : i32
    return %c0_i32, %c0_i32_0 : i32, i32
  }
  func.func @transform_6(%arg0: i32) -> (i32, i32) {
    %c0_i32 = arith.constant 0 : i32
    %c0_i32_0 = arith.constant 0 : i32
    %c0_i32_1 = arith.constant 0 : i32
    return %c0_i32, %c0_i32_0 : i32, i32
  }
  func.func @transform_7(%arg0: i32) -> (i32, i32, i32) {
    %c0_i32 = arith.constant 0 : i32
    %c0_i32_0 = arith.constant 0 : i32
    %c0_i32_1 = arith.constant 0 : i32
    return %arg0, %c0_i32, %c0_i32_0 : i32, i32, i32
  }
}

module attributes {stable_mosaic.version = 11 : i64} {
  func.func @_mha_kernel(%arg0: i32, %arg1: memref<1x10x32xf32, #tpu.memory_space<vmem>>, %arg2: memref<1x10x32xf32, #tpu.memory_space<vmem>>, %arg3: memref<1x1x10xi32, #tpu.memory_space<vmem>>, %arg4: memref<32x32xf32, #tpu.memory_space<vmem>>, %arg5: memref<32x64xf32, #tpu.memory_space<vmem>>, %arg6: memref<32x32xf32, #tpu.memory_space<vmem>>, %arg7: memref<1x32xf32, #tpu.memory_space<vmem>>, %arg8: memref<1x32xf32, #tpu.memory_space<vmem>>, %arg9: memref<1x10x32xf32, #tpu.memory_space<vmem>>) attributes {dimension_semantics = [#tpu.dimension_semantics<parallel>], iteration_bounds = array<i64: 2>, scalar_prefetch = 0 : i64, scratch_operands = 0 : i64, tpu.core_type = #tpu.core_type<tc>, window_params = [{transform_indices = @transform_0, window_bounds = array<i64: 1, 10, 32>}, {transform_indices = @transform_1, window_bounds = array<i64: 1, 10, 32>}, {transform_indices = @transform_2, window_bounds = array<i64: 1, 1, 10>}, {pipeline_mode = #tpu.pipeline_mode<synchronous>, transform_indices = @transform_3, window_bounds = array<i64: 32, 32>}, {pipeline_mode = #tpu.pipeline_mode<synchronous>, transform_indices = @transform_4, window_bounds = array<i64: 32, 64>}, {pipeline_mode = #tpu.pipeline_mode<synchronous>, transform_indices = @transform_5, window_bounds = array<i64: 32, 32>}, {pipeline_mode = #tpu.pipeline_mode<synchronous>, transform_indices = @transform_6, window_bounds = array<i64: 1, 32>}, {pipeline_mode = #tpu.pipeline_mode<synchronous>, transform_indices = @transform_7, window_bounds = array<i64: 1, 32>}, {transform_indices = @transform_8, window_bounds = array<i64: 1, 10, 32>}]} {
    %c0 = arith.constant 0 : index
    %c0_0 = arith.constant 0 : index
    %c0_1 = arith.constant 0 : index
    %0 = vector.load %arg1[%c0, %c0_0, %c0_1] : memref<1x10x32xf32, #tpu.memory_space<vmem>>, vector<1x10x32xf32>
    %1 = vector.shape_cast %0 : vector<1x10x32xf32> to vector<10x32xf32>
    %c0_2 = arith.constant 0 : index
    %c0_3 = arith.constant 0 : index
    %c0_4 = arith.constant 0 : index
    %2 = vector.load %arg2[%c0_2, %c0_3, %c0_4] : memref<1x10x32xf32, #tpu.memory_space<vmem>>, vector<1x10x32xf32>
    %3 = vector.shape_cast %2 : vector<1x10x32xf32> to vector<10x32xf32>
    %c0_5 = arith.constant 0 : index
    %c0_6 = arith.constant 0 : index
    %4 = vector.load %arg4[%c0_5, %c0_6] : memref<32x32xf32, #tpu.memory_space<vmem>>, vector<32x32xf32>
    %cst = arith.constant dense<0.000000e+00> : vector<10x32xf32>
    %5 = tpu.matmul %1, %4, %cst {dimension_numbers = #tpu.dot_dimension_numbers<[1], [0], [0], [1], [0, 0, 1, 1], [], []>} : vector<10x32xf32>, vector<32x32xf32>, vector<10x32xf32> -> vector<10x32xf32>
    %cst_7 = arith.constant 0.353553385 : f32
    %6 = vector.broadcast %cst_7 : f32 to vector<10x32xf32>
    %7 = arith.mulf %5, %6 : vector<10x32xf32>
    %c0_8 = arith.constant 0 : index
    %c0_9 = arith.constant 0 : index
    %8 = vector.load %arg5[%c0_8, %c0_9] : memref<32x64xf32, #tpu.memory_space<vmem>>, vector<32x64xf32>
    %cst_10 = arith.constant dense<0.000000e+00> : vector<10x64xf32>
    %9 = tpu.matmul %3, %8, %cst_10 {dimension_numbers = #tpu.dot_dimension_numbers<[1], [0], [0], [1], [0, 0, 1, 1], [], []>} : vector<10x32xf32>, vector<32x64xf32>, vector<10x64xf32> -> vector<10x64xf32>
    %c0_11 = arith.constant 0 : index
    %c0_12 = arith.constant 0 : index
    %c0_13 = arith.constant 0 : index
    %10 = vector.load %arg3[%c0_11, %c0_12, %c0_13] : memref<1x1x10xi32, #tpu.memory_space<vmem>>, vector<1x1x10xi32>
    %11 = vector.shape_cast %10 : vector<1x1x10xi32> to vector<1x10xi32>
    %c0_i32 = arith.constant 0 : i32
    %12 = vector.broadcast %c0_i32 : i32 to vector<1x10xi32>
    %13 = arith.cmpi ne, %11, %12 : vector<1x10xi32>
    %14 = vector.shape_cast %13 : vector<1x10xi1> to vector<1x10xi1>
    %15 = vector.broadcast %14 : vector<1x10xi1> to vector<10x10xi1>
    %16 = vector.extract_strided_slice %7 {offsets = [0, 0], sizes = [10, 8], strides = [1, 1]} : vector<10x32xf32> to vector<10x8xf32>
    %17 = vector.extract_strided_slice %9 {offsets = [0, 0], sizes = [10, 8], strides = [1, 1]} : vector<10x64xf32> to vector<10x8xf32>
    %18 = vector.extract_strided_slice %9 {offsets = [0, 32], sizes = [10, 8], strides = [1, 1]} : vector<10x64xf32> to vector<10x8xf32>
    %cst_14 = arith.constant dense<0.000000e+00> : vector<10x10xf32>
    %19 = tpu.matmul %16, %17, %cst_14 {dimension_numbers = #tpu.dot_dimension_numbers<[1], [1], [0], [0], [0, 0, 1, 0], [], []>} : vector<10x8xf32>, vector<10x8xf32>, vector<10x10xf32> -> vector<10x10xf32>
    %cst_15 = arith.constant -1.000000e+09 : f32
    %20 = vector.broadcast %cst_15 : f32 to vector<10x10xf32>
    %21 = arith.select %15, %19, %20 : vector<10x10xi1>, vector<10x10xf32>
    %cst_16 = arith.constant dense<0xFF800000> : vector<10xf32>
    %22 = vector.multi_reduction <maximumf>, %21, %cst_16 [1] : vector<10x10xf32> to vector<10xf32>
    %23 = vector.shape_cast %22 : vector<10xf32> to vector<10x1xf32>
    %24 = vector.broadcast %23 : vector<10x1xf32> to vector<10x10xf32>
    %25 = arith.subf %21, %24 : vector<10x10xf32>
    %26 = math.exp %25 : vector<10x10xf32>
    %cst_17 = arith.constant dense<0.000000e+00> : vector<10xf32>
    %27 = vector.multi_reduction <add>, %26, %cst_17 [1] : vector<10x10xf32> to vector<10xf32>
    %28 = vector.shape_cast %27 : vector<10xf32> to vector<10x1xf32>
    %29 = tpu.reciprocal %28 {approx = true} : vector<10x1xf32> -> vector<10x1xf32>
    %30 = vector.broadcast %29 : vector<10x1xf32> to vector<10x10xf32>
    %31 = arith.mulf %26, %30 : vector<10x10xf32>
    %cst_18 = arith.constant dense<0.000000e+00> : vector<10x8xf32>
    %32 = tpu.matmul %31, %18, %cst_18 {dimension_numbers = #tpu.dot_dimension_numbers<[1], [0], [0], [1], [0, 0, 1, 1], [], []>} : vector<10x10xf32>, vector<10x8xf32>, vector<10x8xf32> -> vector<10x8xf32>
    %33 = vector.extract_strided_slice %7 {offsets = [0, 8], sizes = [10, 8], strides = [1, 1]} : vector<10x32xf32> to vector<10x8xf32>
    %34 = vector.extract_strided_slice %9 {offsets = [0, 8], sizes = [10, 8], strides = [1, 1]} : vector<10x64xf32> to vector<10x8xf32>
    %35 = vector.extract_strided_slice %9 {offsets = [0, 40], sizes = [10, 8], strides = [1, 1]} : vector<10x64xf32> to vector<10x8xf32>
    %cst_19 = arith.constant dense<0.000000e+00> : vector<10x10xf32>
    %36 = tpu.matmul %33, %34, %cst_19 {dimension_numbers = #tpu.dot_dimension_numbers<[1], [1], [0], [0], [0, 0, 1, 0], [], []>} : vector<10x8xf32>, vector<10x8xf32>, vector<10x10xf32> -> vector<10x10xf32>
    %cst_20 = arith.constant -1.000000e+09 : f32
    %37 = vector.broadcast %cst_20 : f32 to vector<10x10xf32>
    %38 = arith.select %15, %36, %37 : vector<10x10xi1>, vector<10x10xf32>
    %cst_21 = arith.constant dense<0xFF800000> : vector<10xf32>
    %39 = vector.multi_reduction <maximumf>, %38, %cst_21 [1] : vector<10x10xf32> to vector<10xf32>
    %40 = vector.shape_cast %39 : vector<10xf32> to vector<10x1xf32>
    %41 = vector.broadcast %40 : vector<10x1xf32> to vector<10x10xf32>
    %42 = arith.subf %38, %41 : vector<10x10xf32>
    %43 = math.exp %42 : vector<10x10xf32>
    %cst_22 = arith.constant dense<0.000000e+00> : vector<10xf32>
    %44 = vector.multi_reduction <add>, %43, %cst_22 [1] : vector<10x10xf32> to vector<10xf32>
    %45 = vector.shape_cast %44 : vector<10xf32> to vector<10x1xf32>
    %46 = tpu.reciprocal %45 {approx = true} : vector<10x1xf32> -> vector<10x1xf32>
    %47 = vector.broadcast %46 : vector<10x1xf32> to vector<10x10xf32>
    %48 = arith.mulf %43, %47 : vector<10x10xf32>
    %cst_23 = arith.constant dense<0.000000e+00> : vector<10x8xf32>
    %49 = tpu.matmul %48, %35, %cst_23 {dimension_numbers = #tpu.dot_dimension_numbers<[1], [0], [0], [1], [0, 0, 1, 1], [], []>} : vector<10x10xf32>, vector<10x8xf32>, vector<10x8xf32> -> vector<10x8xf32>
    %50 = vector.extract_strided_slice %7 {offsets = [0, 16], sizes = [10, 8], strides = [1, 1]} : vector<10x32xf32> to vector<10x8xf32>
    %51 = vector.extract_strided_slice %9 {offsets = [0, 16], sizes = [10, 8], strides = [1, 1]} : vector<10x64xf32> to vector<10x8xf32>
    %52 = vector.extract_strided_slice %9 {offsets = [0, 48], sizes = [10, 8], strides = [1, 1]} : vector<10x64xf32> to vector<10x8xf32>
    %cst_24 = arith.constant dense<0.000000e+00> : vector<10x10xf32>
    %53 = tpu.matmul %50, %51, %cst_24 {dimension_numbers = #tpu.dot_dimension_numbers<[1], [1], [0], [0], [0, 0, 1, 0], [], []>} : vector<10x8xf32>, vector<10x8xf32>, vector<10x10xf32> -> vector<10x10xf32>
    %cst_25 = arith.constant -1.000000e+09 : f32
    %54 = vector.broadcast %cst_25 : f32 to vector<10x10xf32>
    %55 = arith.select %15, %53, %54 : vector<10x10xi1>, vector<10x10xf32>
    %cst_26 = arith.constant dense<0xFF800000> : vector<10xf32>
    %56 = vector.multi_reduction <maximumf>, %55, %cst_26 [1] : vector<10x10xf32> to vector<10xf32>
    %57 = vector.shape_cast %56 : vector<10xf32> to vector<10x1xf32>
    %58 = vector.broadcast %57 : vector<10x1xf32> to vector<10x10xf32>
    %59 = arith.subf %55, %58 : vector<10x10xf32>
    %60 = math.exp %59 : vector<10x10xf32>
    %cst_27 = arith.constant dense<0.000000e+00> : vector<10xf32>
    %61 = vector.multi_reduction <add>, %60, %cst_27 [1] : vector<10x10xf32> to vector<10xf32>
    %62 = vector.shape_cast %61 : vector<10xf32> to vector<10x1xf32>
    %63 = tpu.reciprocal %62 {approx = true} : vector<10x1xf32> -> vector<10x1xf32>
    %64 = vector.broadcast %63 : vector<10x1xf32> to vector<10x10xf32>
    %65 = arith.mulf %60, %64 : vector<10x10xf32>
    %cst_28 = arith.constant dense<0.000000e+00> : vector<10x8xf32>
    %66 = tpu.matmul %65, %52, %cst_28 {dimension_numbers = #tpu.dot_dimension_numbers<[1], [0], [0], [1], [0, 0, 1, 1], [], []>} : vector<10x10xf32>, vector<10x8xf32>, vector<10x8xf32> -> vector<10x8xf32>
    %67 = vector.extract_strided_slice %7 {offsets = [0, 24], sizes = [10, 8], strides = [1, 1]} : vector<10x32xf32> to vector<10x8xf32>
    %68 = vector.extract_strided_slice %9 {offsets = [0, 24], sizes = [10, 8], strides = [1, 1]} : vector<10x64xf32> to vector<10x8xf32>
    %69 = vector.extract_strided_slice %9 {offsets = [0, 56], sizes = [10, 8], strides = [1, 1]} : vector<10x64xf32> to vector<10x8xf32>
    %cst_29 = arith.constant dense<0.000000e+00> : vector<10x10xf32>
    %70 = tpu.matmul %67, %68, %cst_29 {dimension_numbers = #tpu.dot_dimension_numbers<[1], [1], [0], [0], [0, 0, 1, 0], [], []>} : vector<10x8xf32>, vector<10x8xf32>, vector<10x10xf32> -> vector<10x10xf32>
    %cst_30 = arith.constant -1.000000e+09 : f32
    %71 = vector.broadcast %cst_30 : f32 to vector<10x10xf32>
    %72 = arith.select %15, %70, %71 : vector<10x10xi1>, vector<10x10xf32>
    %cst_31 = arith.constant dense<0xFF800000> : vector<10xf32>
    %73 = vector.multi_reduction <maximumf>, %72, %cst_31 [1] : vector<10x10xf32> to vector<10xf32>
    %74 = vector.shape_cast %73 : vector<10xf32> to vector<10x1xf32>
    %75 = vector.broadcast %74 : vector<10x1xf32> to vector<10x10xf32>
    %76 = arith.subf %72, %75 : vector<10x10xf32>
    %77 = math.exp %76 : vector<10x10xf32>
    %cst_32 = arith.constant dense<0.000000e+00> : vector<10xf32>
    %78 = vector.multi_reduction <add>, %77, %cst_32 [1] : vector<10x10xf32> to vector<10xf32>
    %79 = vector.shape_cast %78 : vector<10xf32> to vector<10x1xf32>
    %80 = tpu.reciprocal %79 {approx = true} : vector<10x1xf32> -> vector<10x1xf32>
    %81 = vector.broadcast %80 : vector<10x1xf32> to vector<10x10xf32>
    %82 = arith.mulf %77, %81 : vector<10x10xf32>
    %cst_33 = arith.constant dense<0.000000e+00> : vector<10x8xf32>
    %83 = tpu.matmul %82, %69, %cst_33 {dimension_numbers = #tpu.dot_dimension_numbers<[1], [0], [0], [1], [0, 0, 1, 1], [], []>} : vector<10x10xf32>, vector<10x8xf32>, vector<10x8xf32> -> vector<10x8xf32>
    %84 = tpu.concatenate %32, %49, %66, %83 in 1 : vector<10x8xf32>, vector<10x8xf32>, vector<10x8xf32>, vector<10x8xf32> -> vector<10x32xf32>
    %c0_34 = arith.constant 0 : index
    %c0_35 = arith.constant 0 : index
    %85 = vector.load %arg6[%c0_34, %c0_35] : memref<32x32xf32, #tpu.memory_space<vmem>>, vector<32x32xf32>
    %cst_36 = arith.constant dense<0.000000e+00> : vector<10x32xf32>
    %86 = tpu.matmul %84, %85, %cst_36 {dimension_numbers = #tpu.dot_dimension_numbers<[1], [0], [0], [1], [0, 0, 1, 1], [], []>} : vector<10x32xf32>, vector<32x32xf32>, vector<10x32xf32> -> vector<10x32xf32>
    %87 = arith.addf %86, %1 : vector<10x32xf32>
    %cst_37 = arith.constant dense<0.000000e+00> : vector<10xf32>
    %88 = vector.multi_reduction <add>, %87, %cst_37 [1] : vector<10x32xf32> to vector<10xf32>
    %89 = vector.shape_cast %88 : vector<10xf32> to vector<10x1xf32>
    %cst_38 = arith.constant 3.200000e+01 : f32
    %90 = vector.broadcast %cst_38 : f32 to vector<10x1xf32>
    %91 = arith.divf %89, %90 : vector<10x1xf32>
    %92 = vector.broadcast %91 : vector<10x1xf32> to vector<10x32xf32>
    %93 = arith.subf %87, %92 : vector<10x32xf32>
    %94 = arith.mulf %93, %93 : vector<10x32xf32>
    %cst_39 = arith.constant dense<0.000000e+00> : vector<10xf32>
    %95 = vector.multi_reduction <add>, %94, %cst_39 [1] : vector<10x32xf32> to vector<10xf32>
    %96 = vector.shape_cast %95 : vector<10xf32> to vector<10x1xf32>
    %cst_40 = arith.constant 3.200000e+01 : f32
    %97 = vector.broadcast %cst_40 : f32 to vector<10x1xf32>
    %98 = arith.divf %96, %97 : vector<10x1xf32>
    %99 = vector.broadcast %91 : vector<10x1xf32> to vector<10x32xf32>
    %100 = arith.subf %87, %99 : vector<10x32xf32>
    %cst_41 = arith.constant 9.99999997E-7 : f32
    %101 = vector.broadcast %cst_41 : f32 to vector<10x1xf32>
    %102 = arith.addf %98, %101 : vector<10x1xf32>
    %103 = math.rsqrt %102 : vector<10x1xf32>
    %104 = vector.broadcast %103 : vector<10x1xf32> to vector<10x32xf32>
    %105 = arith.mulf %100, %104 : vector<10x32xf32>
    %c0_42 = arith.constant 0 : index
    %c0_43 = arith.constant 0 : index
    %106 = vector.load %arg7[%c0_42, %c0_43] : memref<1x32xf32, #tpu.memory_space<vmem>>, vector<1x32xf32>
    %107 = vector.broadcast %106 : vector<1x32xf32> to vector<10x32xf32>
    %108 = arith.mulf %105, %107 : vector<10x32xf32>
    %c0_44 = arith.constant 0 : index
    %c0_45 = arith.constant 0 : index
    %109 = vector.load %arg8[%c0_44, %c0_45] : memref<1x32xf32, #tpu.memory_space<vmem>>, vector<1x32xf32>
    %110 = vector.broadcast %109 : vector<1x32xf32> to vector<10x32xf32>
    %111 = arith.addf %108, %110 : vector<10x32xf32>
    %c0_46 = arith.constant 0 : index
    %c0_47 = arith.constant 0 : index
    %c0_48 = arith.constant 0 : index
    %112 = vector.load %arg9[%c0_46, %c0_47, %c0_48] : memref<1x10x32xf32, #tpu.memory_space<vmem>>, vector<1x10x32xf32>
    %113 = vector.shape_cast %112 : vector<1x10x32xf32> to vector<10x32xf32>
    %114 = vector.shape_cast %111 : vector<10x32xf32> to vector<1x10x32xf32>
    tpu.vector_store %arg9[%c0_46, %c0_47, %c0_48], %114 {strides = array<i32>} : memref<1x10x32xf32, #tpu.memory_space<vmem>>, vector<1x10x32xf32>,
    return
  }
  func.func @transform_0(%arg0: i32) -> (i32, i32, i32) {
    %c0_i32 = arith.constant 0 : i32
    %c0_i32_0 = arith.constant 0 : i32
    %c0_i32_1 = arith.constant 0 : i32
    return %arg0, %c0_i32, %c0_i32_0 : i32, i32, i32
  }
  func.func @transform_1(%arg0: i32) -> (i32, i32, i32) {
    %c0_i32 = arith.constant 0 : i32
    %c0_i32_0 = arith.constant 0 : i32
    %c0_i32_1 = arith.constant 0 : i32
    return %arg0, %c0_i32, %c0_i32_0 : i32, i32, i32
  }
  func.func @transform_2(%arg0: i32) -> (i32, i32, i32) {
    %c0_i32 = arith.constant 0 : i32
    %c0_i32_0 = arith.constant 0 : i32
    %c0_i32_1 = arith.constant 0 : i32
    return %arg0, %c0_i32, %c0_i32_0 : i32, i32, i32
  }
  func.func @transform_3(%arg0: i32) -> (i32, i32) {
    %c0_i32 = arith.constant 0 : i32
    %c0_i32_0 = arith.constant 0 : i32
    %c0_i32_1 = arith.constant 0 : i32
    return %c0_i32, %c0_i32_0 : i32, i32
  }
  func.func @transform_4(%arg0: i32) -> (i32, i32) {
    %c0_i32 = arith.constant 0 : i32
    %c0_i32_0 = arith.constant 0 : i32
    %c0_i32_1 = arith.constant 0 : i32
    return %c0_i32, %c0_i32_0 : i32, i32
  }
  func.func @transform_5(%arg0: i32) -> (i32, i32) {
    %c0_i32 = arith.constant 0 : i32
    %c0_i32_0 = arith.constant 0 : i32
    %c0_i32_1 = arith.constant 0 : i32
    return %c0_i32, %c0_i32_0 : i32, i32
  }
  func.func @transform_6(%arg0: i32) -> (i32, i32) {
    %c0_i32 = arith.constant 0 : i32
    %c0_i32_0 = arith.constant 0 : i32
    %c0_i32_1 = arith.constant 0 : i32
    return %c0_i32, %c0_i32_0 : i32, i32
  }
  func.func @transform_7(%arg0: i32) -> (i32, i32) {
    %c0_i32 = arith.constant 0 : i32
    %c0_i32_0 = arith.constant 0 : i32
    %c0_i32_1 = arith.constant 0 : i32
    return %c0_i32, %c0_i32_0 : i32, i32
  }
  func.func @transform_8(%arg0: i32) -> (i32, i32, i32) {
    %c0_i32 = arith.constant 0 : i32
    %c0_i32_0 = arith.constant 0 : i32
    %c0_i32_1 = arith.constant 0 : i32
    return %arg0, %c0_i32, %c0_i32_0 : i32, i32, i32
  }
}

module attributes {stable_mosaic.version = 11 : i64} {
  func.func @_embed_kernel(%arg0: i32, %arg1: memref<2x8xi32, #tpu.memory_space<smem>>, %arg2: memref<32x32xf32, #tpu.memory_space<vmem>>, %arg3: memref<8x32xf32, #tpu.memory_space<vmem>>, %arg4: memref<1x32xf32, #tpu.memory_space<vmem>>, %arg5: memref<1x32xf32, #tpu.memory_space<vmem>>, %arg6: memref<1x8x32xf32, #tpu.memory_space<vmem>>) attributes {dimension_semantics = [#tpu.dimension_semantics<parallel>], iteration_bounds = array<i64: 2>, scalar_prefetch = 1 : i64, scratch_operands = 0 : i64, tpu.core_type = #tpu.core_type<tc>, window_params = [{pipeline_mode = #tpu.pipeline_mode<synchronous>, transform_indices = @transform_0, window_bounds = array<i64: 32, 32>}, {pipeline_mode = #tpu.pipeline_mode<synchronous>, transform_indices = @transform_1, window_bounds = array<i64: 8, 32>}, {pipeline_mode = #tpu.pipeline_mode<synchronous>, transform_indices = @transform_2, window_bounds = array<i64: 1, 32>}, {pipeline_mode = #tpu.pipeline_mode<synchronous>, transform_indices = @transform_3, window_bounds = array<i64: 1, 32>}, {transform_indices = @transform_4, window_bounds = array<i64: 1, 8, 32>}]} {
    %0 = arith.index_cast %arg0 : i32 to index
    %c0 = arith.constant 0 : index
    %1 = memref.load %arg1[%0, %c0] : memref<2x8xi32, #tpu.memory_space<smem>>
    %2 = arith.index_cast %1 : i32 to index
    %c0_0 = arith.constant 0 : index
    %3 = vector.load %arg2[%2, %c0_0] : memref<32x32xf32, #tpu.memory_space<vmem>>, vector<1x32xf32>
    %4 = arith.index_cast %arg0 : i32 to index
    %c1 = arith.constant 1 : index
    %5 = memref.load %arg1[%4, %c1] : memref<2x8xi32, #tpu.memory_space<smem>>
    %6 = arith.index_cast %5 : i32 to index
    %c0_1 = arith.constant 0 : index
    %7 = vector.load %arg2[%6, %c0_1] : memref<32x32xf32, #tpu.memory_space<vmem>>, vector<1x32xf32>
    %8 = arith.index_cast %arg0 : i32 to index
    %c2 = arith.constant 2 : index
    %9 = memref.load %arg1[%8, %c2] : memref<2x8xi32, #tpu.memory_space<smem>>
    %10 = arith.index_cast %9 : i32 to index
    %c0_2 = arith.constant 0 : index
    %11 = vector.load %arg2[%10, %c0_2] : memref<32x32xf32, #tpu.memory_space<vmem>>, vector<1x32xf32>
    %12 = arith.index_cast %arg0 : i32 to index
    %c3 = arith.constant 3 : index
    %13 = memref.load %arg1[%12, %c3] : memref<2x8xi32, #tpu.memory_space<smem>>
    %14 = arith.index_cast %13 : i32 to index
    %c0_3 = arith.constant 0 : index
    %15 = vector.load %arg2[%14, %c0_3] : memref<32x32xf32, #tpu.memory_space<vmem>>, vector<1x32xf32>
    %16 = arith.index_cast %arg0 : i32 to index
    %c4 = arith.constant 4 : index
    %17 = memref.load %arg1[%16, %c4] : memref<2x8xi32, #tpu.memory_space<smem>>
    %18 = arith.index_cast %17 : i32 to index
    %c0_4 = arith.constant 0 : index
    %19 = vector.load %arg2[%18, %c0_4] : memref<32x32xf32, #tpu.memory_space<vmem>>, vector<1x32xf32>
    %20 = arith.index_cast %arg0 : i32 to index
    %c5 = arith.constant 5 : index
    %21 = memref.load %arg1[%20, %c5] : memref<2x8xi32, #tpu.memory_space<smem>>
    %22 = arith.index_cast %21 : i32 to index
    %c0_5 = arith.constant 0 : index
    %23 = vector.load %arg2[%22, %c0_5] : memref<32x32xf32, #tpu.memory_space<vmem>>, vector<1x32xf32>
    %24 = arith.index_cast %arg0 : i32 to index
    %c6 = arith.constant 6 : index
    %25 = memref.load %arg1[%24, %c6] : memref<2x8xi32, #tpu.memory_space<smem>>
    %26 = arith.index_cast %25 : i32 to index
    %c0_6 = arith.constant 0 : index
    %27 = vector.load %arg2[%26, %c0_6] : memref<32x32xf32, #tpu.memory_space<vmem>>, vector<1x32xf32>
    %28 = arith.index_cast %arg0 : i32 to index
    %c7 = arith.constant 7 : index
    %29 = memref.load %arg1[%28, %c7] : memref<2x8xi32, #tpu.memory_space<smem>>
    %30 = arith.index_cast %29 : i32 to index
    %c0_7 = arith.constant 0 : index
    %31 = vector.load %arg2[%30, %c0_7] : memref<32x32xf32, #tpu.memory_space<vmem>>, vector<1x32xf32>
    %32 = tpu.concatenate %3, %7, %11, %15, %19, %23, %27, %31 in 0 : vector<1x32xf32>, vector<1x32xf32>, vector<1x32xf32>, vector<1x32xf32>, vector<1x32xf32>, vector<1x32xf32>, vector<1x32xf32>, vector<1x32xf32> -> vector<8x32xf32>
    %c0_8 = arith.constant 0 : index
    %c0_9 = arith.constant 0 : index
    %33 = vector.load %arg3[%c0_8, %c0_9] : memref<8x32xf32, #tpu.memory_space<vmem>>, vector<8x32xf32>
    %34 = arith.addf %32, %33 : vector<8x32xf32>
    %cst = arith.constant dense<0.000000e+00> : vector<8xf32>
    %35 = vector.multi_reduction <add>, %34, %cst [1] : vector<8x32xf32> to vector<8xf32>
    %36 = vector.shape_cast %35 : vector<8xf32> to vector<8x1xf32>
    %cst_10 = arith.constant 3.200000e+01 : f32
    %37 = vector.broadcast %cst_10 : f32 to vector<8x1xf32>
    %38 = arith.divf %36, %37 : vector<8x1xf32>
    %39 = vector.broadcast %38 : vector<8x1xf32> to vector<8x32xf32>
    %40 = arith.subf %34, %39 : vector<8x32xf32>
    %41 = arith.mulf %40, %40 : vector<8x32xf32>
    %cst_11 = arith.constant dense<0.000000e+00> : vector<8xf32>
    %42 = vector.multi_reduction <add>, %41, %cst_11 [1] : vector<8x32xf32> to vector<8xf32>
    %43 = vector.shape_cast %42 : vector<8xf32> to vector<8x1xf32>
    %cst_12 = arith.constant 3.200000e+01 : f32
    %44 = vector.broadcast %cst_12 : f32 to vector<8x1xf32>
    %45 = arith.divf %43, %44 : vector<8x1xf32>
    %46 = vector.broadcast %38 : vector<8x1xf32> to vector<8x32xf32>
    %47 = arith.subf %34, %46 : vector<8x32xf32>
    %cst_13 = arith.constant 9.99999997E-7 : f32
    %48 = vector.broadcast %cst_13 : f32 to vector<8x1xf32>
    %49 = arith.addf %45, %48 : vector<8x1xf32>
    %50 = math.rsqrt %49 : vector<8x1xf32>
    %51 = vector.broadcast %50 : vector<8x1xf32> to vector<8x32xf32>
    %52 = arith.mulf %47, %51 : vector<8x32xf32>
    %c0_14 = arith.constant 0 : index
    %c0_15 = arith.constant 0 : index
    %53 = vector.load %arg4[%c0_14, %c0_15] : memref<1x32xf32, #tpu.memory_space<vmem>>, vector<1x32xf32>
    %54 = vector.broadcast %53 : vector<1x32xf32> to vector<8x32xf32>
    %55 = arith.mulf %52, %54 : vector<8x32xf32>
    %c0_16 = arith.constant 0 : index
    %c0_17 = arith.constant 0 : index
    %56 = vector.load %arg5[%c0_16, %c0_17] : memref<1x32xf32, #tpu.memory_space<vmem>>, vector<1x32xf32>
    %57 = vector.broadcast %56 : vector<1x32xf32> to vector<8x32xf32>
    %58 = arith.addf %55, %57 : vector<8x32xf32>
    %c0_18 = arith.constant 0 : index
    %c0_19 = arith.constant 0 : index
    %c0_20 = arith.constant 0 : index
    %59 = vector.load %arg6[%c0_18, %c0_19, %c0_20] : memref<1x8x32xf32, #tpu.memory_space<vmem>>, vector<1x8x32xf32>
    %60 = vector.shape_cast %59 : vector<1x8x32xf32> to vector<8x32xf32>
    %61 = vector.shape_cast %58 : vector<8x32xf32> to vector<1x8x32xf32>
    tpu.vector_store %arg6[%c0_18, %c0_19, %c0_20], %61 {strides = array<i32>} : memref<1x8x32xf32, #tpu.memory_space<vmem>>, vector<1x8x32xf32>,
    return
  }
  func.func @transform_0(%arg0: i32, %arg1: memref<2x8xi32, #tpu.memory_space<smem>>) -> (i32, i32) {
    %c0_i32 = arith.constant 0 : i32
    %c0_i32_0 = arith.constant 0 : i32
    %c0_i32_1 = arith.constant 0 : i32
    return %c0_i32, %c0_i32_0 : i32, i32
  }
  func.func @transform_1(%arg0: i32, %arg1: memref<2x8xi32, #tpu.memory_space<smem>>) -> (i32, i32) {
    %c0_i32 = arith.constant 0 : i32
    %c0_i32_0 = arith.constant 0 : i32
    %c0_i32_1 = arith.constant 0 : i32
    return %c0_i32, %c0_i32_0 : i32, i32
  }
  func.func @transform_2(%arg0: i32, %arg1: memref<2x8xi32, #tpu.memory_space<smem>>) -> (i32, i32) {
    %c0_i32 = arith.constant 0 : i32
    %c0_i32_0 = arith.constant 0 : i32
    %c0_i32_1 = arith.constant 0 : i32
    return %c0_i32, %c0_i32_0 : i32, i32
  }
  func.func @transform_3(%arg0: i32, %arg1: memref<2x8xi32, #tpu.memory_space<smem>>) -> (i32, i32) {
    %c0_i32 = arith.constant 0 : i32
    %c0_i32_0 = arith.constant 0 : i32
    %c0_i32_1 = arith.constant 0 : i32
    return %c0_i32, %c0_i32_0 : i32, i32
  }
  func.func @transform_4(%arg0: i32, %arg1: memref<2x8xi32, #tpu.memory_space<smem>>) -> (i32, i32, i32) {
    %c0_i32 = arith.constant 0 : i32
    %c0_i32_0 = arith.constant 0 : i32
    %c0_i32_1 = arith.constant 0 : i32
    return %arg0, %c0_i32, %c0_i32_0 : i32, i32, i32
  }
}

module attributes {stable_mosaic.version = 11 : i64} {
  func.func @_mha_kernel(%arg0: i32, %arg1: memref<1x8x32xf32, #tpu.memory_space<vmem>>, %arg2: memref<1x8x32xf32, #tpu.memory_space<vmem>>, %arg3: memref<1x1x8xi32, #tpu.memory_space<vmem>>, %arg4: memref<32x32xf32, #tpu.memory_space<vmem>>, %arg5: memref<32x64xf32, #tpu.memory_space<vmem>>, %arg6: memref<32x32xf32, #tpu.memory_space<vmem>>, %arg7: memref<1x32xf32, #tpu.memory_space<vmem>>, %arg8: memref<1x32xf32, #tpu.memory_space<vmem>>, %arg9: memref<1x8x32xf32, #tpu.memory_space<vmem>>) attributes {dimension_semantics = [#tpu.dimension_semantics<parallel>], iteration_bounds = array<i64: 2>, scalar_prefetch = 0 : i64, scratch_operands = 0 : i64, tpu.core_type = #tpu.core_type<tc>, window_params = [{transform_indices = @transform_0, window_bounds = array<i64: 1, 8, 32>}, {transform_indices = @transform_1, window_bounds = array<i64: 1, 8, 32>}, {transform_indices = @transform_2, window_bounds = array<i64: 1, 1, 8>}, {pipeline_mode = #tpu.pipeline_mode<synchronous>, transform_indices = @transform_3, window_bounds = array<i64: 32, 32>}, {pipeline_mode = #tpu.pipeline_mode<synchronous>, transform_indices = @transform_4, window_bounds = array<i64: 32, 64>}, {pipeline_mode = #tpu.pipeline_mode<synchronous>, transform_indices = @transform_5, window_bounds = array<i64: 32, 32>}, {pipeline_mode = #tpu.pipeline_mode<synchronous>, transform_indices = @transform_6, window_bounds = array<i64: 1, 32>}, {pipeline_mode = #tpu.pipeline_mode<synchronous>, transform_indices = @transform_7, window_bounds = array<i64: 1, 32>}, {transform_indices = @transform_8, window_bounds = array<i64: 1, 8, 32>}]} {
    %c0 = arith.constant 0 : index
    %c0_0 = arith.constant 0 : index
    %c0_1 = arith.constant 0 : index
    %0 = vector.load %arg1[%c0, %c0_0, %c0_1] : memref<1x8x32xf32, #tpu.memory_space<vmem>>, vector<1x8x32xf32>
    %1 = vector.shape_cast %0 : vector<1x8x32xf32> to vector<8x32xf32>
    %c0_2 = arith.constant 0 : index
    %c0_3 = arith.constant 0 : index
    %c0_4 = arith.constant 0 : index
    %2 = vector.load %arg2[%c0_2, %c0_3, %c0_4] : memref<1x8x32xf32, #tpu.memory_space<vmem>>, vector<1x8x32xf32>
    %3 = vector.shape_cast %2 : vector<1x8x32xf32> to vector<8x32xf32>
    %c0_5 = arith.constant 0 : index
    %c0_6 = arith.constant 0 : index
    %4 = vector.load %arg4[%c0_5, %c0_6] : memref<32x32xf32, #tpu.memory_space<vmem>>, vector<32x32xf32>
    %cst = arith.constant dense<0.000000e+00> : vector<8x32xf32>
    %5 = tpu.matmul %1, %4, %cst {dimension_numbers = #tpu.dot_dimension_numbers<[1], [0], [0], [1], [0, 0, 1, 1], [], []>} : vector<8x32xf32>, vector<32x32xf32>, vector<8x32xf32> -> vector<8x32xf32>
    %cst_7 = arith.constant 0.353553385 : f32
    %6 = vector.broadcast %cst_7 : f32 to vector<8x32xf32>
    %7 = arith.mulf %5, %6 : vector<8x32xf32>
    %c0_8 = arith.constant 0 : index
    %c0_9 = arith.constant 0 : index
    %8 = vector.load %arg5[%c0_8, %c0_9] : memref<32x64xf32, #tpu.memory_space<vmem>>, vector<32x64xf32>
    %cst_10 = arith.constant dense<0.000000e+00> : vector<8x64xf32>
    %9 = tpu.matmul %3, %8, %cst_10 {dimension_numbers = #tpu.dot_dimension_numbers<[1], [0], [0], [1], [0, 0, 1, 1], [], []>} : vector<8x32xf32>, vector<32x64xf32>, vector<8x64xf32> -> vector<8x64xf32>
    %c0_11 = arith.constant 0 : index
    %c0_12 = arith.constant 0 : index
    %c0_13 = arith.constant 0 : index
    %10 = vector.load %arg3[%c0_11, %c0_12, %c0_13] : memref<1x1x8xi32, #tpu.memory_space<vmem>>, vector<1x1x8xi32>
    %11 = vector.shape_cast %10 : vector<1x1x8xi32> to vector<1x8xi32>
    %c0_i32 = arith.constant 0 : i32
    %12 = vector.broadcast %c0_i32 : i32 to vector<1x8xi32>
    %13 = arith.cmpi ne, %11, %12 : vector<1x8xi32>
    %14 = vector.shape_cast %13 : vector<1x8xi1> to vector<1x8xi1>
    %15 = vector.broadcast %14 : vector<1x8xi1> to vector<8x8xi1>
    %16 = tpu.iota {dimensions = array<i32: 0>} : vector<8x8xi32>
    %17 = tpu.iota {dimensions = array<i32: 1>} : vector<8x8xi32>
    %18 = arith.cmpi sle, %17, %16 : vector<8x8xi32>
    %19 = arith.andi %15, %18 : vector<8x8xi1>
    %20 = vector.extract_strided_slice %7 {offsets = [0, 0], sizes = [8, 8], strides = [1, 1]} : vector<8x32xf32> to vector<8x8xf32>
    %21 = vector.extract_strided_slice %9 {offsets = [0, 0], sizes = [8, 8], strides = [1, 1]} : vector<8x64xf32> to vector<8x8xf32>
    %22 = vector.extract_strided_slice %9 {offsets = [0, 32], sizes = [8, 8], strides = [1, 1]} : vector<8x64xf32> to vector<8x8xf32>
    %cst_14 = arith.constant dense<0.000000e+00> : vector<8x8xf32>
    %23 = tpu.matmul %20, %21, %cst_14 {dimension_numbers = #tpu.dot_dimension_numbers<[1], [1], [0], [0], [0, 0, 1, 0], [], []>} : vector<8x8xf32>, vector<8x8xf32>, vector<8x8xf32> -> vector<8x8xf32>
    %cst_15 = arith.constant -1.000000e+09 : f32
    %24 = vector.broadcast %cst_15 : f32 to vector<8x8xf32>
    %25 = arith.select %19, %23, %24 : vector<8x8xi1>, vector<8x8xf32>
    %cst_16 = arith.constant dense<0xFF800000> : vector<8xf32>
    %26 = vector.multi_reduction <maximumf>, %25, %cst_16 [1] : vector<8x8xf32> to vector<8xf32>
    %27 = vector.shape_cast %26 : vector<8xf32> to vector<8x1xf32>
    %28 = vector.broadcast %27 : vector<8x1xf32> to vector<8x8xf32>
    %29 = arith.subf %25, %28 : vector<8x8xf32>
    %30 = math.exp %29 : vector<8x8xf32>
    %cst_17 = arith.constant dense<0.000000e+00> : vector<8xf32>
    %31 = vector.multi_reduction <add>, %30, %cst_17 [1] : vector<8x8xf32> to vector<8xf32>
    %32 = vector.shape_cast %31 : vector<8xf32> to vector<8x1xf32>
    %33 = tpu.reciprocal %32 {approx = true} : vector<8x1xf32> -> vector<8x1xf32>
    %34 = vector.broadcast %33 : vector<8x1xf32> to vector<8x8xf32>
    %35 = arith.mulf %30, %34 : vector<8x8xf32>
    %cst_18 = arith.constant dense<0.000000e+00> : vector<8x8xf32>
    %36 = tpu.matmul %35, %22, %cst_18 {dimension_numbers = #tpu.dot_dimension_numbers<[1], [0], [0], [1], [0, 0, 1, 1], [], []>} : vector<8x8xf32>, vector<8x8xf32>, vector<8x8xf32> -> vector<8x8xf32>
    %37 = vector.extract_strided_slice %7 {offsets = [0, 8], sizes = [8, 8], strides = [1, 1]} : vector<8x32xf32> to vector<8x8xf32>
    %38 = vector.extract_strided_slice %9 {offsets = [0, 8], sizes = [8, 8], strides = [1, 1]} : vector<8x64xf32> to vector<8x8xf32>
    %39 = vector.extract_strided_slice %9 {offsets = [0, 40], sizes = [8, 8], strides = [1, 1]} : vector<8x64xf32> to vector<8x8xf32>
    %cst_19 = arith.constant dense<0.000000e+00> : vector<8x8xf32>
    %40 = tpu.matmul %37, %38, %cst_19 {dimension_numbers = #tpu.dot_dimension_numbers<[1], [1], [0], [0], [0, 0, 1, 0], [], []>} : vector<8x8xf32>, vector<8x8xf32>, vector<8x8xf32> -> vector<8x8xf32>
    %cst_20 = arith.constant -1.000000e+09 : f32
    %41 = vector.broadcast %cst_20 : f32 to vector<8x8xf32>
    %42 = arith.select %19, %40, %41 : vector<8x8xi1>, vector<8x8xf32>
    %cst_21 = arith.constant dense<0xFF800000> : vector<8xf32>
    %43 = vector.multi_reduction <maximumf>, %42, %cst_21 [1] : vector<8x8xf32> to vector<8xf32>
    %44 = vector.shape_cast %43 : vector<8xf32> to vector<8x1xf32>
    %45 = vector.broadcast %44 : vector<8x1xf32> to vector<8x8xf32>
    %46 = arith.subf %42, %45 : vector<8x8xf32>
    %47 = math.exp %46 : vector<8x8xf32>
    %cst_22 = arith.constant dense<0.000000e+00> : vector<8xf32>
    %48 = vector.multi_reduction <add>, %47, %cst_22 [1] : vector<8x8xf32> to vector<8xf32>
    %49 = vector.shape_cast %48 : vector<8xf32> to vector<8x1xf32>
    %50 = tpu.reciprocal %49 {approx = true} : vector<8x1xf32> -> vector<8x1xf32>
    %51 = vector.broadcast %50 : vector<8x1xf32> to vector<8x8xf32>
    %52 = arith.mulf %47, %51 : vector<8x8xf32>
    %cst_23 = arith.constant dense<0.000000e+00> : vector<8x8xf32>
    %53 = tpu.matmul %52, %39, %cst_23 {dimension_numbers = #tpu.dot_dimension_numbers<[1], [0], [0], [1], [0, 0, 1, 1], [], []>} : vector<8x8xf32>, vector<8x8xf32>, vector<8x8xf32> -> vector<8x8xf32>
    %54 = vector.extract_strided_slice %7 {offsets = [0, 16], sizes = [8, 8], strides = [1, 1]} : vector<8x32xf32> to vector<8x8xf32>
    %55 = vector.extract_strided_slice %9 {offsets = [0, 16], sizes = [8, 8], strides = [1, 1]} : vector<8x64xf32> to vector<8x8xf32>
    %56 = vector.extract_strided_slice %9 {offsets = [0, 48], sizes = [8, 8], strides = [1, 1]} : vector<8x64xf32> to vector<8x8xf32>
    %cst_24 = arith.constant dense<0.000000e+00> : vector<8x8xf32>
    %57 = tpu.matmul %54, %55, %cst_24 {dimension_numbers = #tpu.dot_dimension_numbers<[1], [1], [0], [0], [0, 0, 1, 0], [], []>} : vector<8x8xf32>, vector<8x8xf32>, vector<8x8xf32> -> vector<8x8xf32>
    %cst_25 = arith.constant -1.000000e+09 : f32
    %58 = vector.broadcast %cst_25 : f32 to vector<8x8xf32>
    %59 = arith.select %19, %57, %58 : vector<8x8xi1>, vector<8x8xf32>
    %cst_26 = arith.constant dense<0xFF800000> : vector<8xf32>
    %60 = vector.multi_reduction <maximumf>, %59, %cst_26 [1] : vector<8x8xf32> to vector<8xf32>
    %61 = vector.shape_cast %60 : vector<8xf32> to vector<8x1xf32>
    %62 = vector.broadcast %61 : vector<8x1xf32> to vector<8x8xf32>
    %63 = arith.subf %59, %62 : vector<8x8xf32>
    %64 = math.exp %63 : vector<8x8xf32>
    %cst_27 = arith.constant dense<0.000000e+00> : vector<8xf32>
    %65 = vector.multi_reduction <add>, %64, %cst_27 [1] : vector<8x8xf32> to vector<8xf32>
    %66 = vector.shape_cast %65 : vector<8xf32> to vector<8x1xf32>
    %67 = tpu.reciprocal %66 {approx = true} : vector<8x1xf32> -> vector<8x1xf32>
    %68 = vector.broadcast %67 : vector<8x1xf32> to vector<8x8xf32>
    %69 = arith.mulf %64, %68 : vector<8x8xf32>
    %cst_28 = arith.constant dense<0.000000e+00> : vector<8x8xf32>
    %70 = tpu.matmul %69, %56, %cst_28 {dimension_numbers = #tpu.dot_dimension_numbers<[1], [0], [0], [1], [0, 0, 1, 1], [], []>} : vector<8x8xf32>, vector<8x8xf32>, vector<8x8xf32> -> vector<8x8xf32>
    %71 = vector.extract_strided_slice %7 {offsets = [0, 24], sizes = [8, 8], strides = [1, 1]} : vector<8x32xf32> to vector<8x8xf32>
    %72 = vector.extract_strided_slice %9 {offsets = [0, 24], sizes = [8, 8], strides = [1, 1]} : vector<8x64xf32> to vector<8x8xf32>
    %73 = vector.extract_strided_slice %9 {offsets = [0, 56], sizes = [8, 8], strides = [1, 1]} : vector<8x64xf32> to vector<8x8xf32>
    %cst_29 = arith.constant dense<0.000000e+00> : vector<8x8xf32>
    %74 = tpu.matmul %71, %72, %cst_29 {dimension_numbers = #tpu.dot_dimension_numbers<[1], [1], [0], [0], [0, 0, 1, 0], [], []>} : vector<8x8xf32>, vector<8x8xf32>, vector<8x8xf32> -> vector<8x8xf32>
    %cst_30 = arith.constant -1.000000e+09 : f32
    %75 = vector.broadcast %cst_30 : f32 to vector<8x8xf32>
    %76 = arith.select %19, %74, %75 : vector<8x8xi1>, vector<8x8xf32>
    %cst_31 = arith.constant dense<0xFF800000> : vector<8xf32>
    %77 = vector.multi_reduction <maximumf>, %76, %cst_31 [1] : vector<8x8xf32> to vector<8xf32>
    %78 = vector.shape_cast %77 : vector<8xf32> to vector<8x1xf32>
    %79 = vector.broadcast %78 : vector<8x1xf32> to vector<8x8xf32>
    %80 = arith.subf %76, %79 : vector<8x8xf32>
    %81 = math.exp %80 : vector<8x8xf32>
    %cst_32 = arith.constant dense<0.000000e+00> : vector<8xf32>
    %82 = vector.multi_reduction <add>, %81, %cst_32 [1] : vector<8x8xf32> to vector<8xf32>
    %83 = vector.shape_cast %82 : vector<8xf32> to vector<8x1xf32>
    %84 = tpu.reciprocal %83 {approx = true} : vector<8x1xf32> -> vector<8x1xf32>
    %85 = vector.broadcast %84 : vector<8x1xf32> to vector<8x8xf32>
    %86 = arith.mulf %81, %85 : vector<8x8xf32>
    %cst_33 = arith.constant dense<0.000000e+00> : vector<8x8xf32>
    %87 = tpu.matmul %86, %73, %cst_33 {dimension_numbers = #tpu.dot_dimension_numbers<[1], [0], [0], [1], [0, 0, 1, 1], [], []>} : vector<8x8xf32>, vector<8x8xf32>, vector<8x8xf32> -> vector<8x8xf32>
    %88 = tpu.concatenate %36, %53, %70, %87 in 1 : vector<8x8xf32>, vector<8x8xf32>, vector<8x8xf32>, vector<8x8xf32> -> vector<8x32xf32>
    %c0_34 = arith.constant 0 : index
    %c0_35 = arith.constant 0 : index
    %89 = vector.load %arg6[%c0_34, %c0_35] : memref<32x32xf32, #tpu.memory_space<vmem>>, vector<32x32xf32>
    %cst_36 = arith.constant dense<0.000000e+00> : vector<8x32xf32>
    %90 = tpu.matmul %88, %89, %cst_36 {dimension_numbers = #tpu.dot_dimension_numbers<[1], [0], [0], [1], [0, 0, 1, 1], [], []>} : vector<8x32xf32>, vector<32x32xf32>, vector<8x32xf32> -> vector<8x32xf32>
    %91 = arith.addf %90, %1 : vector<8x32xf32>
    %cst_37 = arith.constant dense<0.000000e+00> : vector<8xf32>
    %92 = vector.multi_reduction <add>, %91, %cst_37 [1] : vector<8x32xf32> to vector<8xf32>
    %93 = vector.shape_cast %92 : vector<8xf32> to vector<8x1xf32>
    %cst_38 = arith.constant 3.200000e+01 : f32
    %94 = vector.broadcast %cst_38 : f32 to vector<8x1xf32>
    %95 = arith.divf %93, %94 : vector<8x1xf32>
    %96 = vector.broadcast %95 : vector<8x1xf32> to vector<8x32xf32>
    %97 = arith.subf %91, %96 : vector<8x32xf32>
    %98 = arith.mulf %97, %97 : vector<8x32xf32>
    %cst_39 = arith.constant dense<0.000000e+00> : vector<8xf32>
    %99 = vector.multi_reduction <add>, %98, %cst_39 [1] : vector<8x32xf32> to vector<8xf32>
    %100 = vector.shape_cast %99 : vector<8xf32> to vector<8x1xf32>
    %cst_40 = arith.constant 3.200000e+01 : f32
    %101 = vector.broadcast %cst_40 : f32 to vector<8x1xf32>
    %102 = arith.divf %100, %101 : vector<8x1xf32>
    %103 = vector.broadcast %95 : vector<8x1xf32> to vector<8x32xf32>
    %104 = arith.subf %91, %103 : vector<8x32xf32>
    %cst_41 = arith.constant 9.99999997E-7 : f32
    %105 = vector.broadcast %cst_41 : f32 to vector<8x1xf32>
    %106 = arith.addf %102, %105 : vector<8x1xf32>
    %107 = math.rsqrt %106 : vector<8x1xf32>
    %108 = vector.broadcast %107 : vector<8x1xf32> to vector<8x32xf32>
    %109 = arith.mulf %104, %108 : vector<8x32xf32>
    %c0_42 = arith.constant 0 : index
    %c0_43 = arith.constant 0 : index
    %110 = vector.load %arg7[%c0_42, %c0_43] : memref<1x32xf32, #tpu.memory_space<vmem>>, vector<1x32xf32>
    %111 = vector.broadcast %110 : vector<1x32xf32> to vector<8x32xf32>
    %112 = arith.mulf %109, %111 : vector<8x32xf32>
    %c0_44 = arith.constant 0 : index
    %c0_45 = arith.constant 0 : index
    %113 = vector.load %arg8[%c0_44, %c0_45] : memref<1x32xf32, #tpu.memory_space<vmem>>, vector<1x32xf32>
    %114 = vector.broadcast %113 : vector<1x32xf32> to vector<8x32xf32>
    %115 = arith.addf %112, %114 : vector<8x32xf32>
    %c0_46 = arith.constant 0 : index
    %c0_47 = arith.constant 0 : index
    %c0_48 = arith.constant 0 : index
    %116 = vector.load %arg9[%c0_46, %c0_47, %c0_48] : memref<1x8x32xf32, #tpu.memory_space<vmem>>, vector<1x8x32xf32>
    %117 = vector.shape_cast %116 : vector<1x8x32xf32> to vector<8x32xf32>
    %118 = vector.shape_cast %115 : vector<8x32xf32> to vector<1x8x32xf32>
    tpu.vector_store %arg9[%c0_46, %c0_47, %c0_48], %118 {strides = array<i32>} : memref<1x8x32xf32, #tpu.memory_space<vmem>>, vector<1x8x32xf32>,
    return
  }
  func.func @transform_0(%arg0: i32) -> (i32, i32, i32) {
    %c0_i32 = arith.constant 0 : i32
    %c0_i32_0 = arith.constant 0 : i32
    %c0_i32_1 = arith.constant 0 : i32
    return %arg0, %c0_i32, %c0_i32_0 : i32, i32, i32
  }
  func.func @transform_1(%arg0: i32) -> (i32, i32, i32) {
    %c0_i32 = arith.constant 0 : i32
    %c0_i32_0 = arith.constant 0 : i32
    %c0_i32_1 = arith.constant 0 : i32
    return %arg0, %c0_i32, %c0_i32_0 : i32, i32, i32
  }
  func.func @transform_2(%arg0: i32) -> (i32, i32, i32) {
    %c0_i32 = arith.constant 0 : i32
    %c0_i32_0 = arith.constant 0 : i32
    %c0_i32_1 = arith.constant 0 : i32
    return %arg0, %c0_i32, %c0_i32_0 : i32, i32, i32
  }
  func.func @transform_3(%arg0: i32) -> (i32, i32) {
    %c0_i32 = arith.constant 0 : i32
    %c0_i32_0 = arith.constant 0 : i32
    %c0_i32_1 = arith.constant 0 : i32
    return %c0_i32, %c0_i32_0 : i32, i32
  }
  func.func @transform_4(%arg0: i32) -> (i32, i32) {
    %c0_i32 = arith.constant 0 : i32
    %c0_i32_0 = arith.constant 0 : i32
    %c0_i32_1 = arith.constant 0 : i32
    return %c0_i32, %c0_i32_0 : i32, i32
  }
  func.func @transform_5(%arg0: i32) -> (i32, i32) {
    %c0_i32 = arith.constant 0 : i32
    %c0_i32_0 = arith.constant 0 : i32
    %c0_i32_1 = arith.constant 0 : i32
    return %c0_i32, %c0_i32_0 : i32, i32
  }
  func.func @transform_6(%arg0: i32) -> (i32, i32) {
    %c0_i32 = arith.constant 0 : i32
    %c0_i32_0 = arith.constant 0 : i32
    %c0_i32_1 = arith.constant 0 : i32
    return %c0_i32, %c0_i32_0 : i32, i32
  }
  func.func @transform_7(%arg0: i32) -> (i32, i32) {
    %c0_i32 = arith.constant 0 : i32
    %c0_i32_0 = arith.constant 0 : i32
    %c0_i32_1 = arith.constant 0 : i32
    return %c0_i32, %c0_i32_0 : i32, i32
  }
  func.func @transform_8(%arg0: i32) -> (i32, i32, i32) {
    %c0_i32 = arith.constant 0 : i32
    %c0_i32_0 = arith.constant 0 : i32
    %c0_i32_1 = arith.constant 0 : i32
    return %arg0, %c0_i32, %c0_i32_0 : i32, i32, i32
  }
}

module attributes {stable_mosaic.version = 11 : i64} {
  func.func @_mha_kernel(%arg0: i32, %arg1: memref<1x8x32xf32, #tpu.memory_space<vmem>>, %arg2: memref<1x10x32xf32, #tpu.memory_space<vmem>>, %arg3: memref<1x1x10xi32, #tpu.memory_space<vmem>>, %arg4: memref<32x32xf32, #tpu.memory_space<vmem>>, %arg5: memref<32x64xf32, #tpu.memory_space<vmem>>, %arg6: memref<32x32xf32, #tpu.memory_space<vmem>>, %arg7: memref<1x32xf32, #tpu.memory_space<vmem>>, %arg8: memref<1x32xf32, #tpu.memory_space<vmem>>, %arg9: memref<1x8x32xf32, #tpu.memory_space<vmem>>) attributes {dimension_semantics = [#tpu.dimension_semantics<parallel>], iteration_bounds = array<i64: 2>, scalar_prefetch = 0 : i64, scratch_operands = 0 : i64, tpu.core_type = #tpu.core_type<tc>, window_params = [{transform_indices = @transform_0, window_bounds = array<i64: 1, 8, 32>}, {transform_indices = @transform_1, window_bounds = array<i64: 1, 10, 32>}, {transform_indices = @transform_2, window_bounds = array<i64: 1, 1, 10>}, {pipeline_mode = #tpu.pipeline_mode<synchronous>, transform_indices = @transform_3, window_bounds = array<i64: 32, 32>}, {pipeline_mode = #tpu.pipeline_mode<synchronous>, transform_indices = @transform_4, window_bounds = array<i64: 32, 64>}, {pipeline_mode = #tpu.pipeline_mode<synchronous>, transform_indices = @transform_5, window_bounds = array<i64: 32, 32>}, {pipeline_mode = #tpu.pipeline_mode<synchronous>, transform_indices = @transform_6, window_bounds = array<i64: 1, 32>}, {pipeline_mode = #tpu.pipeline_mode<synchronous>, transform_indices = @transform_7, window_bounds = array<i64: 1, 32>}, {transform_indices = @transform_8, window_bounds = array<i64: 1, 8, 32>}]} {
    %c0 = arith.constant 0 : index
    %c0_0 = arith.constant 0 : index
    %c0_1 = arith.constant 0 : index
    %0 = vector.load %arg1[%c0, %c0_0, %c0_1] : memref<1x8x32xf32, #tpu.memory_space<vmem>>, vector<1x8x32xf32>
    %1 = vector.shape_cast %0 : vector<1x8x32xf32> to vector<8x32xf32>
    %c0_2 = arith.constant 0 : index
    %c0_3 = arith.constant 0 : index
    %c0_4 = arith.constant 0 : index
    %2 = vector.load %arg2[%c0_2, %c0_3, %c0_4] : memref<1x10x32xf32, #tpu.memory_space<vmem>>, vector<1x10x32xf32>
    %3 = vector.shape_cast %2 : vector<1x10x32xf32> to vector<10x32xf32>
    %c0_5 = arith.constant 0 : index
    %c0_6 = arith.constant 0 : index
    %4 = vector.load %arg4[%c0_5, %c0_6] : memref<32x32xf32, #tpu.memory_space<vmem>>, vector<32x32xf32>
    %cst = arith.constant dense<0.000000e+00> : vector<8x32xf32>
    %5 = tpu.matmul %1, %4, %cst {dimension_numbers = #tpu.dot_dimension_numbers<[1], [0], [0], [1], [0, 0, 1, 1], [], []>} : vector<8x32xf32>, vector<32x32xf32>, vector<8x32xf32> -> vector<8x32xf32>
    %cst_7 = arith.constant 0.353553385 : f32
    %6 = vector.broadcast %cst_7 : f32 to vector<8x32xf32>
    %7 = arith.mulf %5, %6 : vector<8x32xf32>
    %c0_8 = arith.constant 0 : index
    %c0_9 = arith.constant 0 : index
    %8 = vector.load %arg5[%c0_8, %c0_9] : memref<32x64xf32, #tpu.memory_space<vmem>>, vector<32x64xf32>
    %cst_10 = arith.constant dense<0.000000e+00> : vector<10x64xf32>
    %9 = tpu.matmul %3, %8, %cst_10 {dimension_numbers = #tpu.dot_dimension_numbers<[1], [0], [0], [1], [0, 0, 1, 1], [], []>} : vector<10x32xf32>, vector<32x64xf32>, vector<10x64xf32> -> vector<10x64xf32>
    %c0_11 = arith.constant 0 : index
    %c0_12 = arith.constant 0 : index
    %c0_13 = arith.constant 0 : index
    %10 = vector.load %arg3[%c0_11, %c0_12, %c0_13] : memref<1x1x10xi32, #tpu.memory_space<vmem>>, vector<1x1x10xi32>
    %11 = vector.shape_cast %10 : vector<1x1x10xi32> to vector<1x10xi32>
    %c0_i32 = arith.constant 0 : i32
    %12 = vector.broadcast %c0_i32 : i32 to vector<1x10xi32>
    %13 = arith.cmpi ne, %11, %12 : vector<1x10xi32>
    %14 = vector.shape_cast %13 : vector<1x10xi1> to vector<1x10xi1>
    %15 = vector.broadcast %14 : vector<1x10xi1> to vector<8x10xi1>
    %16 = vector.extract_strided_slice %7 {offsets = [0, 0], sizes = [8, 8], strides = [1, 1]} : vector<8x32xf32> to vector<8x8xf32>
    %17 = vector.extract_strided_slice %9 {offsets = [0, 0], sizes = [10, 8], strides = [1, 1]} : vector<10x64xf32> to vector<10x8xf32>
    %18 = vector.extract_strided_slice %9 {offsets = [0, 32], sizes = [10, 8], strides = [1, 1]} : vector<10x64xf32> to vector<10x8xf32>
    %cst_14 = arith.constant dense<0.000000e+00> : vector<8x10xf32>
    %19 = tpu.matmul %16, %17, %cst_14 {dimension_numbers = #tpu.dot_dimension_numbers<[1], [1], [0], [0], [0, 0, 1, 0], [], []>} : vector<8x8xf32>, vector<10x8xf32>, vector<8x10xf32> -> vector<8x10xf32>
    %cst_15 = arith.constant -1.000000e+09 : f32
    %20 = vector.broadcast %cst_15 : f32 to vector<8x10xf32>
    %21 = arith.select %15, %19, %20 : vector<8x10xi1>, vector<8x10xf32>
    %cst_16 = arith.constant dense<0xFF800000> : vector<8xf32>
    %22 = vector.multi_reduction <maximumf>, %21, %cst_16 [1] : vector<8x10xf32> to vector<8xf32>
    %23 = vector.shape_cast %22 : vector<8xf32> to vector<8x1xf32>
    %24 = vector.broadcast %23 : vector<8x1xf32> to vector<8x10xf32>
    %25 = arith.subf %21, %24 : vector<8x10xf32>
    %26 = math.exp %25 : vector<8x10xf32>
    %cst_17 = arith.constant dense<0.000000e+00> : vector<8xf32>
    %27 = vector.multi_reduction <add>, %26, %cst_17 [1] : vector<8x10xf32> to vector<8xf32>
    %28 = vector.shape_cast %27 : vector<8xf32> to vector<8x1xf32>
    %29 = tpu.reciprocal %28 {approx = true} : vector<8x1xf32> -> vector<8x1xf32>
    %30 = vector.broadcast %29 : vector<8x1xf32> to vector<8x10xf32>
    %31 = arith.mulf %26, %30 : vector<8x10xf32>
    %cst_18 = arith.constant dense<0.000000e+00> : vector<8x8xf32>
    %32 = tpu.matmul %31, %18, %cst_18 {dimension_numbers = #tpu.dot_dimension_numbers<[1], [0], [0], [1], [0, 0, 1, 1], [], []>} : vector<8x10xf32>, vector<10x8xf32>, vector<8x8xf32> -> vector<8x8xf32>
    %33 = vector.extract_strided_slice %7 {offsets = [0, 8], sizes = [8, 8], strides = [1, 1]} : vector<8x32xf32> to vector<8x8xf32>
    %34 = vector.extract_strided_slice %9 {offsets = [0, 8], sizes = [10, 8], strides = [1, 1]} : vector<10x64xf32> to vector<10x8xf32>
    %35 = vector.extract_strided_slice %9 {offsets = [0, 40], sizes = [10, 8], strides = [1, 1]} : vector<10x64xf32> to vector<10x8xf32>
    %cst_19 = arith.constant dense<0.000000e+00> : vector<8x10xf32>
    %36 = tpu.matmul %33, %34, %cst_19 {dimension_numbers = #tpu.dot_dimension_numbers<[1], [1], [0], [0], [0, 0, 1, 0], [], []>} : vector<8x8xf32>, vector<10x8xf32>, vector<8x10xf32> -> vector<8x10xf32>
    %cst_20 = arith.constant -1.000000e+09 : f32
    %37 = vector.broadcast %cst_20 : f32 to vector<8x10xf32>
    %38 = arith.select %15, %36, %37 : vector<8x10xi1>, vector<8x10xf32>
    %cst_21 = arith.constant dense<0xFF800000> : vector<8xf32>
    %39 = vector.multi_reduction <maximumf>, %38, %cst_21 [1] : vector<8x10xf32> to vector<8xf32>
    %40 = vector.shape_cast %39 : vector<8xf32> to vector<8x1xf32>
    %41 = vector.broadcast %40 : vector<8x1xf32> to vector<8x10xf32>
    %42 = arith.subf %38, %41 : vector<8x10xf32>
    %43 = math.exp %42 : vector<8x10xf32>
    %cst_22 = arith.constant dense<0.000000e+00> : vector<8xf32>
    %44 = vector.multi_reduction <add>, %43, %cst_22 [1] : vector<8x10xf32> to vector<8xf32>
    %45 = vector.shape_cast %44 : vector<8xf32> to vector<8x1xf32>
    %46 = tpu.reciprocal %45 {approx = true} : vector<8x1xf32> -> vector<8x1xf32>
    %47 = vector.broadcast %46 : vector<8x1xf32> to vector<8x10xf32>
    %48 = arith.mulf %43, %47 : vector<8x10xf32>
    %cst_23 = arith.constant dense<0.000000e+00> : vector<8x8xf32>
    %49 = tpu.matmul %48, %35, %cst_23 {dimension_numbers = #tpu.dot_dimension_numbers<[1], [0], [0], [1], [0, 0, 1, 1], [], []>} : vector<8x10xf32>, vector<10x8xf32>, vector<8x8xf32> -> vector<8x8xf32>
    %50 = vector.extract_strided_slice %7 {offsets = [0, 16], sizes = [8, 8], strides = [1, 1]} : vector<8x32xf32> to vector<8x8xf32>
    %51 = vector.extract_strided_slice %9 {offsets = [0, 16], sizes = [10, 8], strides = [1, 1]} : vector<10x64xf32> to vector<10x8xf32>
    %52 = vector.extract_strided_slice %9 {offsets = [0, 48], sizes = [10, 8], strides = [1, 1]} : vector<10x64xf32> to vector<10x8xf32>
    %cst_24 = arith.constant dense<0.000000e+00> : vector<8x10xf32>
    %53 = tpu.matmul %50, %51, %cst_24 {dimension_numbers = #tpu.dot_dimension_numbers<[1], [1], [0], [0], [0, 0, 1, 0], [], []>} : vector<8x8xf32>, vector<10x8xf32>, vector<8x10xf32> -> vector<8x10xf32>
    %cst_25 = arith.constant -1.000000e+09 : f32
    %54 = vector.broadcast %cst_25 : f32 to vector<8x10xf32>
    %55 = arith.select %15, %53, %54 : vector<8x10xi1>, vector<8x10xf32>
    %cst_26 = arith.constant dense<0xFF800000> : vector<8xf32>
    %56 = vector.multi_reduction <maximumf>, %55, %cst_26 [1] : vector<8x10xf32> to vector<8xf32>
    %57 = vector.shape_cast %56 : vector<8xf32> to vector<8x1xf32>
    %58 = vector.broadcast %57 : vector<8x1xf32> to vector<8x10xf32>
    %59 = arith.subf %55, %58 : vector<8x10xf32>
    %60 = math.exp %59 : vector<8x10xf32>
    %cst_27 = arith.constant dense<0.000000e+00> : vector<8xf32>
    %61 = vector.multi_reduction <add>, %60, %cst_27 [1] : vector<8x10xf32> to vector<8xf32>
    %62 = vector.shape_cast %61 : vector<8xf32> to vector<8x1xf32>
    %63 = tpu.reciprocal %62 {approx = true} : vector<8x1xf32> -> vector<8x1xf32>
    %64 = vector.broadcast %63 : vector<8x1xf32> to vector<8x10xf32>
    %65 = arith.mulf %60, %64 : vector<8x10xf32>
    %cst_28 = arith.constant dense<0.000000e+00> : vector<8x8xf32>
    %66 = tpu.matmul %65, %52, %cst_28 {dimension_numbers = #tpu.dot_dimension_numbers<[1], [0], [0], [1], [0, 0, 1, 1], [], []>} : vector<8x10xf32>, vector<10x8xf32>, vector<8x8xf32> -> vector<8x8xf32>
    %67 = vector.extract_strided_slice %7 {offsets = [0, 24], sizes = [8, 8], strides = [1, 1]} : vector<8x32xf32> to vector<8x8xf32>
    %68 = vector.extract_strided_slice %9 {offsets = [0, 24], sizes = [10, 8], strides = [1, 1]} : vector<10x64xf32> to vector<10x8xf32>
    %69 = vector.extract_strided_slice %9 {offsets = [0, 56], sizes = [10, 8], strides = [1, 1]} : vector<10x64xf32> to vector<10x8xf32>
    %cst_29 = arith.constant dense<0.000000e+00> : vector<8x10xf32>
    %70 = tpu.matmul %67, %68, %cst_29 {dimension_numbers = #tpu.dot_dimension_numbers<[1], [1], [0], [0], [0, 0, 1, 0], [], []>} : vector<8x8xf32>, vector<10x8xf32>, vector<8x10xf32> -> vector<8x10xf32>
    %cst_30 = arith.constant -1.000000e+09 : f32
    %71 = vector.broadcast %cst_30 : f32 to vector<8x10xf32>
    %72 = arith.select %15, %70, %71 : vector<8x10xi1>, vector<8x10xf32>
    %cst_31 = arith.constant dense<0xFF800000> : vector<8xf32>
    %73 = vector.multi_reduction <maximumf>, %72, %cst_31 [1] : vector<8x10xf32> to vector<8xf32>
    %74 = vector.shape_cast %73 : vector<8xf32> to vector<8x1xf32>
    %75 = vector.broadcast %74 : vector<8x1xf32> to vector<8x10xf32>
    %76 = arith.subf %72, %75 : vector<8x10xf32>
    %77 = math.exp %76 : vector<8x10xf32>
    %cst_32 = arith.constant dense<0.000000e+00> : vector<8xf32>
    %78 = vector.multi_reduction <add>, %77, %cst_32 [1] : vector<8x10xf32> to vector<8xf32>
    %79 = vector.shape_cast %78 : vector<8xf32> to vector<8x1xf32>
    %80 = tpu.reciprocal %79 {approx = true} : vector<8x1xf32> -> vector<8x1xf32>
    %81 = vector.broadcast %80 : vector<8x1xf32> to vector<8x10xf32>
    %82 = arith.mulf %77, %81 : vector<8x10xf32>
    %cst_33 = arith.constant dense<0.000000e+00> : vector<8x8xf32>
    %83 = tpu.matmul %82, %69, %cst_33 {dimension_numbers = #tpu.dot_dimension_numbers<[1], [0], [0], [1], [0, 0, 1, 1], [], []>} : vector<8x10xf32>, vector<10x8xf32>, vector<8x8xf32> -> vector<8x8xf32>
    %84 = tpu.concatenate %32, %49, %66, %83 in 1 : vector<8x8xf32>, vector<8x8xf32>, vector<8x8xf32>, vector<8x8xf32> -> vector<8x32xf32>
    %c0_34 = arith.constant 0 : index
    %c0_35 = arith.constant 0 : index
    %85 = vector.load %arg6[%c0_34, %c0_35] : memref<32x32xf32, #tpu.memory_space<vmem>>, vector<32x32xf32>
    %cst_36 = arith.constant dense<0.000000e+00> : vector<8x32xf32>
    %86 = tpu.matmul %84, %85, %cst_36 {dimension_numbers = #tpu.dot_dimension_numbers<[1], [0], [0], [1], [0, 0, 1, 1], [], []>} : vector<8x32xf32>, vector<32x32xf32>, vector<8x32xf32> -> vector<8x32xf32>
    %87 = arith.addf %86, %1 : vector<8x32xf32>
    %cst_37 = arith.constant dense<0.000000e+00> : vector<8xf32>
    %88 = vector.multi_reduction <add>, %87, %cst_37 [1] : vector<8x32xf32> to vector<8xf32>
    %89 = vector.shape_cast %88 : vector<8xf32> to vector<8x1xf32>
    %cst_38 = arith.constant 3.200000e+01 : f32
    %90 = vector.broadcast %cst_38 : f32 to vector<8x1xf32>
    %91 = arith.divf %89, %90 : vector<8x1xf32>
    %92 = vector.broadcast %91 : vector<8x1xf32> to vector<8x32xf32>
    %93 = arith.subf %87, %92 : vector<8x32xf32>
    %94 = arith.mulf %93, %93 : vector<8x32xf32>
    %cst_39 = arith.constant dense<0.000000e+00> : vector<8xf32>
    %95 = vector.multi_reduction <add>, %94, %cst_39 [1] : vector<8x32xf32> to vector<8xf32>
    %96 = vector.shape_cast %95 : vector<8xf32> to vector<8x1xf32>
    %cst_40 = arith.constant 3.200000e+01 : f32
    %97 = vector.broadcast %cst_40 : f32 to vector<8x1xf32>
    %98 = arith.divf %96, %97 : vector<8x1xf32>
    %99 = vector.broadcast %91 : vector<8x1xf32> to vector<8x32xf32>
    %100 = arith.subf %87, %99 : vector<8x32xf32>
    %cst_41 = arith.constant 9.99999997E-7 : f32
    %101 = vector.broadcast %cst_41 : f32 to vector<8x1xf32>
    %102 = arith.addf %98, %101 : vector<8x1xf32>
    %103 = math.rsqrt %102 : vector<8x1xf32>
    %104 = vector.broadcast %103 : vector<8x1xf32> to vector<8x32xf32>
    %105 = arith.mulf %100, %104 : vector<8x32xf32>
    %c0_42 = arith.constant 0 : index
    %c0_43 = arith.constant 0 : index
    %106 = vector.load %arg7[%c0_42, %c0_43] : memref<1x32xf32, #tpu.memory_space<vmem>>, vector<1x32xf32>
    %107 = vector.broadcast %106 : vector<1x32xf32> to vector<8x32xf32>
    %108 = arith.mulf %105, %107 : vector<8x32xf32>
    %c0_44 = arith.constant 0 : index
    %c0_45 = arith.constant 0 : index
    %109 = vector.load %arg8[%c0_44, %c0_45] : memref<1x32xf32, #tpu.memory_space<vmem>>, vector<1x32xf32>
    %110 = vector.broadcast %109 : vector<1x32xf32> to vector<8x32xf32>
    %111 = arith.addf %108, %110 : vector<8x32xf32>
    %c0_46 = arith.constant 0 : index
    %c0_47 = arith.constant 0 : index
    %c0_48 = arith.constant 0 : index
    %112 = vector.load %arg9[%c0_46, %c0_47, %c0_48] : memref<1x8x32xf32, #tpu.memory_space<vmem>>, vector<1x8x32xf32>
    %113 = vector.shape_cast %112 : vector<1x8x32xf32> to vector<8x32xf32>
    %114 = vector.shape_cast %111 : vector<8x32xf32> to vector<1x8x32xf32>
    tpu.vector_store %arg9[%c0_46, %c0_47, %c0_48], %114 {strides = array<i32>} : memref<1x8x32xf32, #tpu.memory_space<vmem>>, vector<1x8x32xf32>,
    return
  }
  func.func @transform_0(%arg0: i32) -> (i32, i32, i32) {
    %c0_i32 = arith.constant 0 : i32
    %c0_i32_0 = arith.constant 0 : i32
    %c0_i32_1 = arith.constant 0 : i32
    return %arg0, %c0_i32, %c0_i32_0 : i32, i32, i32
  }
  func.func @transform_1(%arg0: i32) -> (i32, i32, i32) {
    %c0_i32 = arith.constant 0 : i32
    %c0_i32_0 = arith.constant 0 : i32
    %c0_i32_1 = arith.constant 0 : i32
    return %arg0, %c0_i32, %c0_i32_0 : i32, i32, i32
  }
  func.func @transform_2(%arg0: i32) -> (i32, i32, i32) {
    %c0_i32 = arith.constant 0 : i32
    %c0_i32_0 = arith.constant 0 : i32
    %c0_i32_1 = arith.constant 0 : i32
    return %arg0, %c0_i32, %c0_i32_0 : i32, i32, i32
  }
  func.func @transform_3(%arg0: i32) -> (i32, i32) {
    %c0_i32 = arith.constant 0 : i32
    %c0_i32_0 = arith.constant 0 : i32
    %c0_i32_1 = arith.constant 0 : i32
    return %c0_i32, %c0_i32_0 : i32, i32
  }
  func.func @transform_4(%arg0: i32) -> (i32, i32) {
    %c0_i32 = arith.constant 0 : i32
    %c0_i32_0 = arith.constant 0 : i32
    %c0_i32_1 = arith.constant 0 : i32
    return %c0_i32, %c0_i32_0 : i32, i32
  }
  func.func @transform_5(%arg0: i32) -> (i32, i32) {
    %c0_i32 = arith.constant 0 : i32
    %c0_i32_0 = arith.constant 0 : i32
    %c0_i32_1 = arith.constant 0 : i32
    return %c0_i32, %c0_i32_0 : i32, i32
  }
  func.func @transform_6(%arg0: i32) -> (i32, i32) {
    %c0_i32 = arith.constant 0 : i32
    %c0_i32_0 = arith.constant 0 : i32
    %c0_i32_1 = arith.constant 0 : i32
    return %c0_i32, %c0_i32_0 : i32, i32
  }
  func.func @transform_7(%arg0: i32) -> (i32, i32) {
    %c0_i32 = arith.constant 0 : i32
    %c0_i32_0 = arith.constant 0 : i32
    %c0_i32_1 = arith.constant 0 : i32
    return %c0_i32, %c0_i32_0 : i32, i32
  }
  func.func @transform_8(%arg0: i32) -> (i32, i32, i32) {
    %c0_i32 = arith.constant 0 : i32
    %c0_i32_0 = arith.constant 0 : i32
    %c0_i32_1 = arith.constant 0 : i32
    return %arg0, %c0_i32, %c0_i32_0 : i32, i32, i32
  }
}

module attributes {stable_mosaic.version = 11 : i64} {
  func.func @_ffn_kernel(%arg0: i32, %arg1: memref<1x8x32xf32, #tpu.memory_space<vmem>>, %arg2: memref<32x64xf32, #tpu.memory_space<vmem>>, %arg3: memref<1x64xf32, #tpu.memory_space<vmem>>, %arg4: memref<64x32xf32, #tpu.memory_space<vmem>>, %arg5: memref<1x32xf32, #tpu.memory_space<vmem>>, %arg6: memref<1x32xf32, #tpu.memory_space<vmem>>, %arg7: memref<1x32xf32, #tpu.memory_space<vmem>>, %arg8: memref<1x8x32xf32, #tpu.memory_space<vmem>>) attributes {dimension_semantics = [#tpu.dimension_semantics<parallel>], iteration_bounds = array<i64: 2>, scalar_prefetch = 0 : i64, scratch_operands = 0 : i64, tpu.core_type = #tpu.core_type<tc>, window_params = [{transform_indices = @transform_0, window_bounds = array<i64: 1, 8, 32>}, {pipeline_mode = #tpu.pipeline_mode<synchronous>, transform_indices = @transform_1, window_bounds = array<i64: 32, 64>}, {pipeline_mode = #tpu.pipeline_mode<synchronous>, transform_indices = @transform_2, window_bounds = array<i64: 1, 64>}, {pipeline_mode = #tpu.pipeline_mode<synchronous>, transform_indices = @transform_3, window_bounds = array<i64: 64, 32>}, {pipeline_mode = #tpu.pipeline_mode<synchronous>, transform_indices = @transform_4, window_bounds = array<i64: 1, 32>}, {pipeline_mode = #tpu.pipeline_mode<synchronous>, transform_indices = @transform_5, window_bounds = array<i64: 1, 32>}, {pipeline_mode = #tpu.pipeline_mode<synchronous>, transform_indices = @transform_6, window_bounds = array<i64: 1, 32>}, {transform_indices = @transform_7, window_bounds = array<i64: 1, 8, 32>}]} {
    %c0 = arith.constant 0 : index
    %c0_0 = arith.constant 0 : index
    %c0_1 = arith.constant 0 : index
    %0 = vector.load %arg1[%c0, %c0_0, %c0_1] : memref<1x8x32xf32, #tpu.memory_space<vmem>>, vector<1x8x32xf32>
    %1 = vector.shape_cast %0 : vector<1x8x32xf32> to vector<8x32xf32>
    %c0_2 = arith.constant 0 : index
    %c0_3 = arith.constant 0 : index
    %2 = vector.load %arg2[%c0_2, %c0_3] : memref<32x64xf32, #tpu.memory_space<vmem>>, vector<32x64xf32>
    %cst = arith.constant dense<0.000000e+00> : vector<8x64xf32>
    %3 = tpu.matmul %1, %2, %cst {dimension_numbers = #tpu.dot_dimension_numbers<[1], [0], [0], [1], [0, 0, 1, 1], [], []>} : vector<8x32xf32>, vector<32x64xf32>, vector<8x64xf32> -> vector<8x64xf32>
    %c0_4 = arith.constant 0 : index
    %c0_5 = arith.constant 0 : index
    %4 = vector.load %arg3[%c0_4, %c0_5] : memref<1x64xf32, #tpu.memory_space<vmem>>, vector<1x64xf32>
    %5 = vector.broadcast %4 : vector<1x64xf32> to vector<8x64xf32>
    %6 = arith.addf %3, %5 : vector<8x64xf32>
    %cst_6 = arith.constant 0.000000e+00 : f32
    %7 = vector.broadcast %cst_6 : f32 to vector<8x64xf32>
    %8 = arith.maximumf %6, %7 : vector<8x64xf32>
    %c0_7 = arith.constant 0 : index
    %c0_8 = arith.constant 0 : index
    %9 = vector.load %arg4[%c0_7, %c0_8] : memref<64x32xf32, #tpu.memory_space<vmem>>, vector<64x32xf32>
    %cst_9 = arith.constant dense<0.000000e+00> : vector<8x32xf32>
    %10 = tpu.matmul %8, %9, %cst_9 {dimension_numbers = #tpu.dot_dimension_numbers<[1], [0], [0], [1], [0, 0, 1, 1], [], []>} : vector<8x64xf32>, vector<64x32xf32>, vector<8x32xf32> -> vector<8x32xf32>
    %c0_10 = arith.constant 0 : index
    %c0_11 = arith.constant 0 : index
    %11 = vector.load %arg5[%c0_10, %c0_11] : memref<1x32xf32, #tpu.memory_space<vmem>>, vector<1x32xf32>
    %12 = vector.broadcast %11 : vector<1x32xf32> to vector<8x32xf32>
    %13 = arith.addf %10, %12 : vector<8x32xf32>
    %14 = arith.addf %13, %1 : vector<8x32xf32>
    %cst_12 = arith.constant dense<0.000000e+00> : vector<8xf32>
    %15 = vector.multi_reduction <add>, %14, %cst_12 [1] : vector<8x32xf32> to vector<8xf32>
    %16 = vector.shape_cast %15 : vector<8xf32> to vector<8x1xf32>
    %cst_13 = arith.constant 3.200000e+01 : f32
    %17 = vector.broadcast %cst_13 : f32 to vector<8x1xf32>
    %18 = arith.divf %16, %17 : vector<8x1xf32>
    %19 = vector.broadcast %18 : vector<8x1xf32> to vector<8x32xf32>
    %20 = arith.subf %14, %19 : vector<8x32xf32>
    %21 = arith.mulf %20, %20 : vector<8x32xf32>
    %cst_14 = arith.constant dense<0.000000e+00> : vector<8xf32>
    %22 = vector.multi_reduction <add>, %21, %cst_14 [1] : vector<8x32xf32> to vector<8xf32>
    %23 = vector.shape_cast %22 : vector<8xf32> to vector<8x1xf32>
    %cst_15 = arith.constant 3.200000e+01 : f32
    %24 = vector.broadcast %cst_15 : f32 to vector<8x1xf32>
    %25 = arith.divf %23, %24 : vector<8x1xf32>
    %26 = vector.broadcast %18 : vector<8x1xf32> to vector<8x32xf32>
    %27 = arith.subf %14, %26 : vector<8x32xf32>
    %cst_16 = arith.constant 9.99999997E-7 : f32
    %28 = vector.broadcast %cst_16 : f32 to vector<8x1xf32>
    %29 = arith.addf %25, %28 : vector<8x1xf32>
    %30 = math.rsqrt %29 : vector<8x1xf32>
    %31 = vector.broadcast %30 : vector<8x1xf32> to vector<8x32xf32>
    %32 = arith.mulf %27, %31 : vector<8x32xf32>
    %c0_17 = arith.constant 0 : index
    %c0_18 = arith.constant 0 : index
    %33 = vector.load %arg6[%c0_17, %c0_18] : memref<1x32xf32, #tpu.memory_space<vmem>>, vector<1x32xf32>
    %34 = vector.broadcast %33 : vector<1x32xf32> to vector<8x32xf32>
    %35 = arith.mulf %32, %34 : vector<8x32xf32>
    %c0_19 = arith.constant 0 : index
    %c0_20 = arith.constant 0 : index
    %36 = vector.load %arg7[%c0_19, %c0_20] : memref<1x32xf32, #tpu.memory_space<vmem>>, vector<1x32xf32>
    %37 = vector.broadcast %36 : vector<1x32xf32> to vector<8x32xf32>
    %38 = arith.addf %35, %37 : vector<8x32xf32>
    %c0_21 = arith.constant 0 : index
    %c0_22 = arith.constant 0 : index
    %c0_23 = arith.constant 0 : index
    %39 = vector.load %arg8[%c0_21, %c0_22, %c0_23] : memref<1x8x32xf32, #tpu.memory_space<vmem>>, vector<1x8x32xf32>
    %40 = vector.shape_cast %39 : vector<1x8x32xf32> to vector<8x32xf32>
    %41 = vector.shape_cast %38 : vector<8x32xf32> to vector<1x8x32xf32>
    tpu.vector_store %arg8[%c0_21, %c0_22, %c0_23], %41 {strides = array<i32>} : memref<1x8x32xf32, #tpu.memory_space<vmem>>, vector<1x8x32xf32>,
    return
  }
  func.func @transform_0(%arg0: i32) -> (i32, i32, i32) {
    %c0_i32 = arith.constant 0 : i32
    %c0_i32_0 = arith.constant 0 : i32
    %c0_i32_1 = arith.constant 0 : i32
    return %arg0, %c0_i32, %c0_i32_0 : i32, i32, i32
  }
  func.func @transform_1(%arg0: i32) -> (i32, i32) {
    %c0_i32 = arith.constant 0 : i32
    %c0_i32_0 = arith.constant 0 : i32
    %c0_i32_1 = arith.constant 0 : i32
    return %c0_i32, %c0_i32_0 : i32, i32
  }
  func.func @transform_2(%arg0: i32) -> (i32, i32) {
    %c0_i32 = arith.constant 0 : i32
    %c0_i32_0 = arith.constant 0 : i32
    %c0_i32_1 = arith.constant 0 : i32
    return %c0_i32, %c0_i32_0 : i32, i32
  }
  func.func @transform_3(%arg0: i32) -> (i32, i32) {
    %c0_i32 = arith.constant 0 : i32
    %c0_i32_0 = arith.constant 0 : i32
    %c0_i32_1 = arith.constant 0 : i32
    return %c0_i32, %c0_i32_0 : i32, i32
  }
  func.func @transform_4(%arg0: i32) -> (i32, i32) {
    %c0_i32 = arith.constant 0 : i32
    %c0_i32_0 = arith.constant 0 : i32
    %c0_i32_1 = arith.constant 0 : i32
    return %c0_i32, %c0_i32_0 : i32, i32
  }
  func.func @transform_5(%arg0: i32) -> (i32, i32) {
    %c0_i32 = arith.constant 0 : i32
    %c0_i32_0 = arith.constant 0 : i32
    %c0_i32_1 = arith.constant 0 : i32
    return %c0_i32, %c0_i32_0 : i32, i32
  }
  func.func @transform_6(%arg0: i32) -> (i32, i32) {
    %c0_i32 = arith.constant 0 : i32
    %c0_i32_0 = arith.constant 0 : i32
    %c0_i32_1 = arith.constant 0 : i32
    return %c0_i32, %c0_i32_0 : i32, i32
  }
  func.func @transform_7(%arg0: i32) -> (i32, i32, i32) {
    %c0_i32 = arith.constant 0 : i32
    %c0_i32_0 = arith.constant 0 : i32
    %c0_i32_1 = arith.constant 0 : i32
    return %arg0, %c0_i32, %c0_i32_0 : i32, i32, i32
  }
}

module attributes {stable_mosaic.version = 11 : i64} {
  func.func @_proj_kernel(%arg0: i32, %arg1: memref<1x8x32xf32, #tpu.memory_space<vmem>>, %arg2: memref<32x32xf32, #tpu.memory_space<vmem>>, %arg3: memref<1x8x32xf32, #tpu.memory_space<vmem>>) attributes {dimension_semantics = [#tpu.dimension_semantics<parallel>], iteration_bounds = array<i64: 2>, scalar_prefetch = 0 : i64, scratch_operands = 0 : i64, tpu.core_type = #tpu.core_type<tc>, window_params = [{transform_indices = @transform_0, window_bounds = array<i64: 1, 8, 32>}, {pipeline_mode = #tpu.pipeline_mode<synchronous>, transform_indices = @transform_1, window_bounds = array<i64: 32, 32>}, {transform_indices = @transform_2, window_bounds = array<i64: 1, 8, 32>}]} {
    %c0 = arith.constant 0 : index
    %c0_0 = arith.constant 0 : index
    %c0_1 = arith.constant 0 : index
    %0 = vector.load %arg1[%c0, %c0_0, %c0_1] : memref<1x8x32xf32, #tpu.memory_space<vmem>>, vector<1x8x32xf32>
    %1 = vector.shape_cast %0 : vector<1x8x32xf32> to vector<8x32xf32>
    %c0_2 = arith.constant 0 : index
    %c0_3 = arith.constant 0 : index
    %2 = vector.load %arg2[%c0_2, %c0_3] : memref<32x32xf32, #tpu.memory_space<vmem>>, vector<32x32xf32>
    %cst = arith.constant dense<0.000000e+00> : vector<8x32xf32>
    %3 = tpu.matmul %1, %2, %cst {dimension_numbers = #tpu.dot_dimension_numbers<[1], [1], [0], [0], [0, 0, 1, 0], [], []>} : vector<8x32xf32>, vector<32x32xf32>, vector<8x32xf32> -> vector<8x32xf32>
    %cst_4 = arith.constant 0.176776692 : f32
    %4 = vector.broadcast %cst_4 : f32 to vector<8x32xf32>
    %5 = arith.mulf %3, %4 : vector<8x32xf32>
    %c0_5 = arith.constant 0 : index
    %c0_6 = arith.constant 0 : index
    %c0_7 = arith.constant 0 : index
    %6 = vector.load %arg3[%c0_5, %c0_6, %c0_7] : memref<1x8x32xf32, #tpu.memory_space<vmem>>, vector<1x8x32xf32>
    %7 = vector.shape_cast %6 : vector<1x8x32xf32> to vector<8x32xf32>
    %8 = vector.shape_cast %5 : vector<8x32xf32> to vector<1x8x32xf32>
    tpu.vector_store %arg3[%c0_5, %c0_6, %c0_7], %8 {strides = array<i32>} : memref<1x8x32xf32, #tpu.memory_space<vmem>>, vector<1x8x32xf32>,
    return
  }
  func.func @transform_0(%arg0: i32) -> (i32, i32, i32) {
    %c0_i32 = arith.constant 0 : i32
    %c0_i32_0 = arith.constant 0 : i32
    %c0_i32_1 = arith.constant 0 : i32
    return %arg0, %c0_i32, %c0_i32_0 : i32, i32, i32
  }
  func.func @transform_1(%arg0: i32) -> (i32, i32) {
    %c0_i32 = arith.constant 0 : i32
    %c0_i32_0 = arith.constant 0 : i32
    %c0_i32_1 = arith.constant 0 : i32
    return %c0_i32, %c0_i32_0 : i32, i32
  }
  func.func @transform_2(%arg0: i32) -> (i32, i32, i32) {
    %c0_i32 = arith.constant 0 : i32
    %c0_i32_0 = arith.constant 0 : i32
    %c0_i32_1 = arith.constant 0 : i32
    return %arg0, %c0_i32, %c0_i32_0 : i32, i32, i32
  }
}

</mosaic_0001>

<bundles_post_ra>
// kernel: transformer_forward.15
= control target key start
LH: loop header
LB: loop body
LE: loop exit
PB: predicated region body
PF: predicated region fallthrough
CT: control target
= control target key end

     0   :  { %s583_s24 = smov 0   ;;  %s663_s0 = inlined_call_operand.vmem [shape: f32[2,10,32], index: 0, kind: input, shape index: {}]   ;;  %s664_s1 = inlined_call_operand.vmem [shape: f32[32,64], index: 1, kind: input, shape index: {}]   ;;  %s665_s2 = inlined_call_operand.vmem [shape: f32[1,64], index: 2, kind: input, shape index: {}]   ;;  %s666_s3 = inlined_call_operand.vmem [shape: f32[64,32], index: 3, kind: input, shape index: {}]   ;;  %s667_s4 = inlined_call_operand.vmem [shape: f32[1,32], index: 4, kind: input, shape index: {}]   ;;  %s668_s5 = inlined_call_operand.vmem [shape: f32[1,32], index: 5, kind: input, shape index: {}]   ;;  %s669_s6 = inlined_call_operand.vmem [shape: f32[1,32], index: 6, kind: input, shape index: {}]   ;;  %s670_s7 = inlined_call_operand.vmem [shape: f32[2,10,32], index: 7, kind: output, shape index: {}]  }
   0x1 LB: > { %s486_s25 = sadd.s32 4294967295, %s540_s24   ;;  %p490_p0 = scmp.ge.s32.totalorder %s540_s24, 1  ;;  %s540_s24 = sphi %s583_s24, %s17_s24  }
   0x2   : > { %p237_p1 = scmp.lt.s32.totalorder %s540_s24, 3 }
   0x4   : > { %p238_p2 = pnand %p490_p0, %p237_p1 }
   0x5   : > { %p269_p3 = scmp.lt.s32.totalorder (!%p238_p2), %s486_s25, 1 }
   0x6   : > { %241 = sbr.rel (%p238_p2) target bundleno = 560 (0x230), region = 48 }
   0xb   : > { %v284_v0 = vld [vmem:[%s664_s1 + $0x18] sm:$0xff]  ;;  %v283_v1 = vld [vmem:[%s664_s1 + $0x10] sm:$0xff]  ;;  %v282_v4 = vld [vmem:[%s664_s1 + $0x8] sm:$0xff]  ;;  %s672_s25 = smov (!%p269_p3, %s486_s25), 1  ;;  %vm289_vm0 = vcmask 261120   ;;  %vm333_vm1 = vcmask 523264  }
   0xc   : > { %308 = vmatpush.msra.mxu0 %v284_v0  ;;  %503 = vmatpush.msra.mxu3 %v284_v0  ;;  %v328_v2 = vld [vmem:[%s666_s3 + $0x38] sm:$0xff]  ;;  %v327_v3 = vld [vmem:[%s666_s3 + $0x30] sm:$0xff]  ;;  %v326_v5 = vld [vmem:[%s666_s3 + $0x28] sm:$0xff]  ;;  %s501_s17 = sshll.u32 %s672_s25, 4  ;;  %vm368_vm2 = vcmask 254976   ;;  %v542_v30 = vmov 32.0  }
   0xd   : > { %348 = vmatpush.msra.mxu1 %v328_v2  ;;  %507 = vmatpush.msra.mxu2 %v328_v2  ;;  %v281_v6 = vld [vmem:[%s664_s1] sm:$0xff]  ;;  %s273_s20 = scalar_lea.vmem %s663_s0, %s501_s17  ;;  %v324_v10 = vld [vmem:[%s666_s3 + $0x18] sm:$0xff]  ;;  %v323_v11 = vld [vmem:[%s666_s3 + $0x10] sm:$0xff]  ;;  %528 = vrcp.f32 %v542_v30  ;;  %s278_s21 = scalar_lea.vmem %s670_s7, %s501_s17 }
   0xe   : > { %309 = vmatpush.msra.mxu0 %v283_v1  ;;  %504 = vmatpush.msra.mxu3 %v283_v1  ;;  %v279_v7 = vld [vmem:[%s273_s20] sm:$0xff]  ;;  %v280_v8 = vld [vmem:[%s273_s20 + $0x8] sm:$0x3] }
   0xf   : > { %349 = vmatpush.msra.mxu1 %v327_v3  ;;  %508 = vmatpush.msra.mxu2 %v327_v3  ;;  %v325_v9 = vld [vmem:[%s666_s3 + $0x20] sm:$0xff]  ;;  %v322_v12 = vld [vmem:[%s666_s3 + $0x8] sm:$0xff] }
  0x10   : > { %310 = vmatpush.msra.mxu0 %v282_v4  ;;  %505 = vmatpush.msra.mxu3 %v282_v4  ;;  %v321_v13 = vld [vmem:[%s666_s3] sm:$0xff] }
  0x11   : > { %350 = vmatpush.msra.mxu1 %v326_v5  ;;  %509 = vmatpush.msra.mxu2 %v326_v5  ;;  %v524_v14 = vld [vmem:[%s665_s2] ss:$0 sm:$0xff] }
  0x12   : > { %311 = vmatpush.msra.mxu0 %v281_v6  ;;  %506 = vmatpush.msra.mxu3 %v281_v6  ;;  %v525_v21 = vld [vmem:[%s667_s4] ss:$0 sm:$0xff] }
  0x13   : > { %495 = vmatmul.msk.f32.vlgmr.msra.gmra.mxu0 %vm289_vm0, %v279_v7  ;;  %496 = vmatmul.msk.f32.vlgmr.msra.gmra.mxu3 %vm289_vm0, %v280_v8  ;;  %v529_v31 = vpop.eup %528  ;;  %v526_v59 = vld [vmem:[%s668_s5] ss:$0 sm:$0xff] }
  0x14   : > { %351 = vmatpush.msra.mxu1 %v325_v9  ;;  %510 = vmatpush.msra.mxu2 %v325_v9  ;;  %v373_v32 = vmul.f32 32.0, %v529_v31  ;;  %vm377_vm3 = vweird.f32 %v529_v31  ;;  %v527_v62 = vld [vmem:[%s669_s6] ss:$0 sm:$0xff] }
  0x16   : > { %352 = vmatpush.msra.mxu1 %v324_v10  ;;  %511 = vmatpush.msra.mxu2 %v324_v10  ;;  %v374_v33 = vsub.f32 1.0, %v373_v32 }
  0x18   : > { %353 = vmatpush.msra.mxu1 %v323_v11  ;;  %512 = vmatpush.msra.mxu2 %v323_v11  ;;  %v375_v34 = vmul.f32 %v529_v31, %v374_v33 }
  0x1a   : > { %354 = vmatpush.msra.mxu1 %v322_v12  ;;  %513 = vmatpush.msra.mxu2 %v322_v12  ;;  %v376_v35 = vadd.f32 %v529_v31, %v375_v34 }
  0x1c   : > { %355 = vmatpush.msra.mxu1 %v321_v13  ;;  %514 = vmatpush.msra.mxu2 %v321_v13  ;;  %v378_v36 = vsel %vm377_vm3, %v529_v31, %v376_v35 }
  0x90   : > { %v313_v15 = vpop.f32.mrf.mxu0 }
  0x91   : > { %v314_v16 = vadd.f32 %v524_v14, %v313_v15 }
  0x93   : > { %v319_v17 = vmax.f32 %v314_v16, 0.0 }
  0x95   : > { %497 = vmatmul.msk.f32.vlgmr.msra.gmra.mxu1 %vm333_vm1, %v319_v17 }
  0x96   : > { %v316_v18 = vpop.f32.mrf.mxu3 }
  0x97   : > { %v317_v19 = vadd.f32 %v524_v14, %v316_v18 }
  0x99   : > { %v320_v20 = vmax.f32 %v317_v19, 0.0 }
  0x9b   : > { %498 = vmatmul.msk.f32.vlgmr.msra.gmra.mxu2 %vm333_vm1, %v320_v20 }
 0x112   : > { %v357_v22 = vpop.f32.mrf.mxu1 }
 0x113   : > { %v358_v23 = vadd.f32 %v525_v21, %v357_v22 }
 0x115   : > { %v363_v24 = vadd.f32 %v358_v23, %v279_v7 }
 0x117   : > { %v365_v25 = vsel %vm289_vm0, %v363_v24, 0.0 }
 0x118   : > { %366 = vadd.xlane.f32.xlu0 %v365_v25 }
 0x11e   : > { %v360_v26 = vpop.f32.mrf.mxu2 }
 0x11f   : > { %v361_v27 = vadd.f32 %v525_v21, %v360_v26 }
 0x121   : > { %v364_v28 = vadd.f32 %v361_v27, %v280_v8 }
 0x123   : > { %v369_v29 = vsel %vm368_vm2, %v364_v28, 0.0 }
 0x124   : > { %370 = vadd.xlane.f32.xlu0 %v369_v29 }
 0x18b   : > { %v367_v37 = vpop.xlane.xlu0 %366 }
 0x18c   : > { %v379_v38 = vmul.f32 %v378_v36, %v367_v37 }
 0x18e   : > { %v381_v39 = vsub.f32 %v363_v24, %v379_v38 }
 0x190   : > { %v383_v40 = vmul.f32 %v381_v39, %v381_v39 }
 0x192   : > { %v385_v41 = vsel %vm289_vm0, %v383_v40, 0.0 }
 0x193   : > { %386 = vadd.xlane.f32.xlu1 %v385_v41 }
 0x197   : > { %v371_v42 = vpop.xlane.xlu0 %370 }
 0x198   : > { %v380_v43 = vmul.f32 %v378_v36, %v371_v42 }
 0x19a   : > { %v382_v44 = vsub.f32 %v364_v28, %v380_v43 }
 0x19c   : > { %v384_v45 = vmul.f32 %v382_v44, %v382_v44 }
 0x19e   : > { %v388_v46 = vsel %vm368_vm2, %v384_v45, 0.0 }
 0x19f   : > { %389 = vadd.xlane.f32.xlu1 %v388_v46 }
 0x206   : > { %v387_v47 = vpop.xlane.xlu1 %386 }
 0x207   : > { %v391_v48 = vmul.f32 %v387_v47, %v378_v36 }
 0x209   : > { %v393_v49 = vadd.f32 1e-06, %v391_v48 }
 0x20b   : > { %530 = vrsqrt.f32 %v393_v49  ;;  %vm401_vm5 = vweird.f32 %v393_v49 }
 0x211   : > { %v531_v50 = vpop.eup %530 }
 0x212   : > { %v396_v51 = vmul.f32 %v531_v50, %v393_v49  ;;  %v390_v52 = vpop.xlane.xlu1 %389  ;;  %vm402_vm4 = vweird.f32 %v531_v50 }
 0x213   : > { %v392_v53 = vmul.f32 %v390_v52, %v378_v36  ;;  %vm403_vm6 = vmor %vm401_vm5, %vm402_vm4 }
 0x214   : > { %v397_v54 = vmul.f32 %v531_v50, %v396_v51 }
 0x215   : > { %v394_v55 = vadd.f32 1e-06, %v392_v53 }
 0x216   : > { %v398_v56 = vmul.f32 0.5, %v397_v54 }
 0x217   : > { %532 = vrsqrt.f32 %v394_v55  ;;  %vm411_vm8 = vweird.f32 %v394_v55 }
 0x218   : > { %v399_v57 = vsub.f32 1.5, %v398_v56 }
 0x21a   : > { %v400_v58 = vmul.f32 %v531_v50, %v399_v57 }
 0x21c   : > { %v404_v60 = vsel %vm403_vm6, %v531_v50, %v400_v58 }
 0x21d   : > { %v533_v61 = vpop.eup %532  ;;  %v415_v63 = vmul.f32 %v404_v60, %v381_v39 }
 0x21e   : > { %v406_v0 = vmul.f32 %v533_v61, %v394_v55  ;;  %vm412_vm7 = vweird.f32 %v533_v61 }
 0x21f   : > { %v421_v1 = vmul.f32 %v526_v59, %v415_v63  ;;  %vm413_vm9 = vmor %vm411_vm8, %vm412_vm7 }
 0x220   : > { %v407_v2 = vmul.f32 %v533_v61, %v406_v0 }
 0x221   : > { %v427_v3 = vadd.f32 %v527_v62, %v421_v1 }
 0x222   : > { %v408_v4 = vmul.f32 0.5, %v407_v2 }
 0x223   : > { %429 = vst.msk [vmem:[%s278_s21] sm:$0xff] %vm289_vm0, %v427_v3 }
 0x224   : > { %v409_v5 = vsub.f32 1.5, %v408_v4 }
 0x226   : > { %v410_v6 = vmul.f32 %v533_v61, %v409_v5 }
 0x228   : > { %v414_v7 = vsel %vm413_vm9, %v533_v61, %v410_v6 }
 0x229   : > { %v416_v8 = vmul.f32 %v414_v7, %v382_v44 }
 0x22b   : > { %v422_v9 = vmul.f32 %v526_v59, %v416_v8 }
 0x22d   : > { %v428_v10 = vadd.f32 %v527_v62, %v422_v9 }
 0x22f   : > { %430 = vst.msk [vmem:[%s278_s21 + $0x8] sm:$0x3] %vm368_vm2, %v428_v10 }
 0x230 PF: > { %s17_s24 = sadd.s32 1, %s540_s24  }
 0x231   : > { %p14_p4 = scmp.ge.s32.totalorder %s17_s24, 4  }
 0x233   :  { %16 = sbr.rel (!%p14_p4) target bundleno = 1 (0x1), region = 78 }

// kernel: transformer_forward.13
= control target key start
LH: loop header
LB: loop body
LE: loop exit
PB: predicated region body
PF: predicated region fallthrough
CT: control target
= control target key end

     0   :  { %s518_s21 = smov [#allocation3]   ;;  %s622_s0 = inlined_call_operand.vmem [shape: s32[2,10], index: 0, kind: input, shape index: {}]   ;;  %s623_s1 = inlined_call_operand.hbm [shape: f32[32,32], index: 1, kind: input, shape index: {}]   ;;  %s624_s2 = inlined_call_operand.vmem [shape: f32[10,32], index: 2, kind: input, shape index: {}]   ;;  %s625_s3 = inlined_call_operand.vmem [shape: f32[1,32], index: 3, kind: input, shape index: {}]   ;;  %s626_s4 = inlined_call_operand.vmem [shape: f32[1,32], index: 4, kind: input, shape index: {}]   ;;  %s627_s5 = inlined_call_operand.vmem [shape: f32[2,10,32], index: 5, kind: output, shape index: {}]  }
   0x1   :  { %s11_s20 = sshll.u32 %s622_s0, 4  ;;  %s12_s20 = int_to_ptr.vmem [resolvable:$true] %s11_s20 }
   0x2   :  { %14 = dma.vmem_to_smem %s12_s20, 32, %s518_s21, [#allocation2] }
   0x3   :  { %508 = dma.done.wait [#allocation2], 32 }
   0x4   :  { %509 = vsyncadd [#allocation2], 4294967264 }
   0x5   :  { %17 = sfence }
   0x6   :  { %18 = vsyncpa [#allocation5], 0  ;;  %s556_s22 = smov 0  }
   0x7 LB: > { %s150_s0 = sshll.u32 %s623_s1, 4  ;;  %s565_s25 = sadd.s32 4294967295, %s516_s22   ;;  %s516_s22 = sphi %s556_s22, %s24_s22   ;;  %s151_s0 = int_to_ptr.hbm [resolvable:$true] %s150_s0 }
   0x8   : > { %p421_p0 = scmp.ge.s32.totalorder %s516_s22, 1  ;;  %p139_p1 = scmp.lt.s32.totalorder %s516_s22, 3 }
   0x9   : > { %p439_p2 = scmp.eq.s32.totalorder %s565_s25, 0  ;;  %s519_s26 = smov [#allocation4]  }
   0xa   : > { %p140_p3 = pnand %p421_p0, %p139_p1  ;;  %s152_s27 = sshll.u32 %s519_s26, 4  ;;  %s153_s27 = int_to_ptr.vmem [resolvable:$true] %s152_s27 }
   0xb   : > { %s520_s28 = smov 128   ;;  %s521_s29 = smov 8  }
   0xc   : > { %p435_p4 = pneg %p140_p3  ;;  %177 = sbr.rel (%p140_p3) target bundleno = 317 (0x13d), region = 36 }
   0xe   : > { %p436_p5 = pnand %p439_p2, %p435_p4 }
  0x10   : > { %438 = dma.hbm_to_vmem [thread:$0]  (!%p436_p5), %s151_s0, 512, %s153_s27, [#allocation5], %s520_s28, %s520_s28, %s521_s29  }
  0x11   : > { %511 = dma.done.wait (%p439_p2), [#allocation5], 512  }
  0x12   : > { %513 = vsyncadd (%p439_p2), [#allocation5], 4294966784  ;;  %s571_s30 = sshll.u32 %s565_s25, 7  ;;  %vm268_vm0 = vcmask 1040384   ;;  %vm270_vm1 = vcmask 1041408   ;;  %vm272_vm2 = vcmask 1042432  }
  0x13   : > { %s205_s6 = sld [smem:[#allocation3 + %s571_s30]]  ;;  %s208_s7 = sadd.s32 1, %s571_s30  ;;  %vm274_vm3 = vcmask 1043456   ;;  %vm276_vm4 = vcmask 1044480   ;;  %vm278_vm5 = vcmask 1045504   ;;  %vm280_vm6 = vcmask 1046528  }
  0x14   : > { %s209_s8 = sld [smem:[#allocation3 + %s208_s7]]  ;;  %s212_s9 = sadd.s32 2, %s571_s30  ;;  %v283_v21 = vld [vmem:[%s624_s2] sm:$0xff]  ;;  %vm287_vm7 = vcmask 261120   ;;  %v284_v27 = vld [vmem:[%s624_s2 + $0x8] sm:$0x3] }
  0x15   : > { %s213_s10 = sld [smem:[#allocation3 + %s212_s9]]  ;;  %s216_s11 = sadd.s32 3, %s571_s30  ;;  %vm291_vm8 = vcmask 254976   ;;  %v522_v32 = vmov 32.0   ;;  %v454_v63 = vld [vmem:[%s625_s3] ss:$0 sm:$0xff] }
  0x16   : > { %s217_s12 = sld [smem:[#allocation3 + %s216_s11]]  ;;  %s220_s13 = sadd.s32 4, %s571_s30  ;;  %456 = vrcp.f32 %v522_v32 }
  0x17   : > { %s221_s14 = sld [smem:[#allocation3 + %s220_s13]]  ;;  %s224_s15 = sadd.s32 5, %s571_s30 }
  0x18   : > { %s225_s16 = sld [smem:[#allocation3 + %s224_s15]]  ;;  %s228_s17 = sadd.s32 6, %s571_s30 }
  0x19   : > { %s580_s18 = sld [smem:[#allocation3 + %s228_s17]]  ;;  %s206_s19 = scalar_lea.vmem [#allocation4], %s205_s6 }
  0x1a   : > { %v207_v0 = vld [vmem:[%s206_s19] sm:$0x1]  ;;  %s232_s20 = sadd.s32 7, %s571_s30  ;;  %s210_s21 = scalar_lea.vmem [#allocation4], %s209_s8 }
  0x1b   : > { %v211_v1 = vld [vmem:[%s210_s21] sm:$0x1]  ;;  %s583_s23 = sld [smem:[#allocation3 + %s232_s20]]  ;;  %s214_s24 = scalar_lea.vmem [#allocation4], %s213_s10 }
  0x1c   : > { %v215_v2 = vld [vmem:[%s214_s24] sm:$0x1]  ;;  %v245_v3 = vrot.slane %v211_v1, 7  ;;  %s236_s0 = sadd.s32 8, %s571_s30  ;;  %s218_s26 = scalar_lea.vmem [#allocation4], %s217_s12  ;;  %v457_v33 = vpop.eup %456 }
  0x1d   : > { %v219_v4 = vld [vmem:[%s218_s26] sm:$0x1]  ;;  %v248_v5 = vrot.slane %v215_v2, 6  ;;  %s586_s27 = sld [smem:[#allocation3 + %s236_s0]]  ;;  %s222_s28 = scalar_lea.vmem [#allocation4], %s221_s14  ;;  %v296_v34 = vmul.f32 32.0, %v457_v33  ;;  %vm300_vm9 = vweird.f32 %v457_v33 }
  0x1e   : > { %v223_v6 = vld [vmem:[%s222_s28] sm:$0x1]  ;;  %v251_v7 = vrot.slane %v219_v4, 5  ;;  %v269_v8 = vsel %vm268_vm0, %v207_v0, %v245_v3  ;;  %s240_s29 = sadd.s32 9, %s571_s30  ;;  %s226_s6 = scalar_lea.vmem [#allocation4], %s225_s16 }
  0x1f   : > { %v227_v9 = vld [vmem:[%s226_s6] sm:$0x1]  ;;  %v254_v10 = vrot.slane %v223_v6, 4  ;;  %v271_v11 = vsel %vm270_vm1, %v269_v8, %v248_v5  ;;  %s241_s7 = sld [smem:[#allocation3 + %s240_s29]]  ;;  %s230_s8 = scalar_lea.vmem [#allocation4], %s580_s18  ;;  %v297_v35 = vsub.f32 1.0, %v296_v34 }
  0x20   : > { %v231_v12 = vld [vmem:[%s230_s8] sm:$0x1]  ;;  %v257_v13 = vrot.slane %v227_v9, 3  ;;  %v273_v14 = vsel %vm272_vm2, %v271_v11, %v251_v7  ;;  %p199_p6 = scmp.lt.s32.totalorder %s565_s25, 1 }
  0x21   : > { %v260_v15 = vrot.slane %v231_v12, 2  ;;  %v275_v16 = vsel %vm274_vm3, %v273_v14, %v254_v10  ;;  %s234_s9 = scalar_lea.vmem [#allocation4], %s583_s23  ;;  %v298_v36 = vmul.f32 %v457_v33, %v297_v35  ;;  %v455_v2 = vld [vmem:[%s626_s4] ss:$0 sm:$0xff] }
  0x22   : > { %v235_v17 = vld [vmem:[%s234_s9] sm:$0x1]  ;;  %v277_v18 = vsel %vm276_vm4, %v275_v16, %v257_v13  ;;  %s629_s25 = smov (!%p199_p6, %s565_s25), 1 }
  0x23   : > { %v263_v19 = vrot.slane %v235_v17, 1  ;;  %v279_v20 = vsel %vm278_vm5, %v277_v18, %v260_v15  ;;  %s238_s11 = scalar_lea.vmem [#allocation4], %s586_s27  ;;  %v299_v37 = vadd.f32 %v457_v33, %v298_v36  ;;  %s430_s17 = sshll.u32 %s629_s25, 4 }
  0x24   : > { %v239_v24 = vld [vmem:[%s238_s11] sm:$0x1]  ;;  %s203_s23 = scalar_lea.vmem %s627_s5, %s430_s17 }
  0x25   : > { %v281_v22 = vsel %vm280_vm6, %v279_v20, %v263_v19  ;;  %s242_s12 = scalar_lea.vmem [#allocation4], %s241_s7  ;;  %v301_v38 = vsel %vm300_vm9, %v457_v33, %v299_v37 }
  0x26   : > { %v285_v23 = vadd.f32 %v283_v21, %v281_v22  ;;  %v243_v25 = vld [vmem:[%s242_s12] sm:$0x1] }
  0x27   : > { %v266_v26 = vrot.slane %v243_v25, 7 }
  0x28   : > { %v288_v28 = vsel %vm287_vm7, %v285_v23, 0.0 }
  0x29   : > { %289 = vadd.xlane.f32.xlu0 %v288_v28  ;;  %v282_v29 = vsel %vm268_vm0, %v239_v24, %v266_v26 }
  0x2a   : > { %v286_v30 = vadd.f32 %v284_v27, %v282_v29 }
  0x2c   : > { %v292_v31 = vsel %vm291_vm8, %v286_v30, 0.0 }
  0x31   : > { %293 = vadd.xlane.f32.xlu0 %v292_v31 }
  0x9c   : > { %v290_v39 = vpop.xlane.xlu0 %289 }
  0x9d   : > { %v302_v40 = vmul.f32 %v301_v38, %v290_v39 }
  0x9f   : > { %v304_v41 = vsub.f32 %v285_v23, %v302_v40 }
  0xa1   : > { %v306_v42 = vmul.f32 %v304_v41, %v304_v41 }
  0xa3   : > { %v308_v43 = vsel %vm287_vm7, %v306_v42, 0.0 }
  0xa4   : > { %309 = vadd.xlane.f32.xlu1 %v308_v43  ;;  %v294_v44 = vpop.xlane.xlu0 %293 }
  0xa5   : > { %v303_v45 = vmul.f32 %v301_v38, %v294_v44 }
  0xa7   : > { %v305_v46 = vsub.f32 %v286_v30, %v303_v45 }
  0xa9   : > { %v307_v47 = vmul.f32 %v305_v46, %v305_v46 }
  0xab   : > { %v311_v48 = vsel %vm291_vm8, %v307_v47, 0.0 }
  0xac   : > { %312 = vadd.xlane.f32.xlu1 %v311_v48 }
 0x117   : > { %v310_v49 = vpop.xlane.xlu1 %309 }
 0x118   : > { %v314_v50 = vmul.f32 %v310_v49, %v301_v38 }
 0x11a   : > { %v316_v51 = vadd.f32 1e-06, %v314_v50 }
 0x11c   : > { %458 = vrsqrt.f32 %v316_v51  ;;  %vm324_vm11 = vweird.f32 %v316_v51 }
 0x11f   : > { %v313_v52 = vpop.xlane.xlu1 %312 }
 0x120   : > { %v315_v53 = vmul.f32 %v313_v52, %v301_v38 }
 0x122   : > { %v459_v54 = vpop.eup %458  ;;  %v317_v55 = vadd.f32 1e-06, %v315_v53 }
 0x123   : > { %v319_v56 = vmul.f32 %v459_v54, %v316_v51  ;;  %vm325_vm10 = vweird.f32 %v459_v54 }
 0x124   : > { %460 = vrsqrt.f32 %v317_v55  ;;  %vm326_vm12 = vmor %vm324_vm11, %vm325_vm10  ;;  %vm334_vm14 = vweird.f32 %v317_v55 }
 0x125   : > { %v320_v57 = vmul.f32 %v459_v54, %v319_v56 }
 0x127   : > { %v321_v58 = vmul.f32 0.5, %v320_v57 }
 0x129   : > { %v322_v59 = vsub.f32 1.5, %v321_v58 }
 0x12a   : > { %v461_v60 = vpop.eup %460 }
 0x12b   : > { %v323_v61 = vmul.f32 %v459_v54, %v322_v59  ;;  %v329_v62 = vmul.f32 %v461_v60, %v317_v55  ;;  %vm335_vm13 = vweird.f32 %v461_v60 }
 0x12c   : > { %vm336_vm15 = vmor %vm334_vm14, %vm335_vm13 }
 0x12d   : > { %v327_v0 = vsel %vm326_vm12, %v459_v54, %v323_v61  ;;  %v330_v1 = vmul.f32 %v461_v60, %v329_v62 }
 0x12e   : > { %v338_v3 = vmul.f32 %v327_v0, %v304_v41 }
 0x12f   : > { %v331_v4 = vmul.f32 0.5, %v330_v1 }
 0x130   : > { %v344_v5 = vmul.f32 %v454_v63, %v338_v3 }
 0x131   : > { %v332_v6 = vsub.f32 1.5, %v331_v4 }
 0x132   : > { %v350_v7 = vadd.f32 %v455_v2, %v344_v5 }
 0x133   : > { %v333_v8 = vmul.f32 %v461_v60, %v332_v6 }
 0x134   : > { %352 = vst.msk [vmem:[%s203_s23] sm:$0xff] %vm287_vm7, %v350_v7 }
 0x135   : > { %v337_v9 = vsel %vm336_vm15, %v461_v60, %v333_v8 }
 0x136   : > { %v339_v10 = vmul.f32 %v337_v9, %v305_v46 }
 0x138   : > { %v345_v11 = vmul.f32 %v454_v63, %v339_v10 }
 0x13a   : > { %v351_v12 = vadd.f32 %v455_v2, %v345_v11 }
 0x13c   : > { %353 = vst.msk [vmem:[%s203_s23 + $0x8] sm:$0x3] %vm291_vm8, %v351_v12 }
 0x13d PF: > { %s24_s22 = sadd.s32 1, %s516_s22  }
 0x13e   : > { %p21_p7 = scmp.ge.s32.totalorder %s24_s22, 4  }
 0x140   :  { %23 = sbr.rel (!%p21_p7) target bundleno = 7 (0x7), region = 78 }
 0x145   :  { %375 = vsyncpa [#allocation5], 1 }
 0x146   :  { %377 = vsyncpa [#allocation5 + $0x1], 1 }

// kernel: transformer_forward.14
= control target key start
LH: loop header
LB: loop body
LE: loop exit
PB: predicated region body
PF: predicated region fallthrough
CT: control target
= control target key end

     0   :  { %13 = vsyncpa [#allocation3], 0  ;;  %s1617_s0 = inlined_call_operand.vmem [shape: f32[2,10,32], index: 0, kind: input, shape index: {}, may-alias: {0,1}]   ;;  %s1618_s1 = inlined_call_operand.vmem [shape: f32[2,10,32], index: 1, kind: input, shape index: {}, may-alias: {0,1}]   ;;  %s1619_s2 = inlined_call_operand.vmem [shape: s32[2,1,10], index: 2, kind: input, shape index: {}]   ;;  %s1620_s3 = inlined_call_operand.hbm [shape: f32[32,32], index: 3, kind: input, shape index: {}]   ;;  %s1621_s4 = inlined_call_operand.hbm [shape: f32[32,64], index: 4, kind: input, shape index: {}]   ;;  %s1622_s5 = inlined_call_operand.hbm [shape: f32[32,32], index: 5, kind: input, shape index: {}]   ;;  %s1623_s6 = inlined_call_operand.vmem [shape: f32[1,32], index: 6, kind: input, shape index: {}]   ;;  %s1624_s7 = inlined_call_operand.vmem [shape: f32[1,32], index: 7, kind: input, shape index: {}]   ;;  %s1625_s8 = inlined_call_operand.vmem [shape: f32[2,10,32], index: 8, kind: output, shape index: {}]  }
   0x1   :  { %14 = vsyncpa [#allocation5], 0  ;;  %s1423_s27 = smov 0  }
   0x2 LB: > { %s1429_s28 = sadd.s32 4294967295, %s1359_s27   ;;  %p1104_p0 = scmp.ge.s32.totalorder %s1359_s27, 1  ;;  %s1359_s27 = sphi %s1423_s27, %s20_s27  }
   0x3   : > { %p234_p1 = scmp.lt.s32.totalorder %s1359_s27, 3  ;;  %p1184_p2 = scmp.eq.s32.totalorder %s1429_s28, 0 }
   0x4   : > { %s259_s9 = sshll.u32 %s1621_s4, 4  ;;  %s245_s13 = sshll.u32 %s1620_s3, 4  ;;  %s260_s9 = int_to_ptr.hbm [resolvable:$true] %s259_s9  ;;  %s246_s13 = int_to_ptr.hbm [resolvable:$true] %s245_s13 }
   0x5   : > { %p1437_p3 = pnand %p1104_p0, %p234_p1  ;;  %s1361_s14 = smov [#allocation4]  }
   0x6   : > { %s261_s15 = sshll.u32 %s1361_s14, 4  ;;  %s1362_s16 = smov [#allocation2]   ;;  %s262_s15 = int_to_ptr.vmem [resolvable:$true] %s261_s15 }
   0x7   : > { %p1174_p4 = pneg %p1437_p3  ;;  %s247_s17 = sshll.u32 %s1362_s16, 4  ;;  %s248_s17 = int_to_ptr.vmem [resolvable:$true] %s247_s17 }
   0x8   : > { %s273_s20 = sshll.u32 %s1622_s5, 4  ;;  %s1363_s21 = smov 128   ;;  %s274_s20 = int_to_ptr.hbm [resolvable:$true] %s273_s20 }
   0x9   : > { %p1175_p5 = pnand %p1184_p2, %p1174_p4  ;;  %s1364_s22 = smov 8  }
   0xa   : > { %s1365_s23 = smov [#allocation6]   ;;  %319 = sbr.rel (%p1437_p3) target bundleno = 1732 (0x6c4), region = 52 }
   0xb   : > { %1180 = dma.hbm_to_vmem [thread:$0]  (!%p1175_p5), %s260_s9, 512, %s262_s15, [#allocation5], %s1363_s21, %s1363_s21, %s1364_s22  }
   0xc   : > { %1177 = dma.hbm_to_vmem [thread:$0]  (!%p1175_p5), %s246_s13, 512, %s248_s17, [#allocation3], %s1363_s21, %s1363_s21, %s1364_s22  }
   0xd   : > { %s275_s24 = sshll.u32 %s1365_s23, 4  ;;  %s276_s24 = int_to_ptr.vmem [resolvable:$true] %s275_s24 }
   0xe   : > { %1183 = dma.hbm_to_vmem [thread:$0]  (!%p1175_p5), %s274_s20, 512, %s276_s24, [#allocation5], %s1363_s21, %s1363_s21, %s1364_s22  }
   0xf   : > { %1350 = dma.done.wait (%p1184_p2), [#allocation3], 512  }
  0x10   : > { %1352 = vsyncadd (%p1184_p2), [#allocation3], 4294966784 }
  0x11   : > { %1354 = dma.done.wait (%p1184_p2), [#allocation5], 1024  }
  0x12   : > { %1356 = vsyncadd (%p1184_p2), [#allocation5], 4294966272  ;;  %p372_p6 = scmp.lt.s32.totalorder %s1429_s28, 1  ;;  %v433_v0 = vld [vmem:[#allocation4 + $0x18] sm:$0xff]  ;;  %v432_v1 = vld [vmem:[#allocation4 + $0x10] sm:$0xff]  ;;  %vm398_vm0 = vcmask 261120  }
  0x13   : > { %452 = vmatpush.msra.mxu1 %v433_v0  ;;  %v431_v2 = vld [vmem:[#allocation4 + $0x8] sm:$0xff]  ;;  %v397_v3 = vld [vmem:[#allocation2 + $0x18] sm:$0xff]  ;;  %v396_v4 = vld [vmem:[#allocation2 + $0x10] sm:$0xff]  ;;  %s1366_s12 = smov 96   ;;  %vm468_vm1 = vcmask 64512   ;;  %s1367_s13 = smov 120  }
  0x14   : > { %s1630_s28 = smov (!%p372_p6, %s1429_s28), 1  ;;  %417 = vmatpush.msra.mxu0 %v397_v3  ;;  %v430_v5 = vld [vmem:[#allocation4] sm:$0xff]  ;;  %1158 = vmatpush.msra.mxu2 %v397_v3  ;;  %v395_v6 = vld [vmem:[#allocation2 + $0x8] sm:$0xff]  ;;  %s1368_s14 = smov 112   ;;  %vm541_vm2 = vcmask 1041408   ;;  %v1370_v23 = vmov 0  }
  0x15   : > { %s1466_s25 = sshll.u32 %s1630_s28, 4  ;;  %453 = vmatpush.msra.mxu1 %v432_v1  ;;  %v394_v8 = vld [vmem:[#allocation2] sm:$0xff]  ;;  %s1369_s15 = smov 104   ;;  %vm506_vm5 = vcmask 80896   ;;  %vm510_vm6 = vcmask 74752   ;;  %vm890_vm7 = vcmask 130048  }
  0x16   : > { %s381_s30 = scalar_lea.vmem %s1618_s1, %s1466_s25  ;;  %s376_s11 = scalar_lea.vmem %s1617_s0, %s1466_s25  ;;  %418 = vmatpush.msra.mxu0 %v396_v4  ;;  %1159 = vmatpush.msra.mxu2 %v396_v4  ;;  %vm893_vm8 = vcmask 195584   ;;  %vm932_vm9 = vcmask 254976  }
  0x17   : > { %454 = vmatpush.msra.mxu1 %v431_v2  ;;  %v392_v7 = vld [vmem:[%s381_s30] sm:$0xff]  ;;  %v1479_v10 = vld [vmem:[%s376_s11 + $0x8] sm:$0x3]  ;;  %s384_s18 = scalar_lea.vmem %s1619_s2, %s1630_s28  ;;  %s1371_s28 = smov 88  }
  0x18   : > { %419 = vmatpush.msra.mxu0 %v395_v6  ;;  %v1476_v9 = vld [vmem:[%s376_s11] sm:$0xff]  ;;  %1160 = vmatpush.msra.mxu2 %v395_v6  ;;  %v393_v11 = vld [vmem:[%s381_s30 + $0x8] sm:$0x3]  ;;  %s1372_s19 = smov 80   ;;  %s1373_s20 = smov 72  }
  0x19   : > { %455 = vmatpush.msra.mxu1 %v430_v5  ;;  %v463_v22 = vld [vmem:[%s384_s18] sm:$0x1]  ;;  %s1374_s21 = smov 16   ;;  %s1375_s22 = smov 8  }
  0x1a   : > { %1121 = vmatmul.msk.f32.vlgmr.msra.gmra.mxu1 %vm398_vm0, %v392_v7  ;;  %420 = vmatpush.msra.mxu0 %v394_v8  ;;  %vm464_vm3 = vcmp.ne.s32.totalorder %v463_v22, 0  ;;  %s1376_s23 = smov 24   ;;  %s389_s11 = scalar_lea.vmem %s1625_s8, %s1466_s25 }
  0x1b   : > { %1119 = vmatmul.msk.f32.vlgmr.msra.gmra.mxu0 %vm398_vm0, %v1476_v9  ;;  %1161 = vmatpush.msra.mxu2 %v394_v8  ;;  %v465_v24 = vsel %vm464_vm3, 1, %v1370_v23 }
  0x1c   : > { %1120 = vmatmul.msk.f32.vlgmr.msra.gmra.mxu2 %vm398_vm0, %v1479_v10  ;;  %v466_v25 = vperm.slane %v465_v24, 0 }
  0x1e   : > { %vm1513_vm4 = vcmp.eq.s32.totalorder %v466_v25, 1 }
  0x22   : > { %1122 = vmatmul.msk.f32.gmra.mxu1 %vm398_vm0, %v393_v11 }
  0x97   : > { %v1486_v12 = vpop.f32.mrf.mxu1 }
  0x98   : > { %530 = vrot.lane.b32.xlu2 %v1486_v12, %s1366_s12  ;;  %v422_v14 = vpop.f32.mrf.mxu0 }
  0x99   : > { %v428_v15 = vmul.f32 0.35355338, %v422_v14 }
  0x9f   : > { %v1489_v13 = vpop.f32.mrf.mxu1  ;;  %v425_v16 = vpop.f32.mrf.mxu2 }
  0xa0   : > { %571 = vrot.lane.b32.xlu2 %v1486_v12, %s1367_s13  ;;  %532 = vrot.lane.b32.xlu1 %v1489_v13, %s1366_s12  ;;  %v429_v17 = vmul.f32 0.35355338, %v425_v16 }
  0xa1   : > { %1123 = vmatpush.xpose.msk.msrb.mxu2 %vm468_vm1, %v1489_v13 }
  0xa5   : > { %1124 = vmatpush.xpose.msk.msrb.mxu2 %vm468_vm1, %v1486_v12 }
  0xa8   : > { %1125 = vmatmul.msk.f32.vlgmr.msrb.gmra.mxu2 %vm468_vm1, %v428_v15  ;;  %672 = vrot.lane.b32.xlu2 %v1489_v13, %s1368_s14 }
  0xa9   : > { %567 = vrot.lane.b32.xlu1 %v428_v15, %s1367_s13 }
  0xb0   : > { %1126 = vmatmul.msk.f32.gmra.mxu2 %vm468_vm1, %v429_v17  ;;  %769 = vrot.lane.b32.xlu2 %v1486_v12, %s1369_s15 }
  0xb1   : > { %771 = vrot.lane.b32.xlu1 %v1489_v13, %s1369_s15 }
  0xf2   : > { %v531_v18 = vpop.permute.xlu2 %530 }
  0xfa   : > { %v572_v19 = vpop.permute.xlu2 %571 }
 0x102   : > { %v673_v20 = vpop.permute.xlu2 %672 }
 0x103   : > { %1137 = vmatpush.xpose.msk.msrb.mxu1 %vm468_vm1, %v673_v20 }
 0x10a   : > { %v770_v48 = vpop.permute.xlu2 %769 }
 0x112   : > { %v533_v21 = vpop.permute.xlu1 %532 }
 0x113   : > { %1127 = vmatpush.msk.msra.mxu3 %vm541_vm2, %v533_v21 }
 0x115   : > { %559 = vmatpush.msra.mxu3 %v531_v18 }
 0x11b   : > { %v568_v46 = vpop.permute.xlu1 %567 }
 0x123   : > { %v772_v47 = vpop.permute.xlu1 %771 }
 0x12b   : > { %v498_v27 = vpop.f32.mrf.mxu2 }
 0x12c   : > { %v504_v28 = vsel %vm1513_vm4, %v498_v27, -1e+09 }
 0x12d   : > { %v507_v29 = vsel %vm506_vm5, %v504_v28, -inf }
 0x12e   : > { %508 = vmax.xlane.f32.xlu0 %v507_v29 }
 0x133   : > { %v501_v30 = vpop.f32.mrf.mxu2 }
 0x134   : > { %v505_v31 = vsel %vm1513_vm4, %v501_v30, -1e+09 }
 0x135   : > { %v511_v32 = vsel %vm510_vm6, %v505_v31, -inf }
 0x136   : > { %512 = vmax.xlane.f32.xlu0 %v511_v32 }
 0x14a   : > { %573 = vrot.lane.b32.xlu0 %v1489_v13, %s1367_s13 }
 0x152   : > { %569 = vrot.lane.b32.xlu0 %v429_v17, %s1367_s13 }
 0x15a   : > { %670 = vrot.lane.b32.xlu0 %v1486_v12, %s1368_s14 }
 0x162   : > { %765 = vrot.lane.b32.xlu0 %v428_v15, %s1369_s15 }
 0x1a1   : > { %v509_v33 = vpop.xlane.xlu0 %508 }
 0x1a2   : > { %v514_v34 = vsub.f32 %v504_v28, %v509_v33 }
 0x1a4   : > { %v516_v35 = vmul.f32 1.442695, %v514_v34 }
 0x1a6   : > { %1217 = vpow2.f32 %v516_v35 }
 0x1a9   : > { %v513_v36 = vpop.xlane.xlu0 %512 }
 0x1aa   : > { %v515_v37 = vsub.f32 %v505_v31, %v513_v36 }
 0x1ac   : > { %v1218_v38 = vpop.eup %1217  ;;  %v518_v39 = vmul.f32 1.442695, %v515_v37 }
 0x1ad   : > { %v520_v40 = vsel %vm506_vm5, %v1218_v38, 0.0 }
 0x1ae   : > { %1219 = vpow2.f32 %v518_v39  ;;  %521 = vadd.xlane.f32.xlu1 %v520_v40 }
 0x1b4   : > { %v1220_v41 = vpop.eup %1219 }
 0x1b5   : > { %v523_v42 = vsel %vm510_vm6, %v1220_v41, 0.0 }
 0x1b6   : > { %524 = vadd.xlane.f32.xlu2 %v523_v42 }
 0x1bc   : > { %v574_v43 = vpop.permute.xlu0 %573 }
 0x1bd   : > { %1130 = vmatpush.xpose.msk.msrb.mxu3 %vm468_vm1, %v574_v43 }
 0x1c1   : > { %1131 = vmatpush.xpose.msk.msrb.mxu3 %vm468_vm1, %v572_v19 }
 0x1c4   : > { %v570_v44 = vpop.permute.xlu0 %569 }
 0x1c7   : > { %666 = vrot.lane.b32.xlu1 %v428_v15, %s1368_s14 }
 0x1cc   : > { %v671_v45 = vpop.permute.xlu0 %670 }
 0x1cd   : > { %1138 = vmatpush.xpose.msk.msrb.mxu1 %vm468_vm1, %v671_v45 }
 0x1ce   : > { %668 = vrot.lane.b32.xlu2 %v429_v17, %s1368_s14 }
 0x1cf   : > { %767 = vrot.lane.b32.xlu1 %v429_v17, %s1369_s15 }
 0x1d4   : > { %v766_v57 = vpop.permute.xlu0 %765 }
 0x221   : > { %v522_v49 = vpop.xlane.xlu1 %521 }
 0x222   : > { %1221 = vrcp.f32 %v522_v49 }
 0x228   : > { %v1222_v50 = vpop.eup %1221 }
 0x229   : > { %v525_v51 = vpop.xlane.xlu2 %524  ;;  %v528_v52 = vmul.f32 %v1222_v50, %v1218_v38 }
 0x22a   : > { %1223 = vrcp.f32 %v525_v51 }
 0x22b   : > { %1128 = vmatmul.msk.f32.vlgmr.msra.gmra.mxu3 %vm506_vm5, %v528_v52 }
 0x22c   : > { %1144 = vmatpush.xpose.msk.msra.mxu3 %vm468_vm1, %v772_v47 }
 0x230   : > { %v1224_v53 = vpop.eup %1223  ;;  %1145 = vmatpush.xpose.msk.msra.mxu3 %vm468_vm1, %v770_v48 }
 0x231   : > { %v529_v54 = vmul.f32 %v1224_v53, %v1220_v41  ;;  %v669_v56 = vpop.permute.xlu2 %668 }
 0x233   : > { %1129 = vmatmul.msk.f32.gmra.mxu3 %vm506_vm5, %v529_v54 }
 0x239   : > { %v667_v55 = vpop.permute.xlu1 %666 }
 0x23a   : > { %1139 = vmatmul.msk.f32.vlgmr.msrb.gmra.mxu1 %vm468_vm1, %v667_v55 }
 0x23b   : > { %1132 = vmatmul.msk.f32.vlgmr.msrb.gmra.mxu3 %vm468_vm1, %v568_v46 }
 0x241   : > { %v768_v58 = vpop.permute.xlu1 %767 }
 0x242   : > { %1140 = vmatmul.msk.f32.gmra.mxu1 %vm468_vm1, %v669_v56 }
 0x243   : > { %1133 = vmatmul.msk.f32.gmra.mxu3 %vm468_vm1, %v570_v44 }
 0x24b   : > { %1146 = vmatmul.msk.f32.vlgmr.msra.gmra.mxu3 %vm468_vm1, %v766_v57 }
 0x253   : > { %1147 = vmatmul.msk.f32.gmra.mxu3 %vm468_vm1, %v768_v58 }
 0x2ae   : > { %v1547_v59 = vpop.f32.mrf.mxu3 }
 0x2b6   : > { %v1549_v60 = vpop.f32.mrf.mxu3 }
 0x2b7   : > { %v699_v61 = vpop.f32.mrf.mxu1 }
 0x2b8   : > { %v705_v62 = vsel %vm1513_vm4, %v699_v61, -1e+09 }
 0x2b9   : > { %v707_v63 = vsel %vm506_vm5, %v705_v62, -inf }
 0x2ba   : > { %708 = vmax.xlane.f32.xlu1 %v707_v63 }
 0x2be   : > { %v600_v0 = vpop.f32.mrf.mxu3 }
 0x2bf   : > { %v606_v1 = vsel %vm1513_vm4, %v600_v0, -1e+09  ;;  %v702_v2 = vpop.f32.mrf.mxu1 }
 0x2c0   : > { %v706_v3 = vsel %vm1513_vm4, %v702_v2, -1e+09  ;;  %v608_v4 = vsel %vm506_vm5, %v606_v1, -inf }
 0x2c1   : > { %609 = vmax.xlane.f32.xlu0 %v608_v4  ;;  %v710_v5 = vsel %vm510_vm6, %v706_v3, -inf }
 0x2c2   : > { %711 = vmax.xlane.f32.xlu2 %v710_v5 }
 0x2c6   : > { %v603_v6 = vpop.f32.mrf.mxu3 }
 0x2c7   : > { %v607_v7 = vsel %vm1513_vm4, %v603_v6, -1e+09 }
 0x2c8   : > { %v611_v8 = vsel %vm510_vm6, %v607_v7, -inf }
 0x2ca   : > { %612 = vmax.xlane.f32.xlu2 %v611_v8 }
 0x2ce   : > { %v798_v11 = vpop.f32.mrf.mxu3 }
 0x2cf   : > { %v804_v14 = vsel %vm1513_vm4, %v798_v11, -1e+09 }
 0x2d0   : > { %v806_v15 = vsel %vm506_vm5, %v804_v14, -inf }
 0x2d1   : > { %807 = vmax.xlane.f32.xlu0 %v806_v15 }
 0x2d6   : > { %v801_v16 = vpop.f32.mrf.mxu3 }
 0x2d7   : > { %v805_v17 = vsel %vm1513_vm4, %v801_v16, -1e+09 }
 0x2d8   : > { %v809_v18 = vsel %vm510_vm6, %v805_v17, -inf }
 0x2d9   : > { %810 = vmax.xlane.f32.xlu1 %v809_v18  ;;  %v899_v18 = vld [vmem:[#allocation6 + $0x18] sm:$0xff] }
 0x2da   : > { %918 = vmatpush.msra.mxu1 %v899_v18 }
 0x2e2   : > { %632 = vrot.lane.b32.xlu2 %v1489_v13, %s1371_s28 }
 0x32d   : > { %v709_v19 = vpop.xlane.xlu1 %708 }
 0x32e   : > { %v713_v20 = vsub.f32 %v705_v62, %v709_v19  ;;  %v898_v19 = vld [vmem:[#allocation6 + $0x10] sm:$0xff] }
 0x32f   : > { %919 = vmatpush.msra.mxu1 %v898_v19 }
 0x330   : > { %v715_v21 = vmul.f32 1.442695, %v713_v20  ;;  %v897_v20 = vld [vmem:[#allocation6 + $0x8] sm:$0xff] }
 0x331   : > { %920 = vmatpush.msra.mxu1 %v897_v20 }
 0x332   : > { %1225 = vpow2.f32 %v715_v21 }
 0x334   : > { %v610_v22 = vpop.xlane.xlu0 %609 }
 0x335   : > { %v614_v23 = vsub.f32 %v606_v1, %v610_v22  ;;  %v712_v24 = vpop.xlane.xlu2 %711  ;;  %v896_v22 = vld [vmem:[#allocation6] sm:$0xff] }
 0x336   : > { %v714_v37 = vsub.f32 %v706_v3, %v712_v24  ;;  %921 = vmatpush.msra.mxu1 %v896_v22 }
 0x337   : > { %v616_v25 = vmul.f32 1.442695, %v614_v23 }
 0x338   : > { %v1226_v27 = vpop.eup %1225  ;;  %v717_v38 = vmul.f32 1.442695, %v714_v37 }
 0x339   : > { %1227 = vpow2.f32 %v616_v25  ;;  %v719_v28 = vsel %vm506_vm5, %v1226_v27, 0.0 }
 0x33a   : > { %720 = vadd.xlane.f32.xlu1 %v719_v28 }
 0x33d   : > { %v613_v26 = vpop.xlane.xlu2 %612 }
 0x33e   : > { %v615_v39 = vsub.f32 %v607_v7, %v613_v26 }
 0x33f   : > { %v1228_v29 = vpop.eup %1227 }
 0x340   : > { %v620_v30 = vsel %vm506_vm5, %v1228_v29, 0.0  ;;  %v618_v40 = vmul.f32 1.442695, %v615_v39 }
 0x341   : > { %621 = vadd.xlane.f32.xlu0 %v620_v30 }
 0x344   : > { %v808_v31 = vpop.xlane.xlu0 %807 }
 0x345   : > { %v812_v32 = vsub.f32 %v804_v14, %v808_v31  ;;  %v633_v33 = vpop.permute.xlu2 %632 }
 0x346   : > { %1134 = vmatpush.msk.msrb.mxu0 %vm541_vm2, %v633_v33 }
 0x347   : > { %v814_v34 = vmul.f32 1.442695, %v812_v32 }
 0x349   : > { %1229 = vpow2.f32 %v814_v34 }
 0x34a   : > { %1231 = vpow2.f32 %v717_v38 }
 0x34b   : > { %1233 = vpow2.f32 %v618_v40 }
 0x34c   : > { %v811_v45 = vpop.xlane.xlu1 %810 }
 0x34d   : > { %v813_v46 = vsub.f32 %v805_v17, %v811_v45 }
 0x34f   : > { %v1230_v35 = vpop.eup %1229  ;;  %v816_v47 = vmul.f32 1.442695, %v813_v46 }
 0x350   : > { %v818_v36 = vsel %vm506_vm5, %v1230_v35, 0.0  ;;  %v1232_v41 = vpop.eup %1231 }
 0x351   : > { %819 = vadd.xlane.f32.xlu2 %v818_v36  ;;  %v722_v42 = vsel %vm510_vm6, %v1232_v41, 0.0  ;;  %v1234_v43 = vpop.eup %1233  ;;  %1235 = vpow2.f32 %v816_v47 }
 0x352   : > { %v623_v44 = vsel %vm510_vm6, %v1234_v43, 0.0 }
 0x353   : > { %731 = vrot.lane.b32.xlu1 %v1489_v13, %s1372_s19 }
 0x355   : > { %630 = vrot.lane.b32.xlu0 %v1486_v12, %s1371_s28 }
 0x357   : > { %v1236_v49 = vpop.eup %1235 }
 0x358   : > { %v821_v53 = vsel %vm510_vm6, %v1236_v49, 0.0 }
 0x35b   : > { %729 = vrot.lane.b32.xlu1 %v1486_v12, %s1372_s19 }
 0x369   : > { %828 = vrot.lane.b32.xlu2 %v1486_v12, %s1373_s20 }
 0x37f   : > { %723 = vadd.xlane.f32.xlu0 %v722_v42 }
 0x385   : > { %624 = vadd.xlane.f32.xlu1 %v623_v44 }
 0x39e   : > { %830 = vrot.lane.b32.xlu1 %v1489_v13, %s1373_s20 }
 0x3ad   : > { %v721_v48 = vpop.xlane.xlu1 %720 }
 0x3b4   : > { %v622_v12 = vpop.xlane.xlu0 %621 }
 0x3b5   : > { %1237 = vrcp.f32 %v622_v12 }
 0x3b6   : > { %1239 = vrcp.f32 %v721_v48 }
 0x3bb   : > { %v1238_v50 = vpop.eup %1237 }
 0x3bc   : > { %v628_v54 = vmul.f32 %v1238_v50, %v1228_v29  ;;  %v1240_v13 = vpop.eup %1239 }
 0x3bd   : > { %v727_v55 = vmul.f32 %v1240_v13, %v1226_v27 }
 0x3c4   : > { %v820_v1 = vpop.xlane.xlu2 %819 }
 0x3c5   : > { %v732_v51 = vpop.permute.xlu1 %731 }
 0x3c6   : > { %1141 = vmatpush.msk.msra.mxu2 %vm541_vm2, %v732_v51 }
 0x3c7   : > { %v631_v52 = vpop.permute.xlu0 %630 }
 0x3c8   : > { %822 = vadd.xlane.f32.xlu1 %v821_v53  ;;  %658 = vmatpush.msrb.mxu0 %v631_v52 }
 0x3c9   : > { %1135 = vmatmul.msk.f32.vlgmr.msrb.gmra.mxu0 %vm506_vm5, %v628_v54 }
 0x3cc   : > { %v829_v5 = vpop.permute.xlu2 %828 }
 0x3cd   : > { %v730_v56 = vpop.permute.xlu1 %729 }
 0x3ce   : > { %757 = vmatpush.msra.mxu2 %v730_v56 }
 0x3cf   : > { %1142 = vmatmul.msk.f32.vlgmr.msra.gmra.mxu2 %vm506_vm5, %v727_v55 }
 0x3f2   : > { %v724_v57 = vpop.xlane.xlu0 %723 }
 0x3f3   : > { %1241 = vrcp.f32 %v724_v57 }
 0x3f8   : > { %v625_v58 = vpop.xlane.xlu1 %624 }
 0x3f9   : > { %v1242_v61 = vpop.eup %1241  ;;  %1243 = vrcp.f32 %v625_v58 }
 0x3fa   : > { %v728_v62 = vmul.f32 %v1242_v61, %v1232_v41  ;;  %1245 = vrcp.f32 %v820_v1  ;;  %v1216_v1 = vld [vmem:[%s1624_s7] ss:$0 sm:$0xff] }
 0x3fc   : > { %1143 = vmatmul.msk.f32.gmra.mxu2 %vm506_vm5, %v728_v62 }
 0x3ff   : > { %v1244_v63 = vpop.eup %1243 }
 0x400   : > { %v629_v0 = vmul.f32 %v1244_v63, %v1234_v43  ;;  %v1246_v2 = vpop.eup %1245  ;;  %v1215_v63 = vld [vmem:[%s1623_s6] ss:$0 sm:$0xff] }
 0x401   : > { %v826_v4 = vmul.f32 %v1246_v2, %v1230_v35 }
 0x402   : > { %1136 = vmatmul.msk.f32.gmra.mxu0 %vm506_vm5, %v629_v0 }
 0x410   : > { %v831_v3 = vpop.permute.xlu1 %830 }
 0x411   : > { %1148 = vmatpush.msk.msra.mxu0 %vm541_vm2, %v831_v3 }
 0x413   : > { %856 = vmatpush.msra.mxu0 %v829_v5 }
 0x414   : > { %1149 = vmatmul.msk.f32.vlgmr.msra.gmra.mxu0 %vm506_vm5, %v826_v4 }
 0x43b   : > { %v823_v6 = vpop.xlane.xlu1 %822 }
 0x43c   : > { %1247 = vrcp.f32 %v823_v6 }
 0x442   : > { %v1248_v7 = vpop.eup %1247 }
 0x443   : > { %v827_v8 = vmul.f32 %v1248_v7, %v1236_v49 }
 0x445   : > { %1150 = vmatmul.msk.f32.gmra.mxu0 %vm506_vm5, %v827_v8 }
 0x446   : > { %v660_v14 = vpop.f32.mrf.mxu0 }
 0x452   : > { %v759_v11 = vpop.f32.mrf.mxu2 }
 0x453   : > { %874 = vrot.lane.b32.xlu0 %v759_v11, %s1374_s21 }
 0x45b   : > { %866 = vrot.lane.b32.xlu0 %v660_v14, %s1375_s22 }
 0x47f   : > { %v663_v15 = vpop.f32.mrf.mxu0  ;;  %v762_v17 = vpop.f32.mrf.mxu2 }
 0x480   : > { %868 = vrot.lane.b32.xlu0 %v663_v15, %s1375_s22 }
 0x491   : > { %v858_v16 = vpop.f32.mrf.mxu0 }
 0x492   : > { %882 = vrot.lane.b32.xlu2 %v858_v16, %s1376_s23 }
 0x49a   : > { %876 = vrot.lane.b32.xlu2 %v762_v17, %s1374_s21 }
 0x4c2   : > { %v861_v21 = vpop.f32.mrf.mxu0 }
 0x4c3   : > { %884 = vrot.lane.b32.xlu1 %v861_v21, %s1376_s23 }
 0x4c5   : > { %v875_v23 = vpop.permute.xlu0 %874 }
 0x4cd   : > { %v867_v24 = vpop.permute.xlu0 %866 }
 0x4ce   : > { %v888_v25 = vsel %vm468_vm1, %v1547_v59, %v867_v24 }
 0x4cf   : > { %v891_v28 = vsel %vm890_vm7, %v888_v25, %v875_v23 }
 0x4ec   : > { %v883_v27 = vpop.permute.xlu2 %882 }
 0x4ed   : > { %v894_v26 = vsel %vm893_vm8, %v891_v28, %v883_v27 }
 0x4ee   : > { %1151 = vmatmul.msk.f32.vlgmr.msra.gmra.mxu1 %vm398_vm0, %v894_v26 }
 0x4f2   : > { %v869_v29 = vpop.permute.xlu0 %868 }
 0x4f3   : > { %v889_v30 = vsel %vm468_vm1, %v1549_v60, %v869_v29  ;;  %v1377_v60 = vmov 32.0  }
 0x4f4   : > { %v877_v31 = vpop.permute.xlu2 %876  ;;  %1249 = vrcp.f32 %v1377_v60 }
 0x4f5   : > { %v892_v32 = vsel %vm890_vm7, %v889_v30, %v877_v31 }
 0x4fa   : > { %v1250_v40 = vpop.eup %1249 }
 0x4fb   : > { %v937_v41 = vmul.f32 32.0, %v1250_v40  ;;  %vm941_vm10 = vweird.f32 %v1250_v40 }
 0x4fd   : > { %v938_v42 = vsub.f32 1.0, %v937_v41 }
 0x4ff   : > { %v939_v43 = vmul.f32 %v1250_v40, %v938_v42 }
 0x501   : > { %v940_v44 = vadd.f32 %v1250_v40, %v939_v43 }
 0x503   : > { %v942_v45 = vsel %vm941_vm10, %v1250_v40, %v940_v44 }
 0x535   : > { %v885_v33 = vpop.permute.xlu1 %884 }
 0x536   : > { %v895_v34 = vsel %vm893_vm8, %v892_v32, %v885_v33 }
 0x537   : > { %1152 = vmatmul.msk.f32.gmra.mxu1 %vm398_vm0, %v895_v34 }
 0x56b   : > { %v923_v35 = vpop.f32.mrf.mxu1 }
 0x56c   : > { %v924_v59 = vadd.f32 %v923_v35, %v1476_v9 }
 0x56e   : > { %v929_v36 = vsel %vm398_vm0, %v924_v59, 0.0 }
 0x56f   : > { %930 = vadd.xlane.f32.xlu0 %v929_v36 }
 0x5b4   : > { %v926_v37 = vpop.f32.mrf.mxu1 }
 0x5b5   : > { %v927_v38 = vadd.f32 %v926_v37, %v1479_v10 }
 0x5b7   : > { %v933_v39 = vsel %vm932_vm9, %v927_v38, 0.0 }
 0x5b8   : > { %934 = vadd.xlane.f32.xlu2 %v933_v39 }
 0x5e2   : > { %v931_v9 = vpop.xlane.xlu0 %930 }
 0x5e3   : > { %v943_v46 = vmul.f32 %v942_v45, %v931_v9 }
 0x5e5   : > { %v945_v47 = vsub.f32 %v924_v59, %v943_v46 }
 0x5e7   : > { %v947_v12 = vmul.f32 %v945_v47, %v945_v47 }
 0x5e9   : > { %v949_v48 = vsel %vm398_vm0, %v947_v12, 0.0 }
 0x5ea   : > { %950 = vadd.xlane.f32.xlu1 %v949_v48 }
 0x62b   : > { %v935_v10 = vpop.xlane.xlu2 %934 }
 0x62c   : > { %v944_v49 = vmul.f32 %v942_v45, %v935_v10 }
 0x62e   : > { %v946_v50 = vsub.f32 %v927_v38, %v944_v49 }
 0x630   : > { %v948_v51 = vmul.f32 %v946_v50, %v946_v50 }
 0x632   : > { %v952_v52 = vsel %vm932_vm9, %v948_v51, 0.0 }
 0x633   : > { %953 = vadd.xlane.f32.xlu0 %v952_v52 }
 0x65d   : > { %v951_v53 = vpop.xlane.xlu1 %950 }
 0x65e   : > { %v955_v54 = vmul.f32 %v951_v53, %v942_v45 }
 0x660   : > { %v957_v13 = vadd.f32 1e-06, %v955_v54 }
 0x662   : > { %1251 = vrsqrt.f32 %v957_v13  ;;  %vm965_vm12 = vweird.f32 %v957_v13 }
 0x668   : > { %v1252_v55 = vpop.eup %1251 }
 0x669   : > { %v960_v56 = vmul.f32 %v1252_v55, %v957_v13  ;;  %vm966_vm11 = vweird.f32 %v1252_v55 }
 0x66a   : > { %vm967_vm13 = vmor %vm965_vm12, %vm966_vm11 }
 0x66b   : > { %v961_v57 = vmul.f32 %v1252_v55, %v960_v56 }
 0x66d   : > { %v962_v58 = vmul.f32 0.5, %v961_v57 }
 0x66f   : > { %v963_v61 = vsub.f32 1.5, %v962_v58 }
 0x671   : > { %v964_v62 = vmul.f32 %v1252_v55, %v963_v61 }
 0x673   : > { %v968_v0 = vsel %vm967_vm13, %v1252_v55, %v964_v62 }
 0x674   : > { %v979_v2 = vmul.f32 %v968_v0, %v945_v47 }
 0x676   : > { %v985_v3 = vmul.f32 %v1215_v63, %v979_v2 }
 0x678   : > { %v991_v4 = vadd.f32 %v1216_v1, %v985_v3 }
 0x67a   : > { %993 = vst.msk [vmem:[%s389_s11] sm:$0xff] %vm398_vm0, %v991_v4 }
 0x6a6   : > { %v954_v5 = vpop.xlane.xlu0 %953 }
 0x6a7   : > { %v956_v6 = vmul.f32 %v954_v5, %v942_v45 }
 0x6a9   : > { %v958_v7 = vadd.f32 1e-06, %v956_v6 }
 0x6ab   : > { %1253 = vrsqrt.f32 %v958_v7  ;;  %vm975_vm15 = vweird.f32 %v958_v7 }
 0x6b1   : > { %v1254_v8 = vpop.eup %1253 }
 0x6b2   : > { %v970_v11 = vmul.f32 %v1254_v8, %v958_v7  ;;  %vm976_vm14 = vweird.f32 %v1254_v8 }
 0x6b3   : > { %vm977_vm1 = vmor %vm975_vm15, %vm976_vm14 }
 0x6b4   : > { %v971_v14 = vmul.f32 %v1254_v8, %v970_v11 }
 0x6b6   : > { %v972_v15 = vmul.f32 0.5, %v971_v14 }
 0x6b8   : > { %v973_v16 = vsub.f32 1.5, %v972_v15 }
 0x6ba   : > { %v974_v17 = vmul.f32 %v1254_v8, %v973_v16 }
 0x6bc   : > { %v978_v18 = vsel %vm977_vm1, %v1254_v8, %v974_v17 }
 0x6bd   : > { %v980_v19 = vmul.f32 %v978_v18, %v946_v50 }
 0x6bf   : > { %v986_v20 = vmul.f32 %v1215_v63, %v980_v19 }
 0x6c1   : > { %v992_v21 = vadd.f32 %v1216_v1, %v986_v20 }
 0x6c3   : > { %994 = vst.msk [vmem:[%s389_s11 + $0x8] sm:$0x3] %vm932_vm9, %v992_v21 }
 0x6c4 PF: > { %s20_s27 = sadd.s32 1, %s1359_s27  }
 0x6c5   : > { %p17_p7 = scmp.ge.s32.totalorder %s20_s27, 4  }
 0x6c7   :  { %19 = sbr.rel (!%p17_p7) target bundleno = 2 (0x2), region = 101 }
 0x6cc   :  { %1016 = vsyncpa [#allocation3], 1 }
 0x6cd   :  { %1018 = vsyncpa [#allocation3 + $0x1], 1 }
 0x6ce   :  { %1019 = vsyncpa [#allocation5], 1 }

// kernel: transformer_forward.16
= control target key start
LH: loop header
LB: loop body
LE: loop exit
PB: predicated region body
PF: predicated region fallthrough
CT: control target
= control target key end

     0   :  { %13 = vsyncpa [#allocation3], 0  ;;  %s1548_s0 = inlined_call_operand.vmem [shape: f32[2,10,32], index: 0, kind: input, shape index: {}, may-alias: {0,1}]   ;;  %s1549_s1 = inlined_call_operand.vmem [shape: f32[2,10,32], index: 1, kind: input, shape index: {}, may-alias: {0,1}]   ;;  %s1550_s2 = inlined_call_operand.vmem [shape: s32[2,1,10], index: 2, kind: input, shape index: {}]   ;;  %s1551_s3 = inlined_call_operand.vmem [shape: f32[32,32], index: 3, kind: input, shape index: {}]   ;;  %s1552_s4 = inlined_call_operand.hbm [shape: f32[32,64], index: 4, kind: input, shape index: {}]   ;;  %s1553_s5 = inlined_call_operand.hbm [shape: f32[32,32], index: 5, kind: input, shape index: {}]   ;;  %s1554_s6 = inlined_call_operand.vmem [shape: f32[1,32], index: 6, kind: input, shape index: {}]   ;;  %s1555_s7 = inlined_call_operand.vmem [shape: f32[1,32], index: 7, kind: input, shape index: {}]   ;;  %s1556_s8 = inlined_call_operand.vmem [shape: f32[2,10,32], index: 8, kind: output, shape index: {}]  }
   0x1   :  { %14 = vsyncpa [#allocation5], 0  ;;  %s1355_s27 = smov 0  }
   0x2 LB: > { %s248_s30 = sshll.u32 %s1552_s4, 4  ;;  %s1077_s9 = sadd.s32 4294967295, %s1292_s27   ;;  %s1292_s27 = sphi %s1355_s27, %s20_s27   ;;  %s249_s30 = int_to_ptr.hbm [resolvable:$true] %s248_s30 }
   0x3   : > { %p1079_p0 = scmp.ge.s32.totalorder %s1292_s27, 1  ;;  %p234_p1 = scmp.lt.s32.totalorder %s1292_s27, 3 }
   0x4   : > { %p1150_p2 = scmp.eq.s32.totalorder %s1077_s9, 0  ;;  %s1294_s11 = smov [#allocation2]  }
   0x5   : > { %p1366_p3 = pnand %p1079_p0, %p234_p1  ;;  %s250_s12 = sshll.u32 %s1294_s11, 4  ;;  %s251_s12 = int_to_ptr.vmem [resolvable:$true] %s250_s12 }
   0x6   : > { %s262_s15 = sshll.u32 %s1553_s5, 4  ;;  %s1295_s16 = smov [#allocation4]   ;;  %s263_s15 = int_to_ptr.hbm [resolvable:$true] %s262_s15 }
   0x7   : > { %p1143_p4 = pneg %p1366_p3  ;;  %s264_s17 = sshll.u32 %s1295_s16, 4  ;;  %s265_s17 = int_to_ptr.vmem [resolvable:$true] %s264_s17 }
   0x8   : > { %s1296_s18 = smov 128   ;;  %s1297_s19 = smov 8  }
   0x9   : > { %p1144_p5 = pnand %p1150_p2, %p1143_p4  ;;  %308 = sbr.rel (%p1366_p3) target bundleno = 1731 (0x6c3), region = 52 }
   0xb   : > { %1146 = dma.hbm_to_vmem [thread:$0]  (!%p1144_p5), %s249_s30, 512, %s251_s12, [#allocation3], %s1296_s18, %s1296_s18, %s1297_s19  }
   0xc   : > { %1149 = dma.hbm_to_vmem [thread:$0]  (!%p1144_p5), %s263_s15, 512, %s265_s17, [#allocation5], %s1296_s18, %s1296_s18, %s1297_s19  }
   0xe   : > { %1283 = dma.done.wait (%p1150_p2), [#allocation3], 512  }
   0xf   : > { %1285 = vsyncadd (%p1150_p2), [#allocation3], 4294966784 }
  0x10   : > { %1287 = dma.done.wait (%p1150_p2), [#allocation5], 512  }
  0x11   : > { %1289 = vsyncadd (%p1150_p2), [#allocation5], 4294966784  ;;  %p356_p6 = scmp.lt.s32.totalorder %s1077_s9, 1  ;;  %v417_v0 = vld [vmem:[#allocation2 + $0x18] sm:$0xff]  ;;  %v416_v1 = vld [vmem:[#allocation2 + $0x10] sm:$0xff]  ;;  %vm382_vm0 = vcmask 261120  }
  0x12   : > { %436 = vmatpush.msra.mxu1 %v417_v0  ;;  %v415_v2 = vld [vmem:[#allocation2 + $0x8] sm:$0xff]  ;;  %v381_v3 = vld [vmem:[%s1551_s3 + $0x18] sm:$0xff]  ;;  %v380_v4 = vld [vmem:[%s1551_s3 + $0x10] sm:$0xff]  ;;  %s1298_s15 = smov 96   ;;  %vm452_vm1 = vcmask 64512   ;;  %s1299_s16 = smov 120  }
  0x13   : > { %s1561_s9 = smov (!%p356_p6, %s1077_s9), 1  ;;  %401 = vmatpush.msra.mxu0 %v381_v3  ;;  %v414_v5 = vld [vmem:[#allocation2] sm:$0xff]  ;;  %1131 = vmatpush.msra.mxu2 %v381_v3  ;;  %v379_v6 = vld [vmem:[%s1551_s3 + $0x8] sm:$0xff]  ;;  %s1300_s17 = smov 112   ;;  %vm525_vm2 = vcmask 1041408   ;;  %v1302_v23 = vmov 0  }
  0x14   : > { %s1385_s20 = sshll.u32 %s1561_s9, 4  ;;  %437 = vmatpush.msra.mxu1 %v416_v1  ;;  %v378_v8 = vld [vmem:[%s1551_s3] sm:$0xff]  ;;  %s1301_s18 = smov 104   ;;  %vm490_vm5 = vcmask 80896   ;;  %vm494_vm6 = vcmask 74752   ;;  %vm874_vm7 = vcmask 130048  }
  0x15   : > { %s365_s23 = scalar_lea.vmem %s1549_s1, %s1385_s20  ;;  %s360_s12 = scalar_lea.vmem %s1548_s0, %s1385_s20  ;;  %402 = vmatpush.msra.mxu0 %v380_v4  ;;  %1132 = vmatpush.msra.mxu2 %v380_v4  ;;  %vm877_vm8 = vcmask 195584   ;;  %vm916_vm9 = vcmask 254976  }
  0x16   : > { %438 = vmatpush.msra.mxu1 %v415_v2  ;;  %v376_v7 = vld [vmem:[%s365_s23] sm:$0xff]  ;;  %v1410_v10 = vld [vmem:[%s360_s12 + $0x8] sm:$0x3]  ;;  %s368_s22 = scalar_lea.vmem %s1550_s2, %s1561_s9  ;;  %s1303_s9 = smov 88  }
  0x17   : > { %403 = vmatpush.msra.mxu0 %v379_v6  ;;  %v1407_v9 = vld [vmem:[%s360_s12] sm:$0xff]  ;;  %1133 = vmatpush.msra.mxu2 %v379_v6  ;;  %v377_v11 = vld [vmem:[%s365_s23 + $0x8] sm:$0x3]  ;;  %s1304_s23 = smov 80   ;;  %s1305_s24 = smov 72  }
  0x18   : > { %439 = vmatpush.msra.mxu1 %v414_v5  ;;  %v447_v22 = vld [vmem:[%s368_s22] sm:$0x1]  ;;  %s1306_s25 = smov 16   ;;  %s1307_s26 = smov 8  }
  0x19   : > { %1094 = vmatmul.msk.f32.vlgmr.msra.gmra.mxu1 %vm382_vm0, %v376_v7  ;;  %404 = vmatpush.msra.mxu0 %v378_v8  ;;  %vm448_vm3 = vcmp.ne.s32.totalorder %v447_v22, 0  ;;  %s1308_s28 = smov 24   ;;  %s373_s14 = scalar_lea.vmem %s1556_s8, %s1385_s20 }
  0x1a   : > { %1092 = vmatmul.msk.f32.vlgmr.msra.gmra.mxu0 %vm382_vm0, %v1407_v9  ;;  %1134 = vmatpush.msra.mxu2 %v378_v8  ;;  %v449_v24 = vsel %vm448_vm3, 1, %v1302_v23 }
  0x1b   : > { %1093 = vmatmul.msk.f32.vlgmr.msra.gmra.mxu2 %vm382_vm0, %v1410_v10  ;;  %v450_v25 = vperm.slane %v449_v24, 0 }
  0x1d   : > { %vm1444_vm4 = vcmp.eq.s32.totalorder %v450_v25, 1 }
  0x21   : > { %1095 = vmatmul.msk.f32.gmra.mxu1 %vm382_vm0, %v377_v11 }
  0x96   : > { %v1417_v12 = vpop.f32.mrf.mxu1 }
  0x97   : > { %514 = vrot.lane.b32.xlu2 %v1417_v12, %s1298_s15  ;;  %v406_v14 = vpop.f32.mrf.mxu0 }
  0x98   : > { %v412_v15 = vmul.f32 0.35355338, %v406_v14 }
  0x9e   : > { %v1420_v13 = vpop.f32.mrf.mxu1  ;;  %v409_v16 = vpop.f32.mrf.mxu2 }
  0x9f   : > { %555 = vrot.lane.b32.xlu2 %v1417_v12, %s1299_s16  ;;  %516 = vrot.lane.b32.xlu1 %v1420_v13, %s1298_s15  ;;  %v413_v17 = vmul.f32 0.35355338, %v409_v16 }
  0xa0   : > { %1096 = vmatpush.xpose.msk.msrb.mxu2 %vm452_vm1, %v1420_v13 }
  0xa4   : > { %1097 = vmatpush.xpose.msk.msrb.mxu2 %vm452_vm1, %v1417_v12 }
  0xa7   : > { %1098 = vmatmul.msk.f32.vlgmr.msrb.gmra.mxu2 %vm452_vm1, %v412_v15  ;;  %656 = vrot.lane.b32.xlu2 %v1420_v13, %s1300_s17 }
  0xa8   : > { %551 = vrot.lane.b32.xlu1 %v412_v15, %s1299_s16 }
  0xaf   : > { %1099 = vmatmul.msk.f32.gmra.mxu2 %vm452_vm1, %v413_v17  ;;  %753 = vrot.lane.b32.xlu2 %v1417_v12, %s1301_s18 }
  0xb0   : > { %755 = vrot.lane.b32.xlu1 %v1420_v13, %s1301_s18 }
  0xf1   : > { %v515_v18 = vpop.permute.xlu2 %514 }
  0xf9   : > { %v556_v19 = vpop.permute.xlu2 %555 }
 0x101   : > { %v657_v20 = vpop.permute.xlu2 %656 }
 0x102   : > { %1110 = vmatpush.xpose.msk.msrb.mxu1 %vm452_vm1, %v657_v20 }
 0x109   : > { %v754_v48 = vpop.permute.xlu2 %753 }
 0x111   : > { %v517_v21 = vpop.permute.xlu1 %516 }
 0x112   : > { %1100 = vmatpush.msk.msra.mxu3 %vm525_vm2, %v517_v21 }
 0x114   : > { %543 = vmatpush.msra.mxu3 %v515_v18 }
 0x11a   : > { %v552_v46 = vpop.permute.xlu1 %551 }
 0x122   : > { %v756_v47 = vpop.permute.xlu1 %755 }
 0x12a   : > { %v482_v27 = vpop.f32.mrf.mxu2 }
 0x12b   : > { %v488_v28 = vsel %vm1444_vm4, %v482_v27, -1e+09 }
 0x12c   : > { %v491_v29 = vsel %vm490_vm5, %v488_v28, -inf }
 0x12d   : > { %492 = vmax.xlane.f32.xlu0 %v491_v29 }
 0x132   : > { %v485_v30 = vpop.f32.mrf.mxu2 }
 0x133   : > { %v489_v31 = vsel %vm1444_vm4, %v485_v30, -1e+09 }
 0x134   : > { %v495_v32 = vsel %vm494_vm6, %v489_v31, -inf }
 0x135   : > { %496 = vmax.xlane.f32.xlu0 %v495_v32 }
 0x149   : > { %557 = vrot.lane.b32.xlu0 %v1420_v13, %s1299_s16 }
 0x151   : > { %553 = vrot.lane.b32.xlu0 %v413_v17, %s1299_s16 }
 0x159   : > { %654 = vrot.lane.b32.xlu0 %v1417_v12, %s1300_s17 }
 0x161   : > { %749 = vrot.lane.b32.xlu0 %v412_v15, %s1301_s18 }
 0x1a0   : > { %v493_v33 = vpop.xlane.xlu0 %492 }
 0x1a1   : > { %v498_v34 = vsub.f32 %v488_v28, %v493_v33 }
 0x1a3   : > { %v500_v35 = vmul.f32 1.442695, %v498_v34 }
 0x1a5   : > { %1180 = vpow2.f32 %v500_v35 }
 0x1a8   : > { %v497_v36 = vpop.xlane.xlu0 %496 }
 0x1a9   : > { %v499_v37 = vsub.f32 %v489_v31, %v497_v36 }
 0x1ab   : > { %v1181_v38 = vpop.eup %1180  ;;  %v502_v39 = vmul.f32 1.442695, %v499_v37 }
 0x1ac   : > { %v504_v40 = vsel %vm490_vm5, %v1181_v38, 0.0 }
 0x1ad   : > { %1182 = vpow2.f32 %v502_v39  ;;  %505 = vadd.xlane.f32.xlu1 %v504_v40 }
 0x1b3   : > { %v1183_v41 = vpop.eup %1182 }
 0x1b4   : > { %v507_v42 = vsel %vm494_vm6, %v1183_v41, 0.0 }
 0x1b5   : > { %508 = vadd.xlane.f32.xlu2 %v507_v42 }
 0x1bb   : > { %v558_v43 = vpop.permute.xlu0 %557 }
 0x1bc   : > { %1103 = vmatpush.xpose.msk.msrb.mxu3 %vm452_vm1, %v558_v43 }
 0x1c0   : > { %1104 = vmatpush.xpose.msk.msrb.mxu3 %vm452_vm1, %v556_v19 }
 0x1c3   : > { %v554_v44 = vpop.permute.xlu0 %553 }
 0x1c6   : > { %650 = vrot.lane.b32.xlu1 %v412_v15, %s1300_s17 }
 0x1cb   : > { %v655_v45 = vpop.permute.xlu0 %654 }
 0x1cc   : > { %1111 = vmatpush.xpose.msk.msrb.mxu1 %vm452_vm1, %v655_v45 }
 0x1cd   : > { %652 = vrot.lane.b32.xlu2 %v413_v17, %s1300_s17 }
 0x1ce   : > { %751 = vrot.lane.b32.xlu1 %v413_v17, %s1301_s18 }
 0x1d3   : > { %v750_v57 = vpop.permute.xlu0 %749 }
 0x220   : > { %v506_v49 = vpop.xlane.xlu1 %505 }
 0x221   : > { %1184 = vrcp.f32 %v506_v49 }
 0x227   : > { %v1185_v50 = vpop.eup %1184 }
 0x228   : > { %v509_v51 = vpop.xlane.xlu2 %508  ;;  %v512_v52 = vmul.f32 %v1185_v50, %v1181_v38 }
 0x229   : > { %1186 = vrcp.f32 %v509_v51 }
 0x22a   : > { %1101 = vmatmul.msk.f32.vlgmr.msra.gmra.mxu3 %vm490_vm5, %v512_v52 }
 0x22b   : > { %1117 = vmatpush.xpose.msk.msra.mxu3 %vm452_vm1, %v756_v47 }
 0x22f   : > { %v1187_v53 = vpop.eup %1186  ;;  %1118 = vmatpush.xpose.msk.msra.mxu3 %vm452_vm1, %v754_v48 }
 0x230   : > { %v513_v54 = vmul.f32 %v1187_v53, %v1183_v41  ;;  %v653_v56 = vpop.permute.xlu2 %652 }
 0x232   : > { %1102 = vmatmul.msk.f32.gmra.mxu3 %vm490_vm5, %v513_v54 }
 0x238   : > { %v651_v55 = vpop.permute.xlu1 %650 }
 0x239   : > { %1112 = vmatmul.msk.f32.vlgmr.msrb.gmra.mxu1 %vm452_vm1, %v651_v55 }
 0x23a   : > { %1105 = vmatmul.msk.f32.vlgmr.msrb.gmra.mxu3 %vm452_vm1, %v552_v46 }
 0x240   : > { %v752_v58 = vpop.permute.xlu1 %751 }
 0x241   : > { %1113 = vmatmul.msk.f32.gmra.mxu1 %vm452_vm1, %v653_v56 }
 0x242   : > { %1106 = vmatmul.msk.f32.gmra.mxu3 %vm452_vm1, %v554_v44 }
 0x24a   : > { %1119 = vmatmul.msk.f32.vlgmr.msra.gmra.mxu3 %vm452_vm1, %v750_v57 }
 0x252   : > { %1120 = vmatmul.msk.f32.gmra.mxu3 %vm452_vm1, %v752_v58 }
 0x2ad   : > { %v1478_v59 = vpop.f32.mrf.mxu3 }
 0x2b5   : > { %v1480_v60 = vpop.f32.mrf.mxu3 }
 0x2b6   : > { %v683_v61 = vpop.f32.mrf.mxu1 }
 0x2b7   : > { %v689_v62 = vsel %vm1444_vm4, %v683_v61, -1e+09 }
 0x2b8   : > { %v691_v63 = vsel %vm490_vm5, %v689_v62, -inf }
 0x2b9   : > { %692 = vmax.xlane.f32.xlu1 %v691_v63 }
 0x2bd   : > { %v584_v0 = vpop.f32.mrf.mxu3 }
 0x2be   : > { %v590_v1 = vsel %vm1444_vm4, %v584_v0, -1e+09  ;;  %v686_v2 = vpop.f32.mrf.mxu1 }
 0x2bf   : > { %v690_v3 = vsel %vm1444_vm4, %v686_v2, -1e+09  ;;  %v592_v4 = vsel %vm490_vm5, %v590_v1, -inf }
 0x2c0   : > { %593 = vmax.xlane.f32.xlu0 %v592_v4  ;;  %v694_v5 = vsel %vm494_vm6, %v690_v3, -inf }
 0x2c1   : > { %695 = vmax.xlane.f32.xlu2 %v694_v5 }
 0x2c5   : > { %v587_v6 = vpop.f32.mrf.mxu3 }
 0x2c6   : > { %v591_v7 = vsel %vm1444_vm4, %v587_v6, -1e+09 }
 0x2c7   : > { %v595_v8 = vsel %vm494_vm6, %v591_v7, -inf }
 0x2c9   : > { %596 = vmax.xlane.f32.xlu2 %v595_v8 }
 0x2cd   : > { %v782_v11 = vpop.f32.mrf.mxu3 }
 0x2ce   : > { %v788_v14 = vsel %vm1444_vm4, %v782_v11, -1e+09 }
 0x2cf   : > { %v790_v15 = vsel %vm490_vm5, %v788_v14, -inf }
 0x2d0   : > { %791 = vmax.xlane.f32.xlu0 %v790_v15 }
 0x2d5   : > { %v785_v16 = vpop.f32.mrf.mxu3 }
 0x2d6   : > { %v789_v17 = vsel %vm1444_vm4, %v785_v16, -1e+09 }
 0x2d7   : > { %v793_v18 = vsel %vm494_vm6, %v789_v17, -inf }
 0x2d8   : > { %794 = vmax.xlane.f32.xlu1 %v793_v18  ;;  %v883_v18 = vld [vmem:[#allocation4 + $0x18] sm:$0xff] }
 0x2d9   : > { %902 = vmatpush.msra.mxu1 %v883_v18 }
 0x2e1   : > { %616 = vrot.lane.b32.xlu2 %v1420_v13, %s1303_s9 }
 0x32c   : > { %v693_v19 = vpop.xlane.xlu1 %692 }
 0x32d   : > { %v697_v20 = vsub.f32 %v689_v62, %v693_v19  ;;  %v882_v19 = vld [vmem:[#allocation4 + $0x10] sm:$0xff] }
 0x32e   : > { %903 = vmatpush.msra.mxu1 %v882_v19 }
 0x32f   : > { %v699_v21 = vmul.f32 1.442695, %v697_v20  ;;  %v881_v20 = vld [vmem:[#allocation4 + $0x8] sm:$0xff] }
 0x330   : > { %904 = vmatpush.msra.mxu1 %v881_v20 }
 0x331   : > { %1188 = vpow2.f32 %v699_v21 }
 0x333   : > { %v594_v22 = vpop.xlane.xlu0 %593 }
 0x334   : > { %v598_v23 = vsub.f32 %v590_v1, %v594_v22  ;;  %v696_v24 = vpop.xlane.xlu2 %695  ;;  %v880_v22 = vld [vmem:[#allocation4] sm:$0xff] }
 0x335   : > { %v698_v37 = vsub.f32 %v690_v3, %v696_v24  ;;  %905 = vmatpush.msra.mxu1 %v880_v22 }
 0x336   : > { %v600_v25 = vmul.f32 1.442695, %v598_v23 }
 0x337   : > { %v1189_v27 = vpop.eup %1188  ;;  %v701_v38 = vmul.f32 1.442695, %v698_v37 }
 0x338   : > { %1190 = vpow2.f32 %v600_v25  ;;  %v703_v28 = vsel %vm490_vm5, %v1189_v27, 0.0 }
 0x339   : > { %704 = vadd.xlane.f32.xlu1 %v703_v28 }
 0x33c   : > { %v597_v26 = vpop.xlane.xlu2 %596 }
 0x33d   : > { %v599_v39 = vsub.f32 %v591_v7, %v597_v26 }
 0x33e   : > { %v1191_v29 = vpop.eup %1190 }
 0x33f   : > { %v604_v30 = vsel %vm490_vm5, %v1191_v29, 0.0  ;;  %v602_v40 = vmul.f32 1.442695, %v599_v39 }
 0x340   : > { %605 = vadd.xlane.f32.xlu0 %v604_v30 }
 0x343   : > { %v792_v31 = vpop.xlane.xlu0 %791 }
 0x344   : > { %v796_v32 = vsub.f32 %v788_v14, %v792_v31  ;;  %v617_v33 = vpop.permute.xlu2 %616 }
 0x345   : > { %1107 = vmatpush.msk.msrb.mxu0 %vm525_vm2, %v617_v33 }
 0x346   : > { %v798_v34 = vmul.f32 1.442695, %v796_v32 }
 0x348   : > { %1192 = vpow2.f32 %v798_v34 }
 0x349   : > { %1194 = vpow2.f32 %v701_v38 }
 0x34a   : > { %1196 = vpow2.f32 %v602_v40 }
 0x34b   : > { %v795_v45 = vpop.xlane.xlu1 %794 }
 0x34c   : > { %v797_v46 = vsub.f32 %v789_v17, %v795_v45 }
 0x34e   : > { %v1193_v35 = vpop.eup %1192  ;;  %v800_v47 = vmul.f32 1.442695, %v797_v46 }
 0x34f   : > { %v802_v36 = vsel %vm490_vm5, %v1193_v35, 0.0  ;;  %v1195_v41 = vpop.eup %1194 }
 0x350   : > { %803 = vadd.xlane.f32.xlu2 %v802_v36  ;;  %v706_v42 = vsel %vm494_vm6, %v1195_v41, 0.0  ;;  %v1197_v43 = vpop.eup %1196  ;;  %1198 = vpow2.f32 %v800_v47 }
 0x351   : > { %v607_v44 = vsel %vm494_vm6, %v1197_v43, 0.0 }
 0x352   : > { %715 = vrot.lane.b32.xlu1 %v1420_v13, %s1304_s23 }
 0x354   : > { %614 = vrot.lane.b32.xlu0 %v1417_v12, %s1303_s9 }
 0x356   : > { %v1199_v49 = vpop.eup %1198 }
 0x357   : > { %v805_v53 = vsel %vm494_vm6, %v1199_v49, 0.0 }
 0x35a   : > { %713 = vrot.lane.b32.xlu1 %v1417_v12, %s1304_s23 }
 0x368   : > { %812 = vrot.lane.b32.xlu2 %v1417_v12, %s1305_s24 }
 0x37e   : > { %707 = vadd.xlane.f32.xlu0 %v706_v42 }
 0x384   : > { %608 = vadd.xlane.f32.xlu1 %v607_v44 }
 0x39d   : > { %814 = vrot.lane.b32.xlu1 %v1420_v13, %s1305_s24 }
 0x3ac   : > { %v705_v48 = vpop.xlane.xlu1 %704 }
 0x3b3   : > { %v606_v12 = vpop.xlane.xlu0 %605 }
 0x3b4   : > { %1200 = vrcp.f32 %v606_v12 }
 0x3b5   : > { %1202 = vrcp.f32 %v705_v48 }
 0x3ba   : > { %v1201_v50 = vpop.eup %1200 }
 0x3bb   : > { %v612_v54 = vmul.f32 %v1201_v50, %v1191_v29  ;;  %v1203_v13 = vpop.eup %1202 }
 0x3bc   : > { %v711_v55 = vmul.f32 %v1203_v13, %v1189_v27 }
 0x3c3   : > { %v804_v1 = vpop.xlane.xlu2 %803 }
 0x3c4   : > { %v716_v51 = vpop.permute.xlu1 %715 }
 0x3c5   : > { %1114 = vmatpush.msk.msra.mxu2 %vm525_vm2, %v716_v51 }
 0x3c6   : > { %v615_v52 = vpop.permute.xlu0 %614 }
 0x3c7   : > { %806 = vadd.xlane.f32.xlu1 %v805_v53  ;;  %642 = vmatpush.msrb.mxu0 %v615_v52 }
 0x3c8   : > { %1108 = vmatmul.msk.f32.vlgmr.msrb.gmra.mxu0 %vm490_vm5, %v612_v54 }
 0x3cb   : > { %v813_v5 = vpop.permute.xlu2 %812 }
 0x3cc   : > { %v714_v56 = vpop.permute.xlu1 %713 }
 0x3cd   : > { %741 = vmatpush.msra.mxu2 %v714_v56 }
 0x3ce   : > { %1115 = vmatmul.msk.f32.vlgmr.msra.gmra.mxu2 %vm490_vm5, %v711_v55 }
 0x3f1   : > { %v708_v57 = vpop.xlane.xlu0 %707 }
 0x3f2   : > { %1204 = vrcp.f32 %v708_v57 }
 0x3f7   : > { %v609_v58 = vpop.xlane.xlu1 %608 }
 0x3f8   : > { %v1205_v61 = vpop.eup %1204  ;;  %1206 = vrcp.f32 %v609_v58 }
 0x3f9   : > { %v712_v62 = vmul.f32 %v1205_v61, %v1195_v41  ;;  %1208 = vrcp.f32 %v804_v1  ;;  %v1179_v1 = vld [vmem:[%s1555_s7] ss:$0 sm:$0xff] }
 0x3fb   : > { %1116 = vmatmul.msk.f32.gmra.mxu2 %vm490_vm5, %v712_v62 }
 0x3fe   : > { %v1207_v63 = vpop.eup %1206 }
 0x3ff   : > { %v613_v0 = vmul.f32 %v1207_v63, %v1197_v43  ;;  %v1209_v2 = vpop.eup %1208  ;;  %v1178_v63 = vld [vmem:[%s1554_s6] ss:$0 sm:$0xff] }
 0x400   : > { %v810_v4 = vmul.f32 %v1209_v2, %v1193_v35 }
 0x401   : > { %1109 = vmatmul.msk.f32.gmra.mxu0 %vm490_vm5, %v613_v0 }
 0x40f   : > { %v815_v3 = vpop.permute.xlu1 %814 }
 0x410   : > { %1121 = vmatpush.msk.msra.mxu0 %vm525_vm2, %v815_v3 }
 0x412   : > { %840 = vmatpush.msra.mxu0 %v813_v5 }
 0x413   : > { %1122 = vmatmul.msk.f32.vlgmr.msra.gmra.mxu0 %vm490_vm5, %v810_v4 }
 0x43a   : > { %v807_v6 = vpop.xlane.xlu1 %806 }
 0x43b   : > { %1210 = vrcp.f32 %v807_v6 }
 0x441   : > { %v1211_v7 = vpop.eup %1210 }
 0x442   : > { %v811_v8 = vmul.f32 %v1211_v7, %v1199_v49 }
 0x444   : > { %1123 = vmatmul.msk.f32.gmra.mxu0 %vm490_vm5, %v811_v8 }
 0x445   : > { %v644_v14 = vpop.f32.mrf.mxu0 }
 0x451   : > { %v743_v11 = vpop.f32.mrf.mxu2 }
 0x452   : > { %858 = vrot.lane.b32.xlu0 %v743_v11, %s1306_s25 }
 0x45a   : > { %850 = vrot.lane.b32.xlu0 %v644_v14, %s1307_s26 }
 0x47e   : > { %v647_v15 = vpop.f32.mrf.mxu0  ;;  %v746_v17 = vpop.f32.mrf.mxu2 }
 0x47f   : > { %852 = vrot.lane.b32.xlu0 %v647_v15, %s1307_s26 }
 0x490   : > { %v842_v16 = vpop.f32.mrf.mxu0 }
 0x491   : > { %866 = vrot.lane.b32.xlu2 %v842_v16, %s1308_s28 }
 0x499   : > { %860 = vrot.lane.b32.xlu2 %v746_v17, %s1306_s25 }
 0x4c1   : > { %v845_v21 = vpop.f32.mrf.mxu0 }
 0x4c2   : > { %868 = vrot.lane.b32.xlu1 %v845_v21, %s1308_s28 }
 0x4c4   : > { %v859_v23 = vpop.permute.xlu0 %858 }
 0x4cc   : > { %v851_v24 = vpop.permute.xlu0 %850 }
 0x4cd   : > { %v872_v25 = vsel %vm452_vm1, %v1478_v59, %v851_v24 }
 0x4ce   : > { %v875_v28 = vsel %vm874_vm7, %v872_v25, %v859_v23 }
 0x4eb   : > { %v867_v27 = vpop.permute.xlu2 %866 }
 0x4ec   : > { %v878_v26 = vsel %vm877_vm8, %v875_v28, %v867_v27 }
 0x4ed   : > { %1124 = vmatmul.msk.f32.vlgmr.msra.gmra.mxu1 %vm382_vm0, %v878_v26 }
 0x4f1   : > { %v853_v29 = vpop.permute.xlu0 %852 }
 0x4f2   : > { %v873_v30 = vsel %vm452_vm1, %v1480_v60, %v853_v29  ;;  %v1309_v60 = vmov 32.0  }
 0x4f3   : > { %v861_v31 = vpop.permute.xlu2 %860  ;;  %1212 = vrcp.f32 %v1309_v60 }
 0x4f4   : > { %v876_v32 = vsel %vm874_vm7, %v873_v30, %v861_v31 }
 0x4f9   : > { %v1213_v40 = vpop.eup %1212 }
 0x4fa   : > { %v921_v41 = vmul.f32 32.0, %v1213_v40  ;;  %vm925_vm10 = vweird.f32 %v1213_v40 }
 0x4fc   : > { %v922_v42 = vsub.f32 1.0, %v921_v41 }
 0x4fe   : > { %v923_v43 = vmul.f32 %v1213_v40, %v922_v42 }
 0x500   : > { %v924_v44 = vadd.f32 %v1213_v40, %v923_v43 }
 0x502   : > { %v926_v45 = vsel %vm925_vm10, %v1213_v40, %v924_v44 }
 0x534   : > { %v869_v33 = vpop.permute.xlu1 %868 }
 0x535   : > { %v879_v34 = vsel %vm877_vm8, %v876_v32, %v869_v33 }
 0x536   : > { %1125 = vmatmul.msk.f32.gmra.mxu1 %vm382_vm0, %v879_v34 }
 0x56a   : > { %v907_v35 = vpop.f32.mrf.mxu1 }
 0x56b   : > { %v908_v59 = vadd.f32 %v907_v35, %v1407_v9 }
 0x56d   : > { %v913_v36 = vsel %vm382_vm0, %v908_v59, 0.0 }
 0x56e   : > { %914 = vadd.xlane.f32.xlu0 %v913_v36 }
 0x5b3   : > { %v910_v37 = vpop.f32.mrf.mxu1 }
 0x5b4   : > { %v911_v38 = vadd.f32 %v910_v37, %v1410_v10 }
 0x5b6   : > { %v917_v39 = vsel %vm916_vm9, %v911_v38, 0.0 }
 0x5b7   : > { %918 = vadd.xlane.f32.xlu2 %v917_v39 }
 0x5e1   : > { %v915_v9 = vpop.xlane.xlu0 %914 }
 0x5e2   : > { %v927_v46 = vmul.f32 %v926_v45, %v915_v9 }
 0x5e4   : > { %v929_v47 = vsub.f32 %v908_v59, %v927_v46 }
 0x5e6   : > { %v931_v12 = vmul.f32 %v929_v47, %v929_v47 }
 0x5e8   : > { %v933_v48 = vsel %vm382_vm0, %v931_v12, 0.0 }
 0x5e9   : > { %934 = vadd.xlane.f32.xlu1 %v933_v48 }
 0x62a   : > { %v919_v10 = vpop.xlane.xlu2 %918 }
 0x62b   : > { %v928_v49 = vmul.f32 %v926_v45, %v919_v10 }
 0x62d   : > { %v930_v50 = vsub.f32 %v911_v38, %v928_v49 }
 0x62f   : > { %v932_v51 = vmul.f32 %v930_v50, %v930_v50 }
 0x631   : > { %v936_v52 = vsel %vm916_vm9, %v932_v51, 0.0 }
 0x632   : > { %937 = vadd.xlane.f32.xlu0 %v936_v52 }
 0x65c   : > { %v935_v53 = vpop.xlane.xlu1 %934 }
 0x65d   : > { %v939_v54 = vmul.f32 %v935_v53, %v926_v45 }
 0x65f   : > { %v941_v13 = vadd.f32 1e-06, %v939_v54 }
 0x661   : > { %1214 = vrsqrt.f32 %v941_v13  ;;  %vm949_vm12 = vweird.f32 %v941_v13 }
 0x667   : > { %v1215_v55 = vpop.eup %1214 }
 0x668   : > { %v944_v56 = vmul.f32 %v1215_v55, %v941_v13  ;;  %vm950_vm11 = vweird.f32 %v1215_v55 }
 0x669   : > { %vm951_vm13 = vmor %vm949_vm12, %vm950_vm11 }
 0x66a   : > { %v945_v57 = vmul.f32 %v1215_v55, %v944_v56 }
 0x66c   : > { %v946_v58 = vmul.f32 0.5, %v945_v57 }
 0x66e   : > { %v947_v61 = vsub.f32 1.5, %v946_v58 }
 0x670   : > { %v948_v62 = vmul.f32 %v1215_v55, %v947_v61 }
 0x672   : > { %v952_v0 = vsel %vm951_vm13, %v1215_v55, %v948_v62 }
 0x673   : > { %v963_v2 = vmul.f32 %v952_v0, %v929_v47 }
 0x675   : > { %v969_v3 = vmul.f32 %v1178_v63, %v963_v2 }
 0x677   : > { %v975_v4 = vadd.f32 %v1179_v1, %v969_v3 }
 0x679   : > { %977 = vst.msk [vmem:[%s373_s14] sm:$0xff] %vm382_vm0, %v975_v4 }
 0x6a5   : > { %v938_v5 = vpop.xlane.xlu0 %937 }
 0x6a6   : > { %v940_v6 = vmul.f32 %v938_v5, %v926_v45 }
 0x6a8   : > { %v942_v7 = vadd.f32 1e-06, %v940_v6 }
 0x6aa   : > { %1216 = vrsqrt.f32 %v942_v7  ;;  %vm959_vm15 = vweird.f32 %v942_v7 }
 0x6b0   : > { %v1217_v8 = vpop.eup %1216 }
 0x6b1   : > { %v954_v11 = vmul.f32 %v1217_v8, %v942_v7  ;;  %vm960_vm14 = vweird.f32 %v1217_v8 }
 0x6b2   : > { %vm961_vm1 = vmor %vm959_vm15, %vm960_vm14 }
 0x6b3   : > { %v955_v14 = vmul.f32 %v1217_v8, %v954_v11 }
 0x6b5   : > { %v956_v15 = vmul.f32 0.5, %v955_v14 }
 0x6b7   : > { %v957_v16 = vsub.f32 1.5, %v956_v15 }
 0x6b9   : > { %v958_v17 = vmul.f32 %v1217_v8, %v957_v16 }
 0x6bb   : > { %v962_v18 = vsel %vm961_vm1, %v1217_v8, %v958_v17 }
 0x6bc   : > { %v964_v19 = vmul.f32 %v962_v18, %v930_v50 }
 0x6be   : > { %v970_v20 = vmul.f32 %v1178_v63, %v964_v19 }
 0x6c0   : > { %v976_v21 = vadd.f32 %v1179_v1, %v970_v20 }
 0x6c2   : > { %978 = vst.msk [vmem:[%s373_s14 + $0x8] sm:$0x3] %vm916_vm9, %v976_v21 }
 0x6c3 PF: > { %s20_s27 = sadd.s32 1, %s1292_s27  }
 0x6c4   : > { %p17_p7 = scmp.ge.s32.totalorder %s20_s27, 4  }
 0x6c6   :  { %19 = sbr.rel (!%p17_p7) target bundleno = 2 (0x2), region = 97 }
 0x6cb   :  { %1000 = vsyncpa [#allocation3], 1 }
 0x6cc   :  { %1002 = vsyncpa [#allocation3 + $0x1], 1 }
 0x6cd   :  { %1003 = vsyncpa [#allocation5], 1 }

// kernel: transformer_forward.18
= control target key start
LH: loop header
LB: loop body
LE: loop exit
PB: predicated region body
PF: predicated region fallthrough
CT: control target
= control target key end

     0   :  { %s468_s21 = smov [#allocation3]   ;;  %s542_s0 = inlined_call_operand.vmem [shape: s32[2,8], index: 0, kind: input, shape index: {}]   ;;  %s543_s1 = inlined_call_operand.hbm [shape: f32[32,32], index: 1, kind: input, shape index: {}]   ;;  %s544_s2 = inlined_call_operand.vmem [shape: f32[8,32], index: 2, kind: input, shape index: {}]   ;;  %s545_s3 = inlined_call_operand.vmem [shape: f32[1,32], index: 3, kind: input, shape index: {}]   ;;  %s546_s4 = inlined_call_operand.vmem [shape: f32[1,32], index: 4, kind: input, shape index: {}]   ;;  %s547_s5 = inlined_call_operand.vmem [shape: f32[2,8,32], index: 5, kind: output, shape index: {}]  }
   0x1   :  { %s11_s20 = sshll.u32 %s542_s0, 4  ;;  %s12_s20 = int_to_ptr.vmem [resolvable:$true] %s11_s20 }
   0x2   :  { %14 = dma.vmem_to_smem %s12_s20, 32, %s468_s21, [#allocation2] }
   0x3   :  { %458 = dma.done.wait [#allocation2], 32 }
   0x4   :  { %459 = vsyncadd [#allocation2], 4294967264 }
   0x5   :  { %17 = sfence }
   0x6   :  { %18 = vsyncpa [#allocation5], 0  ;;  %s506_s22 = smov 0  }
   0x7 LB: > { %s150_s0 = sshll.u32 %s543_s1, 4  ;;  %s515_s25 = sadd.s32 4294967295, %s466_s22   ;;  %s466_s22 = sphi %s506_s22, %s24_s22   ;;  %s151_s0 = int_to_ptr.hbm [resolvable:$true] %s150_s0 }
   0x8   : > { %p375_p0 = scmp.ge.s32.totalorder %s466_s22, 1  ;;  %p139_p1 = scmp.lt.s32.totalorder %s466_s22, 3 }
   0x9   : > { %p391_p2 = scmp.eq.s32.totalorder %s515_s25, 0  ;;  %s469_s26 = smov [#allocation4]  }
   0xa   : > { %p140_p3 = pnand %p375_p0, %p139_p1  ;;  %s152_s27 = sshll.u32 %s469_s26, 4  ;;  %s153_s27 = int_to_ptr.vmem [resolvable:$true] %s152_s27 }
   0xb   : > { %s470_s28 = smov 128   ;;  %s471_s29 = smov 8  }
   0xc   : > { %p387_p4 = pneg %p140_p3  ;;  %177 = sbr.rel (%p140_p3) target bundleno = 309 (0x135), region = 36 }
   0xe   : > { %p388_p5 = pnand %p391_p2, %p387_p4 }
  0x10   : > { %390 = dma.hbm_to_vmem [thread:$0]  (!%p388_p5), %s151_s0, 512, %s153_s27, [#allocation5], %s470_s28, %s470_s28, %s471_s29  }
  0x11   : > { %461 = dma.done.wait (%p391_p2), [#allocation5], 512  }
  0x12   : > { %463 = vsyncadd (%p391_p2), [#allocation5], 4294966784  ;;  %s380_s30 = sshll.u32 %s515_s25, 7  ;;  %vm255_vm0 = vcmask 1040384   ;;  %vm257_vm1 = vcmask 1041408   ;;  %vm259_vm2 = vcmask 1042432  }
  0x13   : > { %s203_s6 = sld [smem:[#allocation3 + %s380_s30]]  ;;  %s206_s7 = sadd.s32 1, %s380_s30  ;;  %vm261_vm3 = vcmask 1043456   ;;  %vm263_vm4 = vcmask 1044480   ;;  %vm265_vm5 = vcmask 1045504   ;;  %vm267_vm6 = vcmask 1046528  }
  0x14   : > { %s207_s8 = sld [smem:[#allocation3 + %s206_s7]]  ;;  %s210_s9 = sadd.s32 2, %s380_s30  ;;  %v269_v21 = vld [vmem:[%s544_s2] sm:$0xff]  ;;  %vm271_vm7 = vcmask 261120   ;;  %v472_v25 = vmov 32.0  }
  0x15   : > { %s211_s10 = sld [smem:[#allocation3 + %s210_s9]]  ;;  %s214_s11 = sadd.s32 3, %s380_s30  ;;  %408 = vrcp.f32 %v472_v25  ;;  %v406_v46 = vld [vmem:[%s545_s3] ss:$0 sm:$0xff] }
  0x16   : > { %s215_s12 = sld [smem:[#allocation3 + %s214_s11]]  ;;  %s218_s13 = sadd.s32 4, %s380_s30  ;;  %v407_v48 = vld [vmem:[%s546_s4] ss:$0 sm:$0xff] }
  0x17   : > { %s219_s14 = sld [smem:[#allocation3 + %s218_s13]]  ;;  %s222_s15 = sadd.s32 5, %s380_s30 }
  0x18   : > { %s223_s16 = sld [smem:[#allocation3 + %s222_s15]]  ;;  %s226_s17 = sadd.s32 6, %s380_s30 }
  0x19   : > { %s227_s18 = sld [smem:[#allocation3 + %s226_s17]]  ;;  %s230_s19 = sadd.s32 7, %s380_s30 }
  0x1a   : > { %s204_s20 = scalar_lea.vmem [#allocation4], %s203_s6  ;;  %s208_s21 = scalar_lea.vmem [#allocation4], %s207_s8 }
  0x1b   : > { %v205_v0 = vld [vmem:[%s204_s20] sm:$0x1]  ;;  %s231_s23 = sld [smem:[#allocation3 + %s230_s19]]  ;;  %s212_s24 = scalar_lea.vmem [#allocation4], %s211_s10  ;;  %v409_v26 = vpop.eup %408 }
  0x1c   : > { %v209_v1 = vld [vmem:[%s208_s21] sm:$0x1]  ;;  %s216_s0 = scalar_lea.vmem [#allocation4], %s215_s12  ;;  %v276_v27 = vmul.f32 32.0, %v409_v26  ;;  %vm280_vm8 = vweird.f32 %v409_v26  ;;  %p198_p6 = scmp.lt.s32.totalorder %s515_s25, 1 }
  0x1d   : > { %v213_v2 = vld [vmem:[%s212_s24] sm:$0x1]  ;;  %v235_v3 = vrot.slane %v209_v1, 7  ;;  %s220_s26 = scalar_lea.vmem [#allocation4], %s219_s14 }
  0x1e   : > { %v217_v4 = vld [vmem:[%s216_s0] sm:$0x1]  ;;  %v238_v5 = vrot.slane %v213_v2, 6  ;;  %s224_s27 = scalar_lea.vmem [#allocation4], %s223_s16  ;;  %v277_v28 = vsub.f32 1.0, %v276_v27  ;;  %s549_s25 = smov (!%p198_p6, %s515_s25), 1 }
  0x1f   : > { %v221_v6 = vld [vmem:[%s220_s26] sm:$0x1]  ;;  %v241_v7 = vrot.slane %v217_v4, 5  ;;  %v256_v8 = vsel %vm255_vm0, %v205_v0, %v235_v3  ;;  %s228_s28 = scalar_lea.vmem [#allocation4], %s227_s18  ;;  %s379_s9 = sshll.u32 %s549_s25, 3 }
  0x20   : > { %v225_v9 = vld [vmem:[%s224_s27] sm:$0x1]  ;;  %v244_v10 = vrot.slane %v221_v6, 4  ;;  %v258_v11 = vsel %vm257_vm1, %v256_v8, %v238_v5  ;;  %v278_v29 = vmul.f32 %v409_v26, %v277_v28  ;;  %s201_s14 = scalar_lea.vmem %s547_s5, %s379_s9 }
  0x21   : > { %v229_v12 = vld [vmem:[%s228_s28] sm:$0x1]  ;;  %v247_v13 = vrot.slane %v225_v9, 3  ;;  %v260_v14 = vsel %vm259_vm2, %v258_v11, %v241_v7  ;;  %s232_s29 = scalar_lea.vmem [#allocation4], %s231_s23 }
  0x22   : > { %v250_v15 = vrot.slane %v229_v12, 2  ;;  %v262_v16 = vsel %vm261_vm3, %v260_v14, %v244_v10  ;;  %v233_v17 = vld [vmem:[%s232_s29] sm:$0x1]  ;;  %v279_v30 = vadd.f32 %v409_v26, %v278_v29 }
  0x23   : > { %v264_v18 = vsel %vm263_vm4, %v262_v16, %v247_v13  ;;  %v253_v19 = vrot.slane %v233_v17, 1 }
  0x24   : > { %v266_v20 = vsel %vm265_vm5, %v264_v18, %v250_v15  ;;  %v281_v31 = vsel %vm280_vm8, %v409_v26, %v279_v30 }
  0x25   : > { %v268_v22 = vsel %vm267_vm6, %v266_v20, %v253_v19 }
  0x26   : > { %v270_v23 = vadd.f32 %v269_v21, %v268_v22 }
  0x28   : > { %v272_v24 = vsel %vm271_vm7, %v270_v23, 0.0 }
  0x29   : > { %273 = vadd.xlane.f32.xlu0 %v272_v24 }
  0x9c   : > { %v274_v32 = vpop.xlane.xlu0 %273 }
  0x9d   : > { %v282_v33 = vmul.f32 %v281_v31, %v274_v32 }
  0x9f   : > { %v283_v34 = vsub.f32 %v270_v23, %v282_v33 }
  0xa1   : > { %v284_v35 = vmul.f32 %v283_v34, %v283_v34 }
  0xa3   : > { %v285_v36 = vsel %vm271_vm7, %v284_v35, 0.0 }
  0xa4   : > { %286 = vadd.xlane.f32.xlu0 %v285_v36 }
 0x117   : > { %v287_v37 = vpop.xlane.xlu0 %286 }
 0x118   : > { %v288_v38 = vmul.f32 %v287_v37, %v281_v31 }
 0x11a   : > { %v289_v39 = vadd.f32 1e-06, %v288_v38 }
 0x11c   : > { %410 = vrsqrt.f32 %v289_v39  ;;  %vm296_vm10 = vweird.f32 %v289_v39 }
 0x122   : > { %v411_v40 = vpop.eup %410 }
 0x123   : > { %v291_v41 = vmul.f32 %v411_v40, %v289_v39  ;;  %vm297_vm9 = vweird.f32 %v411_v40 }
 0x124   : > { %vm298_vm11 = vmor %vm296_vm10, %vm297_vm9 }
 0x125   : > { %v292_v42 = vmul.f32 %v411_v40, %v291_v41 }
 0x127   : > { %v293_v43 = vmul.f32 0.5, %v292_v42 }
 0x129   : > { %v294_v44 = vsub.f32 1.5, %v293_v43 }
 0x12b   : > { %v295_v45 = vmul.f32 %v411_v40, %v294_v44 }
 0x12d   : > { %v299_v47 = vsel %vm298_vm11, %v411_v40, %v295_v45 }
 0x12e   : > { %v300_v49 = vmul.f32 %v299_v47, %v283_v34 }
 0x130   : > { %v305_v50 = vmul.f32 %v406_v46, %v300_v49 }
 0x132   : > { %v310_v51 = vadd.f32 %v407_v48, %v305_v50 }
 0x134   : > { %311 = vst.msk [vmem:[%s201_s14] sm:$0xff] %vm271_vm7, %v310_v51 }
 0x135 PF: > { %s24_s22 = sadd.s32 1, %s466_s22  }
 0x136   : > { %p21_p7 = scmp.ge.s32.totalorder %s24_s22, 4  }
 0x138   :  { %23 = sbr.rel (!%p21_p7) target bundleno = 7 (0x7), region = 76 }
 0x13d   :  { %331 = vsyncpa [#allocation5], 1 }
 0x13e   :  { %333 = vsyncpa [#allocation5 + $0x1], 1 }

// kernel: transformer_forward.20
= control target key start
LH: loop header
LB: loop body
LE: loop exit
PB: predicated region body
PF: predicated region fallthrough
CT: control target
= control target key end

     0   :  { %13 = vsyncpa [#allocation3], 0  ;;  %s1381_s0 = inlined_call_operand.vmem [shape: f32[2,8,32], index: 0, kind: input, shape index: {}]   ;;  %s1382_s1 = inlined_call_operand.vmem [shape: f32[2,10,32], index: 1, kind: input, shape index: {}]   ;;  %s1383_s2 = inlined_call_operand.vmem [shape: s32[2,1,10], index: 2, kind: input, shape index: {}]   ;;  %s1384_s3 = inlined_call_operand.hbm [shape: f32[32,32], index: 3, kind: input, shape index: {}]   ;;  %s1385_s4 = inlined_call_operand.hbm [shape: f32[32,64], index: 4, kind: input, shape index: {}]   ;;  %s1386_s5 = inlined_call_operand.hbm [shape: f32[32,32], index: 5, kind: input, shape index: {}]   ;;  %s1387_s6 = inlined_call_operand.vmem [shape: f32[1,32], index: 6, kind: input, shape index: {}]   ;;  %s1388_s7 = inlined_call_operand.vmem [shape: f32[1,32], index: 7, kind: input, shape index: {}]   ;;  %s1389_s8 = inlined_call_operand.vmem [shape: f32[2,8,32], index: 8, kind: output, shape index: {}]  }
   0x1   :  { %14 = vsyncpa [#allocation5], 0  ;;  %s1225_s27 = smov 0  }
   0x2 LB: > { %s1231_s28 = sadd.s32 4294967295, %s1161_s27   ;;  %p942_p0 = scmp.ge.s32.totalorder %s1161_s27, 1  ;;  %s1161_s27 = sphi %s1225_s27, %s20_s27  }
   0x3   : > { %p234_p1 = scmp.lt.s32.totalorder %s1161_s27, 3  ;;  %p1004_p2 = scmp.eq.s32.totalorder %s1231_s28, 0 }
   0x4   : > { %s259_s9 = sshll.u32 %s1385_s4, 4  ;;  %s245_s13 = sshll.u32 %s1384_s3, 4  ;;  %s260_s9 = int_to_ptr.hbm [resolvable:$true] %s259_s9  ;;  %s246_s13 = int_to_ptr.hbm [resolvable:$true] %s245_s13 }
   0x5   : > { %p1239_p3 = pnand %p942_p0, %p234_p1  ;;  %s1163_s14 = smov [#allocation4]  }
   0x6   : > { %s261_s15 = sshll.u32 %s1163_s14, 4  ;;  %s1164_s16 = smov [#allocation2]   ;;  %s262_s15 = int_to_ptr.vmem [resolvable:$true] %s261_s15 }
   0x7   : > { %p994_p4 = pneg %p1239_p3  ;;  %s247_s17 = sshll.u32 %s1164_s16, 4  ;;  %s248_s17 = int_to_ptr.vmem [resolvable:$true] %s247_s17 }
   0x8   : > { %s273_s20 = sshll.u32 %s1386_s5, 4  ;;  %s1165_s21 = smov 128   ;;  %s274_s20 = int_to_ptr.hbm [resolvable:$true] %s273_s20 }
   0x9   : > { %p995_p5 = pnand %p1004_p2, %p994_p4  ;;  %s1166_s22 = smov 8  }
   0xa   : > { %s1167_s23 = smov [#allocation6]   ;;  %318 = sbr.rel (%p1239_p3) target bundleno = 1980 (0x7bc), region = 52 }
   0xb   : > { %1000 = dma.hbm_to_vmem [thread:$0]  (!%p995_p5), %s260_s9, 512, %s262_s15, [#allocation5], %s1165_s21, %s1165_s21, %s1166_s22  }
   0xc   : > { %997 = dma.hbm_to_vmem [thread:$0]  (!%p995_p5), %s246_s13, 512, %s248_s17, [#allocation3], %s1165_s21, %s1165_s21, %s1166_s22  }
   0xd   : > { %s275_s24 = sshll.u32 %s1167_s23, 4  ;;  %s276_s24 = int_to_ptr.vmem [resolvable:$true] %s275_s24 }
   0xe   : > { %1003 = dma.hbm_to_vmem [thread:$0]  (!%p995_p5), %s274_s20, 512, %s276_s24, [#allocation5], %s1165_s21, %s1165_s21, %s1166_s22  }
   0xf   : > { %1152 = dma.done.wait (%p1004_p2), [#allocation3], 512  }
  0x10   : > { %1154 = vsyncadd (%p1004_p2), [#allocation3], 4294966784 }
  0x11   : > { %1156 = dma.done.wait (%p1004_p2), [#allocation5], 1024  }
  0x12   : > { %1158 = vsyncadd (%p1004_p2), [#allocation5], 4294966272  ;;  %p369_p6 = scmp.lt.s32.totalorder %s1231_s28, 1  ;;  %v420_v0 = vld [vmem:[#allocation4 + $0x18] sm:$0xff]  ;;  %v419_v1 = vld [vmem:[#allocation4 + $0x10] sm:$0xff]  ;;  %vm392_vm0 = vcmask 261120  }
  0x13   : > { %439 = vmatpush.msra.mxu1 %v420_v0  ;;  %v391_v2 = vld [vmem:[#allocation2 + $0x18] sm:$0xff]  ;;  %v418_v3 = vld [vmem:[#allocation4 + $0x8] sm:$0xff]  ;;  %v390_v4 = vld [vmem:[#allocation2 + $0x10] sm:$0xff]  ;;  %vm455_vm1 = vcmask 64512   ;;  %s1168_s13 = smov 120   ;;  %s1169_s14 = smov 96  }
  0x14   : > { %s1394_s28 = smov (!%p369_p6, %s1231_s28), 1  ;;  %408 = vmatpush.msra.mxu0 %v391_v2  ;;  %v389_v5 = vld [vmem:[#allocation2 + $0x8] sm:$0xff]  ;;  %v417_v6 = vld [vmem:[#allocation4] sm:$0xff]  ;;  %s1170_s15 = smov 112   ;;  %vm506_vm2 = vcmask 1041408   ;;  %v1171_v21 = vmov 0  }
  0x15   : > { %s981_s25 = sshll.u32 %s1394_s28, 4  ;;  %s951_s26 = sshll.u32 %s1394_s28, 3  ;;  %440 = vmatpush.msra.mxu1 %v419_v1  ;;  %v388_v8 = vld [vmem:[#allocation2] sm:$0xff]  ;;  %vm486_vm5 = vcmask 80896   ;;  %v769_v24 = vld [vmem:[#allocation6 + $0x8] sm:$0xff]  ;;  %vm764_vm6 = vcmask 130048  }
  0x16   : > { %s377_s9 = scalar_lea.vmem %s1382_s1, %s981_s25  ;;  %s372_s12 = scalar_lea.vmem %s1381_s0, %s951_s26  ;;  %409 = vmatpush.msra.mxu0 %v390_v4  ;;  %vm766_vm7 = vcmask 195584  }
  0x17   : > { %441 = vmatpush.msra.mxu1 %v418_v3  ;;  %v386_v7 = vld [vmem:[%s377_s9] sm:$0xff]  ;;  %v387_v10 = vld [vmem:[%s377_s9 + $0x8] sm:$0x3]  ;;  %s380_s18 = scalar_lea.vmem %s1383_s2, %s1394_s28  ;;  %s1172_s19 = smov 88  }
  0x18   : > { %410 = vmatpush.msra.mxu0 %v389_v5  ;;  %v1277_v9 = vld [vmem:[%s372_s12] sm:$0xff]  ;;  %s1173_s20 = smov 104   ;;  %s1174_s21 = smov 80  }
  0x19   : > { %442 = vmatpush.msra.mxu1 %v417_v6  ;;  %v450_v20 = vld [vmem:[%s380_s18] sm:$0x1]  ;;  %s1175_s22 = smov 72   ;;  %s1176_s23 = smov 8  }
  0x1a   : > { %956 = vmatmul.msk.f32.vlgmr.msra.gmra.mxu1 %vm392_vm0, %v386_v7  ;;  %411 = vmatpush.msra.mxu0 %v388_v8  ;;  %vm451_vm3 = vcmp.ne.s32.totalorder %v450_v20, 0  ;;  %s1177_s24 = smov 16   ;;  %s1178_s25 = smov 24  }
  0x1b   : > { %955 = vmatmul.msk.f32.vlgmr.msra.gmra.mxu0 %vm392_vm0, %v1277_v9  ;;  %v452_v22 = vsel %vm451_vm3, 1, %v1171_v21 }
  0x1c   : > { %v453_v23 = vperm.slane %v452_v22, 0  ;;  %v771_v22 = vld [vmem:[#allocation6 + $0x18] sm:$0xff] }
  0x1e   : > { %vm1308_vm4 = vcmp.eq.s32.totalorder %v453_v23, 1  ;;  %v770_v23 = vld [vmem:[#allocation6 + $0x10] sm:$0xff] }
  0x22   : > { %957 = vmatmul.msk.f32.gmra.mxu1 %vm392_vm0, %v387_v10 }
  0x97   : > { %v1283_v11 = vpop.f32.mrf.mxu1 }
  0x98   : > { %v413_v13 = vpop.f32.mrf.mxu0 }
  0x99   : > { %v416_v14 = vmul.f32 0.35355338, %v413_v13 }
  0x9f   : > { %v1285_v12 = vpop.f32.mrf.mxu1 }
  0xa0   : > { %533 = vrot.lane.b32.xlu2 %v1285_v12, %s1168_s13  ;;  %500 = vrot.lane.b32.xlu1 %v1285_v12, %s1169_s14 }
  0xa1   : > { %958 = vmatpush.xpose.msk.msra.mxu2 %vm455_vm1, %v1285_v12 }
  0xa5   : > { %959 = vmatpush.xpose.msk.msra.mxu2 %vm455_vm1, %v1283_v11 }
  0xa8   : > { %960 = vmatmul.msk.f32.vlgmr.msra.gmra.mxu2 %vm455_vm1, %v416_v14  ;;  %531 = vrot.lane.b32.xlu2 %v1283_v11, %s1168_s13 }
  0xa9   : > { %498 = vrot.lane.b32.xlu1 %v1283_v11, %s1169_s14 }
  0xb0   : > { %607 = vrot.lane.b32.xlu2 %v1285_v12, %s1170_s15 }
  0xfa   : > { %v534_v15 = vpop.permute.xlu2 %533 }
 0x102   : > { %v532_v16 = vpop.permute.xlu2 %531 }
 0x10a   : > { %v608_v17 = vpop.permute.xlu2 %607 }
 0x10b   : > { %968 = vmatpush.xpose.msk.msrb.mxu2 %vm455_vm1, %v608_v17 }
 0x112   : > { %v501_v18 = vpop.permute.xlu1 %500 }
 0x113   : > { %961 = vmatpush.msk.msra.mxu3 %vm506_vm2, %v501_v18 }
 0x11b   : > { %v499_v19 = vpop.permute.xlu1 %498 }
 0x11c   : > { %524 = vmatpush.msra.mxu3 %v499_v19 }
 0x11e   : > { %963 = vmatpush.xpose.msk.msrb.mxu3 %vm455_vm1, %v534_v15 }
 0x122   : > { %964 = vmatpush.xpose.msk.msrb.mxu3 %vm455_vm1, %v532_v16 }
 0x12b   : > { %v482_v25 = vpop.f32.mrf.mxu2 }
 0x12c   : > { %v485_v26 = vsel %vm1308_vm4, %v482_v25, -1e+09 }
 0x12d   : > { %v487_v27 = vsel %vm486_vm5, %v485_v26, -inf }
 0x12e   : > { %488 = vmax.xlane.f32.xlu0 %v487_v27 }
 0x1a1   : > { %v489_v28 = vpop.xlane.xlu0 %488 }
 0x1a2   : > { %v490_v29 = vsub.f32 %v485_v26, %v489_v28 }
 0x1a4   : > { %v491_v30 = vmul.f32 1.442695, %v490_v29 }
 0x1a6   : > { %1037 = vpow2.f32 %v491_v30 }
 0x1ac   : > { %v1038_v31 = vpop.eup %1037 }
 0x1ad   : > { %v493_v32 = vsel %vm486_vm5, %v1038_v31, 0.0 }
 0x1ae   : > { %494 = vadd.xlane.f32.xlu0 %v493_v32 }
 0x1c2   : > { %529 = vrot.lane.b32.xlu0 %v416_v14, %s1168_s13  ;;  %s384_s13 = scalar_lea.vmem %s1389_s8, %s951_s26 }
 0x1ca   : > { %605 = vrot.lane.b32.xlu0 %v1283_v11, %s1170_s15 }
 0x1d2   : > { %603 = vrot.lane.b32.xlu0 %v416_v14, %s1170_s15 }
 0x1da   : > { %575 = vrot.lane.b32.xlu0 %v1285_v12, %s1172_s19 }
 0x1e2   : > { %681 = vrot.lane.b32.xlu0 %v1285_v12, %s1173_s20 }
 0x1ea   : > { %677 = vrot.lane.b32.xlu0 %v416_v14, %s1173_s20 }
 0x221   : > { %v495_v33 = vpop.xlane.xlu0 %494 }
 0x222   : > { %1039 = vrcp.f32 %v495_v33 }
 0x228   : > { %v1040_v34 = vpop.eup %1039 }
 0x229   : > { %v497_v35 = vmul.f32 %v1040_v34, %v1038_v31 }
 0x22b   : > { %962 = vmatmul.msk.f32.vlgmr.msra.gmra.mxu3 %vm486_vm5, %v497_v35  ;;  %v1179_v35 = vmov 32.0  }
 0x234   : > { %v530_v36 = vpop.permute.xlu0 %529 }
 0x235   : > { %965 = vmatmul.msk.f32.vlgmr.msrb.gmra.mxu3 %vm455_vm1, %v530_v36 }
 0x23c   : > { %v606_v37 = vpop.permute.xlu0 %605 }
 0x23d   : > { %969 = vmatpush.xpose.msk.msrb.mxu2 %vm455_vm1, %v606_v37 }
 0x241   : > { %787 = vmatpush.msra.mxu2 %v771_v22 }
 0x243   : > { %788 = vmatpush.msra.mxu2 %v770_v23 }
 0x244   : > { %v604_v38 = vpop.permute.xlu0 %603 }
 0x245   : > { %970 = vmatmul.msk.f32.vlgmr.msrb.gmra.mxu2 %vm455_vm1, %v604_v38 }
 0x246   : > { %789 = vmatpush.msra.mxu2 %v769_v24 }
 0x24c   : > { %v576_v39 = vpop.permute.xlu0 %575 }
 0x24d   : > { %966 = vmatpush.msk.msrb.mxu0 %vm506_vm2, %v576_v39 }
 0x254   : > { %v682_v50 = vpop.permute.xlu0 %681 }
 0x25c   : > { %v678_v53 = vpop.permute.xlu0 %677 }
 0x2ae   : > { %v1329_v40 = vpop.f32.mrf.mxu3 }
 0x2b8   : > { %v558_v41 = vpop.f32.mrf.mxu3 }
 0x2b9   : > { %v561_v42 = vsel %vm1308_vm4, %v558_v41, -1e+09 }
 0x2ba   : > { %v562_v43 = vsel %vm486_vm5, %v561_v42, -inf }
 0x2bb   : > { %563 = vmax.xlane.f32.xlu1 %v562_v43 }
 0x2c8   : > { %v632_v44 = vpop.f32.mrf.mxu2 }
 0x2c9   : > { %v635_v45 = vsel %vm1308_vm4, %v632_v44, -1e+09 }
 0x2ca   : > { %v636_v46 = vsel %vm486_vm5, %v635_v45, -inf }
 0x2cb   : > { %637 = vmax.xlane.f32.xlu0 %v636_v46 }
 0x2d4   : > { %573 = vrot.lane.b32.xlu1 %v1283_v11, %s1172_s19 }
 0x2df   : > { %649 = vrot.lane.b32.xlu0 %v1285_v12, %s1174_s21 }
 0x2e7   : > { %721 = vrot.lane.b32.xlu0 %v1283_v11, %s1175_s22 }
 0x32e   : > { %v564_v47 = vpop.xlane.xlu1 %563 }
 0x32f   : > { %v565_v48 = vsub.f32 %v561_v42, %v564_v47 }
 0x331   : > { %v566_v49 = vmul.f32 1.442695, %v565_v48 }
 0x333   : > { %1041 = vpow2.f32 %v566_v49 }
 0x339   : > { %v1042_v51 = vpop.eup %1041 }
 0x33a   : > { %v568_v52 = vsel %vm486_vm5, %v1042_v51, 0.0 }
 0x33b   : > { %569 = vadd.xlane.f32.xlu2 %v568_v52 }
 0x33e   : > { %v638_v55 = vpop.xlane.xlu0 %637 }
 0x33f   : > { %v639_v57 = vsub.f32 %v635_v45, %v638_v55  ;;  %v1035_v55 = vld [vmem:[%s1387_s6] ss:$0 sm:$0xff] }
 0x341   : > { %v640_v58 = vmul.f32 1.442695, %v639_v57  ;;  %v1036_v57 = vld [vmem:[%s1388_s7] ss:$0 sm:$0xff] }
 0x343   : > { %1043 = vpow2.f32 %v640_v58 }
 0x346   : > { %v574_v54 = vpop.permute.xlu1 %573 }
 0x347   : > { %598 = vmatpush.msrb.mxu0 %v574_v54 }
 0x349   : > { %973 = vmatpush.xpose.msk.msra.mxu0 %vm455_vm1, %v682_v50  ;;  %v1044_v59 = vpop.eup %1043 }
 0x34a   : > { %v642_v60 = vsel %vm486_vm5, %v1044_v59, 0.0 }
 0x351   : > { %v650_v56 = vpop.permute.xlu0 %649 }
 0x352   : > { %971 = vmatpush.msk.msra.mxu3 %vm506_vm2, %v650_v56 }
 0x353   : > { %679 = vrot.lane.b32.xlu2 %v1283_v11, %s1173_s20 }
 0x359   : > { %v722_v20 = vpop.permute.xlu0 %721 }
 0x37c   : > { %643 = vadd.xlane.f32.xlu2 %v642_v60 }
 0x394   : > { %647 = vrot.lane.b32.xlu2 %v1283_v11, %s1174_s21 }
 0x3ae   : > { %v570_v61 = vpop.xlane.xlu2 %569 }
 0x3af   : > { %1045 = vrcp.f32 %v570_v61 }
 0x3b5   : > { %v1046_v62 = vpop.eup %1045 }
 0x3b6   : > { %v680_v63 = vpop.permute.xlu2 %679  ;;  %v572_v0 = vmul.f32 %v1046_v62, %v1042_v51 }
 0x3b7   : > { %974 = vmatpush.xpose.msk.msra.mxu0 %vm455_vm1, %v680_v63 }
 0x3b8   : > { %967 = vmatmul.msk.f32.vlgmr.msrb.gmra.mxu0 %vm486_vm5, %v572_v0 }
 0x3c0   : > { %975 = vmatmul.msk.f32.vlgmr.msra.gmra.mxu0 %vm455_vm1, %v678_v53 }
 0x3ef   : > { %v644_v1 = vpop.xlane.xlu2 %643 }
 0x3f0   : > { %1047 = vrcp.f32 %v644_v1 }
 0x3f6   : > { %v1048_v2 = vpop.eup %1047 }
 0x3f7   : > { %v646_v3 = vmul.f32 %v1048_v2, %v1044_v59  ;;  %v648_v4 = vpop.permute.xlu2 %647 }
 0x3f8   : > { %672 = vmatpush.msra.mxu3 %v648_v4 }
 0x3f9   : > { %972 = vmatmul.msk.f32.vlgmr.msra.gmra.mxu3 %vm486_vm5, %v646_v3 }
 0x435   : > { %v600_v5 = vpop.f32.mrf.mxu0 }
 0x436   : > { %752 = vrot.lane.b32.xlu0 %v600_v5, %s1176_s23 }
 0x43d   : > { %v706_v6 = vpop.f32.mrf.mxu0 }
 0x43e   : > { %v709_v7 = vsel %vm1308_vm4, %v706_v6, -1e+09 }
 0x43f   : > { %v710_v8 = vsel %vm486_vm5, %v709_v7, -inf }
 0x440   : > { %711 = vmax.xlane.f32.xlu1 %v710_v8 }
 0x47c   : > { %v674_v10 = vpop.f32.mrf.mxu3 }
 0x47d   : > { %756 = vrot.lane.b32.xlu0 %v674_v10, %s1177_s24 }
 0x4a8   : > { %v753_v26 = vpop.permute.xlu0 %752 }
 0x4a9   : > { %v763_v28 = vsel %vm455_vm1, %v1329_v40, %v753_v26 }
 0x4b3   : > { %v712_v11 = vpop.xlane.xlu1 %711 }
 0x4b4   : > { %v713_v13 = vsub.f32 %v709_v7, %v712_v11 }
 0x4b6   : > { %v714_v14 = vmul.f32 1.442695, %v713_v13 }
 0x4b8   : > { %1049 = vpow2.f32 %v714_v14 }
 0x4be   : > { %v1050_v15 = vpop.eup %1049 }
 0x4bf   : > { %v716_v16 = vsel %vm486_vm5, %v1050_v15, 0.0 }
 0x4c0   : > { %717 = vadd.xlane.f32.xlu1 %v716_v16 }
 0x4d9   : > { %723 = vrot.lane.b32.xlu1 %v1285_v12, %s1175_s22  ;;  %v768_v12 = vld [vmem:[#allocation6] sm:$0xff] }
 0x4da   : > { %790 = vmatpush.msra.mxu2 %v768_v12 }
 0x4ef   : > { %v757_v27 = vpop.permute.xlu0 %756 }
 0x4f0   : > { %v765_v29 = vsel %vm764_vm6, %v763_v28, %v757_v27 }
 0x533   : > { %v718_v17 = vpop.xlane.xlu1 %717 }
 0x534   : > { %1051 = vrcp.f32 %v718_v17 }
 0x535   : > { %1053 = vrcp.f32 %v1179_v35 }
 0x53a   : > { %v1052_v18 = vpop.eup %1051 }
 0x53b   : > { %v720_v21 = vmul.f32 %v1052_v18, %v1050_v15  ;;  %v1054_v36 = vpop.eup %1053 }
 0x53c   : > { %v799_v37 = vmul.f32 32.0, %v1054_v36  ;;  %vm803_vm8 = vweird.f32 %v1054_v36 }
 0x53e   : > { %v800_v38 = vsub.f32 1.0, %v799_v37 }
 0x540   : > { %v801_v39 = vmul.f32 %v1054_v36, %v800_v38 }
 0x542   : > { %v802_v41 = vadd.f32 %v1054_v36, %v801_v39 }
 0x544   : > { %v804_v40 = vsel %vm803_vm8, %v1054_v36, %v802_v41 }
 0x54b   : > { %v724_v19 = vpop.permute.xlu1 %723 }
 0x54c   : > { %976 = vmatpush.msk.msrb.mxu1 %vm506_vm2, %v724_v19 }
 0x54e   : > { %746 = vmatpush.msrb.mxu1 %v722_v20 }
 0x54f   : > { %977 = vmatmul.msk.f32.vlgmr.msrb.gmra.mxu1 %vm486_vm5, %v720_v21 }
 0x5cc   : > { %v748_v25 = vpop.f32.mrf.mxu1 }
 0x5cd   : > { %760 = vrot.lane.b32.xlu2 %v748_v25, %s1178_s25 }
 0x627   : > { %v761_v30 = vpop.permute.xlu2 %760 }
 0x628   : > { %v767_v31 = vsel %vm766_vm7, %v765_v29, %v761_v30 }
 0x629   : > { %978 = vmatmul.msk.f32.vlgmr.msra.gmra.mxu2 %vm392_vm0, %v767_v31 }
 0x6ac   : > { %v792_v32 = vpop.f32.mrf.mxu2 }
 0x6ad   : > { %v793_v33 = vadd.f32 %v792_v32, %v1277_v9 }
 0x6af   : > { %v795_v34 = vsel %vm392_vm0, %v793_v33, 0.0 }
 0x6b0   : > { %796 = vadd.xlane.f32.xlu1 %v795_v34 }
 0x723   : > { %v797_v42 = vpop.xlane.xlu1 %796 }
 0x724   : > { %v805_v43 = vmul.f32 %v804_v40, %v797_v42 }
 0x726   : > { %v806_v44 = vsub.f32 %v793_v33, %v805_v43 }
 0x728   : > { %v807_v45 = vmul.f32 %v806_v44, %v806_v44 }
 0x72a   : > { %v808_v46 = vsel %vm392_vm0, %v807_v45, 0.0 }
 0x72b   : > { %809 = vadd.xlane.f32.xlu0 %v808_v46 }
 0x79e   : > { %v810_v9 = vpop.xlane.xlu0 %809 }
 0x79f   : > { %v811_v47 = vmul.f32 %v810_v9, %v804_v40 }
 0x7a1   : > { %v812_v48 = vadd.f32 1e-06, %v811_v47 }
 0x7a3   : > { %1055 = vrsqrt.f32 %v812_v48  ;;  %vm819_vm10 = vweird.f32 %v812_v48 }
 0x7a9   : > { %v1056_v49 = vpop.eup %1055 }
 0x7aa   : > { %v814_v50 = vmul.f32 %v1056_v49, %v812_v48  ;;  %vm820_vm9 = vweird.f32 %v1056_v49 }
 0x7ab   : > { %vm821_vm11 = vmor %vm819_vm10, %vm820_vm9 }
 0x7ac   : > { %v815_v51 = vmul.f32 %v1056_v49, %v814_v50 }
 0x7ae   : > { %v816_v52 = vmul.f32 0.5, %v815_v51 }
 0x7b0   : > { %v817_v53 = vsub.f32 1.5, %v816_v52 }
 0x7b2   : > { %v818_v54 = vmul.f32 %v1056_v49, %v817_v53 }
 0x7b4   : > { %v822_v56 = vsel %vm821_vm11, %v1056_v49, %v818_v54 }
 0x7b5   : > { %v823_v58 = vmul.f32 %v822_v56, %v806_v44 }
 0x7b7   : > { %v828_v59 = vmul.f32 %v1035_v55, %v823_v58 }
 0x7b9   : > { %v833_v60 = vadd.f32 %v1036_v57, %v828_v59 }
 0x7bb   : > { %834 = vst.msk [vmem:[%s384_s13] sm:$0xff] %vm392_vm0, %v833_v60 }
 0x7bc PF: > { %s20_s27 = sadd.s32 1, %s1161_s27  }
 0x7bd   : > { %p17_p7 = scmp.ge.s32.totalorder %s20_s27, 4  }
 0x7bf   :  { %19 = sbr.rel (!%p17_p7) target bundleno = 2 (0x2), region = 101 }
 0x7c4   :  { %854 = vsyncpa [#allocation3], 1 }
 0x7c5   :  { %856 = vsyncpa [#allocation3 + $0x1], 1 }
 0x7c6   :  { %857 = vsyncpa [#allocation5], 1 }

// kernel: transformer_forward.19
= control target key start
LH: loop header
LB: loop body
LE: loop exit
PB: predicated region body
PF: predicated region fallthrough
CT: control target
= control target key end

     0   :  { %13 = vsyncpa [#allocation3], 0  ;;  %s1236_s0 = inlined_call_operand.vmem [shape: f32[2,8,32], index: 0, kind: input, shape index: {}, may-alias: {0,1}]   ;;  %s1237_s1 = inlined_call_operand.vmem [shape: f32[2,8,32], index: 1, kind: input, shape index: {}, may-alias: {0,1}]   ;;  %s1238_s2 = inlined_call_operand.vmem [shape: s32[2,1,8], index: 2, kind: input, shape index: {}]   ;;  %s1239_s3 = inlined_call_operand.vmem [shape: f32[32,32], index: 3, kind: input, shape index: {}]   ;;  %s1240_s4 = inlined_call_operand.hbm [shape: f32[32,64], index: 4, kind: input, shape index: {}]   ;;  %s1241_s5 = inlined_call_operand.hbm [shape: f32[32,32], index: 5, kind: input, shape index: {}]   ;;  %s1242_s6 = inlined_call_operand.vmem [shape: f32[1,32], index: 6, kind: input, shape index: {}]   ;;  %s1243_s7 = inlined_call_operand.vmem [shape: f32[1,32], index: 7, kind: input, shape index: {}]   ;;  %s1244_s8 = inlined_call_operand.vmem [shape: f32[2,8,32], index: 8, kind: output, shape index: {}]  }
   0x1   :  { %14 = vsyncpa [#allocation5], 0  ;;  %s1109_s27 = smov 0  }
   0x2 LB: > { %s248_s30 = sshll.u32 %s1240_s4, 4  ;;  %s878_s9 = sadd.s32 4294967295, %s1046_s27   ;;  %s1046_s27 = sphi %s1109_s27, %s20_s27   ;;  %s249_s30 = int_to_ptr.hbm [resolvable:$true] %s248_s30 }
   0x3   : > { %p880_p0 = scmp.ge.s32.totalorder %s1046_s27, 1  ;;  %p234_p1 = scmp.lt.s32.totalorder %s1046_s27, 3 }
   0x4   : > { %p922_p2 = scmp.eq.s32.totalorder %s878_s9, 0  ;;  %s1048_s11 = smov [#allocation2]  }
   0x5   : > { %p1120_p3 = pnand %p880_p0, %p234_p1  ;;  %s250_s12 = sshll.u32 %s1048_s11, 4  ;;  %s251_s12 = int_to_ptr.vmem [resolvable:$true] %s250_s12 }
   0x6   : > { %s262_s15 = sshll.u32 %s1241_s5, 4  ;;  %s1049_s16 = smov [#allocation4]   ;;  %s263_s15 = int_to_ptr.hbm [resolvable:$true] %s262_s15 }
   0x7   : > { %p915_p4 = pneg %p1120_p3  ;;  %s264_s17 = sshll.u32 %s1049_s16, 4  ;;  %s265_s17 = int_to_ptr.vmem [resolvable:$true] %s264_s17 }
   0x8   : > { %s1050_s18 = smov 128   ;;  %s1051_s19 = smov 8  }
   0x9   : > { %p916_p5 = pnand %p922_p2, %p915_p4  ;;  %306 = sbr.rel (%p1120_p3) target bundleno = 1601 (0x641), region = 52 }
   0xb   : > { %918 = dma.hbm_to_vmem [thread:$0]  (!%p916_p5), %s249_s30, 512, %s251_s12, [#allocation3], %s1050_s18, %s1050_s18, %s1051_s19  }
   0xc   : > { %921 = dma.hbm_to_vmem [thread:$0]  (!%p916_p5), %s263_s15, 512, %s265_s17, [#allocation5], %s1050_s18, %s1050_s18, %s1051_s19  }
   0xe   : > { %1037 = dma.done.wait (%p922_p2), [#allocation3], 512  }
   0xf   : > { %1039 = vsyncadd (%p922_p2), [#allocation3], 4294966784 }
  0x10   : > { %1041 = dma.done.wait (%p922_p2), [#allocation5], 512  }
  0x11   : > { %1043 = vsyncadd (%p922_p2), [#allocation5], 4294966784  ;;  %p351_p6 = scmp.lt.s32.totalorder %s878_s9, 1  ;;  %v371_v0 = vld [vmem:[%s1239_s3 + $0x18] sm:$0xff]  ;;  %v370_v2 = vld [vmem:[%s1239_s3 + $0x10] sm:$0xff]  ;;  %vm372_vm0 = vcmask 261120   ;;  %v429_v16 = vlaneseq }
  0x12   : > { %v400_v1 = vld [vmem:[#allocation2 + $0x18] sm:$0xff]  ;;  %388 = vmatpush.msra.mxu0 %v371_v0  ;;  %v399_v3 = vld [vmem:[#allocation2 + $0x10] sm:$0xff]  ;;  %v369_v4 = vld [vmem:[%s1239_s3 + $0x8] sm:$0xff]  ;;  %vm435_vm1 = vcmask 64512   ;;  %s1052_s15 = smov 96   ;;  %s1053_s16 = smov 120  }
  0x13   : > { %s1249_s9 = smov (!%p351_p6, %s878_s9), 1  ;;  %416 = vmatpush.msra.mxu1 %v400_v1  ;;  %v398_v5 = vld [vmem:[#allocation2 + $0x8] sm:$0xff]  ;;  %v368_v6 = vld [vmem:[%s1239_s3] sm:$0xff]  ;;  %s1054_s17 = smov 104   ;;  %v1056_v18 = vmov 0   ;;  %v430_v22 = vshrl.u32 %v429_v16, 7 }
  0x14   : > { %s1139_s20 = sshll.u32 %s1249_s9, 3  ;;  %389 = vmatpush.msra.mxu0 %v370_v2  ;;  %v397_v7 = vld [vmem:[#allocation2] sm:$0xff]  ;;  %s1055_s18 = smov 112   ;;  %v432_v23 = vand.u32 127, %v429_v16  ;;  %v718_v16 = vld [vmem:[#allocation4 + $0x18] sm:$0xff]  ;;  %vm711_vm6 = vcmask 130048  }
  0x15   : > { %s354_s30 = scalar_lea.vmem %s1236_s0, %s1139_s20  ;;  %s358_s12 = scalar_lea.vmem %s1237_s1, %s1139_s20  ;;  %417 = vmatpush.msra.mxu1 %v399_v3  ;;  %vm713_vm7 = vcmask 195584  }
  0x16   : > { %390 = vmatpush.msra.mxu0 %v369_v4  ;;  %v1161_v8 = vld [vmem:[%s354_s30] sm:$0xff]  ;;  %s361_s22 = scalar_lea.vmem %s1238_s2, %s1249_s9  ;;  %vm433_vm4 = vcmp.le.s32.totalorder %v432_v23, %v430_v22  ;;  %s1057_s9 = smov 72  }
  0x17   : > { %418 = vmatpush.msra.mxu1 %v398_v5  ;;  %v367_v9 = vld [vmem:[%s358_s12] sm:$0xff]  ;;  %s1058_s23 = smov 88   ;;  %s1059_s24 = smov 80  }
  0x18   : > { %391 = vmatpush.msra.mxu0 %v368_v6  ;;  %v424_v15 = vld [vmem:[%s361_s22] sm:$0x1]  ;;  %s1060_s25 = smov 8   ;;  %s1061_s26 = smov 24  }
  0x19   : > { %419 = vmatpush.msra.mxu1 %v397_v7  ;;  %890 = vmatmul.msk.f32.vlgmr.msra.gmra.mxu0 %vm372_vm0, %v1161_v8  ;;  %vm425_vm2 = vcmp.ne.s32.totalorder %v424_v15, 0  ;;  %s1062_s28 = smov 16   ;;  %s365_s14 = scalar_lea.vmem %s1244_s8, %s1139_s20 }
  0x1a   : > { %891 = vmatmul.msk.f32.vlgmr.msra.gmra.mxu1 %vm372_vm0, %v367_v9  ;;  %v426_v19 = vsel %vm425_vm2, 1, %v1056_v18  ;;  %v716_v18 = vld [vmem:[#allocation4 + $0x8] sm:$0xff] }
  0x1b   : > { %v427_v21 = vperm.slane %v426_v19, 0  ;;  %v715_v19 = vld [vmem:[#allocation4] sm:$0xff] }
  0x1d   : > { %vm428_vm3 = vcmp.eq.s32.totalorder %v427_v21, 1 }
  0x1e   : > { %vm1182_vm5 = vmand %vm428_vm3, %vm433_vm4 }
  0x96   : > { %v393_v10 = vpop.f32.mrf.mxu0 }
  0x97   : > { %v1166_v11 = vpop.f32.mrf.mxu1  ;;  %v396_v12 = vmul.f32 0.35355338, %v393_v10 }
  0x98   : > { %474 = vrot.lane.b32.xlu1 %v1166_v11, %s1052_s15  ;;  %892 = vmatpush.xpose.msk.msra.mxu2 %vm435_vm1, %v1166_v11 }
  0x99   : > { %500 = vrot.lane.b32.xlu2 %v396_v12, %s1053_s16 }
  0x9b   : > { %893 = vmatmul.msk.f32.vlgmr.msra.gmra.mxu2 %vm435_vm1, %v396_v12 }
  0xa0   : > { %502 = vrot.lane.b32.xlu1 %v1166_v11, %s1053_s16 }
  0xa1   : > { %634 = vrot.lane.b32.xlu2 %v1166_v11, %s1054_s17 }
  0xa8   : > { %568 = vrot.lane.b32.xlu1 %v1166_v11, %s1055_s18 }
  0xa9   : > { %566 = vrot.lane.b32.xlu2 %v396_v12, %s1055_s18 }
  0xf3   : > { %v501_v13 = vpop.permute.xlu2 %500 }
  0xfb   : > { %v635_v20 = vpop.permute.xlu2 %634 }
 0x103   : > { %v567_v26 = vpop.permute.xlu2 %566 }
 0x10a   : > { %v475_v14 = vpop.permute.xlu1 %474 }
 0x10b   : > { %495 = vmatpush.msra.mxu3 %v475_v14 }
 0x112   : > { %v503_v17 = vpop.permute.xlu1 %502 }
 0x113   : > { %895 = vmatpush.xpose.msk.msrb.mxu3 %vm435_vm1, %v503_v17  ;;  %v717_v17 = vld [vmem:[#allocation4 + $0x10] sm:$0xff] }
 0x11a   : > { %v569_v24 = vpop.permute.xlu1 %568 }
 0x11b   : > { %898 = vmatpush.xpose.msk.msrb.mxu0 %vm435_vm1, %v569_v24 }
 0x11e   : > { %v459_v27 = vpop.f32.mrf.mxu2  ;;  %899 = vmatmul.msk.f32.vlgmr.msrb.gmra.mxu0 %vm435_vm1, %v567_v26 }
 0x11f   : > { %v462_v28 = vsel %vm1182_vm5, %v459_v27, -1e+09  ;;  %734 = vmatpush.msra.mxu0 %v718_v16 }
 0x120   : > { %v463_v29 = vsel %vm435_vm1, %v462_v28, -inf }
 0x121   : > { %464 = vmax.xlane.f32.xlu0 %v463_v29  ;;  %735 = vmatpush.msra.mxu0 %v717_v17  ;;  %v1063_v29 = vmov 32.0  }
 0x123   : > { %736 = vmatpush.msra.mxu0 %v716_v18 }
 0x125   : > { %737 = vmatpush.msra.mxu0 %v715_v19 }
 0x194   : > { %v465_v30 = vpop.xlane.xlu0 %464 }
 0x195   : > { %v466_v31 = vsub.f32 %v462_v28, %v465_v30 }
 0x197   : > { %v467_v32 = vmul.f32 1.442695, %v466_v31 }
 0x199   : > { %952 = vpow2.f32 %v467_v32 }
 0x19b   : > { %v591_v35 = vpop.f32.mrf.mxu0 }
 0x19c   : > { %v594_v36 = vsel %vm1182_vm5, %v591_v35, -1e+09 }
 0x19d   : > { %v595_v37 = vsel %vm435_vm1, %v594_v36, -inf }
 0x19f   : > { %v953_v33 = vpop.eup %952 }
 0x1a0   : > { %v469_v34 = vsel %vm435_vm1, %v953_v33, 0.0 }
 0x1a1   : > { %470 = vadd.xlane.f32.xlu0 %v469_v34 }
 0x1b5   : > { %632 = vrot.lane.b32.xlu0 %v396_v12, %s1054_s17 }
 0x1df   : > { %596 = vmax.xlane.f32.xlu0 %v595_v37 }
 0x1f3   : > { %672 = vrot.lane.b32.xlu0 %v1166_v11, %s1057_s9 }
 0x214   : > { %v471_v38 = vpop.xlane.xlu0 %470 }
 0x215   : > { %954 = vrcp.f32 %v471_v38 }
 0x21b   : > { %v955_v39 = vpop.eup %954 }
 0x21c   : > { %v473_v40 = vmul.f32 %v955_v39, %v953_v33 }
 0x21e   : > { %894 = vmatmul.msk.f32.vlgmr.msra.gmra.mxu3 %vm435_vm1, %v473_v40 }
 0x21f   : > { %901 = vmatpush.xpose.msk.msra.mxu3 %vm435_vm1, %v635_v20 }
 0x226   : > { %896 = vmatmul.msk.f32.vlgmr.msrb.gmra.mxu3 %vm435_vm1, %v501_v13 }
 0x227   : > { %v633_v41 = vpop.permute.xlu0 %632 }
 0x22e   : > { %902 = vmatmul.msk.f32.vlgmr.msra.gmra.mxu3 %vm435_vm1, %v633_v41 }
 0x252   : > { %v597_v42 = vpop.xlane.xlu0 %596 }
 0x253   : > { %v598_v44 = vsub.f32 %v594_v36, %v597_v42 }
 0x255   : > { %v599_v45 = vmul.f32 1.442695, %v598_v44 }
 0x257   : > { %956 = vpow2.f32 %v599_v45 }
 0x25d   : > { %v957_v49 = vpop.eup %956 }
 0x25e   : > { %v601_v53 = vsel %vm435_vm1, %v957_v49, 0.0 }
 0x265   : > { %v673_v6 = vpop.permute.xlu0 %672 }
 0x2a1   : > { %v1200_v43 = vpop.f32.mrf.mxu3 }
 0x2a9   : > { %v525_v46 = vpop.f32.mrf.mxu3 }
 0x2aa   : > { %v528_v47 = vsel %vm1182_vm5, %v525_v46, -1e+09 }
 0x2ab   : > { %v529_v48 = vsel %vm435_vm1, %v528_v47, -inf }
 0x2ac   : > { %530 = vmax.xlane.f32.xlu1 %v529_v48 }
 0x2b1   : > { %v657_v50 = vpop.f32.mrf.mxu3 }
 0x2b2   : > { %v660_v51 = vsel %vm1182_vm5, %v657_v50, -1e+09 }
 0x2b3   : > { %v661_v52 = vsel %vm435_vm1, %v660_v51, -inf }
 0x2b4   : > { %662 = vmax.xlane.f32.xlu2 %v661_v52  ;;  %602 = vadd.xlane.f32.xlu1 %v601_v53 }
 0x31f   : > { %v531_v54 = vpop.xlane.xlu1 %530 }
 0x320   : > { %v532_v55 = vsub.f32 %v528_v47, %v531_v54 }
 0x322   : > { %v533_v56 = vmul.f32 1.442695, %v532_v55 }
 0x324   : > { %958 = vpow2.f32 %v533_v56 }
 0x327   : > { %v663_v57 = vpop.xlane.xlu2 %662  ;;  %v603_v0 = vpop.xlane.xlu1 %602 }
 0x328   : > { %v664_v58 = vsub.f32 %v660_v51, %v663_v57  ;;  %v951_v51 = vld [vmem:[%s1243_s7] ss:$0 sm:$0xff] }
 0x32a   : > { %v959_v59 = vpop.eup %958  ;;  %v665_v60 = vmul.f32 1.442695, %v664_v58 }
 0x32b   : > { %v535_v61 = vsel %vm435_vm1, %v959_v59, 0.0 }
 0x32c   : > { %960 = vpow2.f32 %v665_v60  ;;  %536 = vadd.xlane.f32.xlu2 %v535_v61 }
 0x332   : > { %v961_v62 = vpop.eup %960 }
 0x333   : > { %v667_v63 = vsel %vm435_vm1, %v961_v62, 0.0 }
 0x334   : > { %668 = vadd.xlane.f32.xlu1 %v667_v63 }
 0x344   : > { %540 = vrot.lane.b32.xlu2 %v1166_v11, %s1058_s23 }
 0x34d   : > { %606 = vrot.lane.b32.xlu1 %v1166_v11, %s1059_s24 }
 0x39f   : > { %v537_v1 = vpop.xlane.xlu2 %536 }
 0x3a0   : > { %962 = vrcp.f32 %v537_v1 }
 0x3a6   : > { %v963_v2 = vpop.eup %962 }
 0x3a7   : > { %v541_v3 = vpop.permute.xlu2 %540  ;;  %v669_v4 = vpop.xlane.xlu1 %668  ;;  %v539_v5 = vmul.f32 %v963_v2, %v959_v59 }
 0x3a8   : > { %964 = vrcp.f32 %v669_v4  ;;  %561 = vmatpush.msrb.mxu2 %v541_v3 }
 0x3a9   : > { %897 = vmatmul.msk.f32.vlgmr.msrb.gmra.mxu2 %vm435_vm1, %v539_v5  ;;  %966 = vrcp.f32 %v603_v0 }
 0x3aa   : > { %693 = vmatpush.msra.mxu2 %v673_v6  ;;  %968 = vrcp.f32 %v1063_v29 }
 0x3ae   : > { %v965_v7 = vpop.eup %964 }
 0x3af   : > { %v671_v9 = vmul.f32 %v965_v7, %v961_v62  ;;  %v967_v10 = vpop.eup %966 }
 0x3b0   : > { %v605_v12 = vmul.f32 %v967_v10, %v957_v49  ;;  %v969_v30 = vpop.eup %968  ;;  %v950_v49 = vld [vmem:[%s1242_s6] ss:$0 sm:$0xff] }
 0x3b1   : > { %903 = vmatmul.msk.f32.vlgmr.msra.gmra.mxu2 %vm435_vm1, %v671_v9  ;;  %v746_v31 = vmul.f32 32.0, %v969_v30  ;;  %vm750_vm8 = vweird.f32 %v969_v30 }
 0x3b3   : > { %v747_v32 = vsub.f32 1.0, %v746_v31 }
 0x3b5   : > { %v748_v33 = vmul.f32 %v969_v30, %v747_v32 }
 0x3b7   : > { %v749_v34 = vadd.f32 %v969_v30, %v748_v33 }
 0x3b9   : > { %v751_v35 = vsel %vm750_vm8, %v969_v30, %v749_v34 }
 0x3bf   : > { %v607_v11 = vpop.permute.xlu1 %606 }
 0x3c0   : > { %627 = vmatpush.msrb.mxu1 %v607_v11 }
 0x3c1   : > { %900 = vmatmul.msk.f32.vlgmr.msrb.gmra.mxu1 %vm435_vm1, %v605_v12 }
 0x42c   : > { %v563_v13 = vpop.f32.mrf.mxu2 }
 0x42d   : > { %699 = vrot.lane.b32.xlu2 %v563_v13, %s1060_s25 }
 0x434   : > { %v695_v14 = vpop.f32.mrf.mxu2 }
 0x435   : > { %707 = vrot.lane.b32.xlu2 %v695_v14, %s1061_s26 }
 0x43e   : > { %v629_v15 = vpop.f32.mrf.mxu1 }
 0x43f   : > { %703 = vrot.lane.b32.xlu0 %v629_v15, %s1062_s28 }
 0x487   : > { %v700_v20 = vpop.permute.xlu2 %699 }
 0x488   : > { %v710_v21 = vsel %vm435_vm1, %v1200_v43, %v700_v20 }
 0x48f   : > { %v708_v23 = vpop.permute.xlu2 %707 }
 0x4b1   : > { %v704_v22 = vpop.permute.xlu0 %703 }
 0x4b2   : > { %v712_v24 = vsel %vm711_vm6, %v710_v21, %v704_v22 }
 0x4b3   : > { %v714_v25 = vsel %vm713_vm7, %v712_v24, %v708_v23 }
 0x4b4   : > { %904 = vmatmul.msk.f32.vlgmr.msra.gmra.mxu0 %vm372_vm0, %v714_v25 }
 0x531   : > { %v739_v26 = vpop.f32.mrf.mxu0 }
 0x532   : > { %v740_v27 = vadd.f32 %v739_v26, %v1161_v8 }
 0x534   : > { %v742_v28 = vsel %vm372_vm0, %v740_v27, 0.0 }
 0x535   : > { %743 = vadd.xlane.f32.xlu0 %v742_v28 }
 0x5a8   : > { %v744_v36 = vpop.xlane.xlu0 %743 }
 0x5a9   : > { %v752_v37 = vmul.f32 %v751_v35, %v744_v36 }
 0x5ab   : > { %v753_v38 = vsub.f32 %v740_v27, %v752_v37 }
 0x5ad   : > { %v754_v39 = vmul.f32 %v753_v38, %v753_v38 }
 0x5af   : > { %v755_v40 = vsel %vm372_vm0, %v754_v39, 0.0 }
 0x5b0   : > { %756 = vadd.xlane.f32.xlu1 %v755_v40 }
 0x623   : > { %v757_v8 = vpop.xlane.xlu1 %756 }
 0x624   : > { %v758_v41 = vmul.f32 %v757_v8, %v751_v35 }
 0x626   : > { %v759_v42 = vadd.f32 1e-06, %v758_v41 }
 0x628   : > { %970 = vrsqrt.f32 %v759_v42  ;;  %vm766_vm10 = vweird.f32 %v759_v42 }
 0x62e   : > { %v971_v43 = vpop.eup %970 }
 0x62f   : > { %v761_v44 = vmul.f32 %v971_v43, %v759_v42  ;;  %vm767_vm9 = vweird.f32 %v971_v43 }
 0x630   : > { %vm768_vm11 = vmor %vm766_vm10, %vm767_vm9 }
 0x631   : > { %v762_v45 = vmul.f32 %v971_v43, %v761_v44 }
 0x633   : > { %v763_v46 = vmul.f32 0.5, %v762_v45 }
 0x635   : > { %v764_v47 = vsub.f32 1.5, %v763_v46 }
 0x637   : > { %v765_v48 = vmul.f32 %v971_v43, %v764_v47 }
 0x639   : > { %v769_v50 = vsel %vm768_vm11, %v971_v43, %v765_v48 }
 0x63a   : > { %v770_v52 = vmul.f32 %v769_v50, %v753_v38 }
 0x63c   : > { %v775_v53 = vmul.f32 %v950_v49, %v770_v52 }
 0x63e   : > { %v780_v54 = vadd.f32 %v951_v51, %v775_v53 }
 0x640   : > { %781 = vst.msk [vmem:[%s365_s14] sm:$0xff] %vm372_vm0, %v780_v54 }
 0x641 PF: > { %s20_s27 = sadd.s32 1, %s1046_s27  }
 0x642   : > { %p17_p7 = scmp.ge.s32.totalorder %s20_s27, 4  }
 0x644   :  { %19 = sbr.rel (!%p17_p7) target bundleno = 2 (0x2), region = 97 }
 0x649   :  { %801 = vsyncpa [#allocation3], 1 }
 0x64a   :  { %803 = vsyncpa [#allocation3 + $0x1], 1 }
 0x64b   :  { %804 = vsyncpa [#allocation5], 1 }

// kernel: transformer_forward.21
= control target key start
LH: loop header
LB: loop body
LE: loop exit
PB: predicated region body
PF: predicated region fallthrough
CT: control target
= control target key end

     0   :  { %s515_s24 = smov 0   ;;  %s591_s0 = inlined_call_operand.vmem [shape: f32[2,8,32], index: 0, kind: input, shape index: {}]   ;;  %s592_s1 = inlined_call_operand.vmem [shape: f32[32,64], index: 1, kind: input, shape index: {}]   ;;  %s593_s2 = inlined_call_operand.vmem [shape: f32[1,64], index: 2, kind: input, shape index: {}]   ;;  %s594_s3 = inlined_call_operand.vmem [shape: f32[64,32], index: 3, kind: input, shape index: {}]   ;;  %s595_s4 = inlined_call_operand.vmem [shape: f32[1,32], index: 4, kind: input, shape index: {}]   ;;  %s596_s5 = inlined_call_operand.vmem [shape: f32[1,32], index: 5, kind: input, shape index: {}]   ;;  %s597_s6 = inlined_call_operand.vmem [shape: f32[1,32], index: 6, kind: input, shape index: {}]   ;;  %s598_s7 = inlined_call_operand.vmem [shape: f32[2,8,32], index: 7, kind: output, shape index: {}]  }
   0x1 LB: > { %s438_s25 = sadd.s32 4294967295, %s472_s24   ;;  %p442_p0 = scmp.ge.s32.totalorder %s472_s24, 1  ;;  %s472_s24 = sphi %s515_s24, %s17_s24  }
   0x2   : > { %p236_p1 = scmp.lt.s32.totalorder %s472_s24, 3 }
   0x4   : > { %p237_p2 = pnand %p442_p0, %p236_p1 }
   0x5   : > { %p266_p3 = scmp.lt.s32.totalorder (!%p237_p2), %s438_s25, 1 }
   0x6   : > { %240 = sbr.rel (%p237_p2) target bundleno = 548 (0x224), region = 48 }
   0xb   : > { %v278_v0 = vld [vmem:[%s592_s1 + $0x18] sm:$0xff]  ;;  %v277_v1 = vld [vmem:[%s592_s1 + $0x10] sm:$0xff]  ;;  %v276_v4 = vld [vmem:[%s592_s1 + $0x8] sm:$0xff]  ;;  %s600_s25 = smov (!%p266_p3, %s438_s25), 1  ;;  %vm283_vm0 = vcmask 261120   ;;  %vm320_vm1 = vcmask 523264  }
   0xc   : > { %299 = vmatpush.msra.mxu0 %v278_v0  ;;  %v315_v2 = vld [vmem:[%s594_s3 + $0x38] sm:$0xff]  ;;  %v314_v3 = vld [vmem:[%s594_s3 + $0x30] sm:$0xff]  ;;  %v313_v5 = vld [vmem:[%s594_s3 + $0x28] sm:$0xff]  ;;  %s443_s17 = sshll.u32 %s600_s25, 3  ;;  %v474_v22 = vmov 32.0  }
   0xd   : > { %332 = vmatpush.msra.mxu1 %v315_v2  ;;  %v275_v6 = vld [vmem:[%s592_s1] sm:$0xff]  ;;  %s269_s20 = scalar_lea.vmem %s591_s0, %s443_s17  ;;  %v311_v9 = vld [vmem:[%s594_s3 + $0x18] sm:$0xff]  ;;  %v310_v10 = vld [vmem:[%s594_s3 + $0x10] sm:$0xff]  ;;  %462 = vrcp.f32 %v474_v22  ;;  %s273_s21 = scalar_lea.vmem %s598_s7, %s443_s17 }
   0xe   : > { %300 = vmatpush.msra.mxu0 %v277_v1  ;;  %v312_v7 = vld [vmem:[%s594_s3 + $0x20] sm:$0xff]  ;;  %v309_v11 = vld [vmem:[%s594_s3 + $0x8] sm:$0xff] }
   0xf   : > { %333 = vmatpush.msra.mxu1 %v314_v3  ;;  %v274_v8 = vld [vmem:[%s269_s20] sm:$0xff] }
  0x10   : > { %301 = vmatpush.msra.mxu0 %v276_v4  ;;  %v308_v12 = vld [vmem:[%s594_s3] sm:$0xff] }
  0x11   : > { %334 = vmatpush.msra.mxu1 %v313_v5  ;;  %v458_v13 = vld [vmem:[%s593_s2] ss:$0 sm:$0xff] }
  0x12   : > { %302 = vmatpush.msra.mxu0 %v275_v6  ;;  %v459_v17 = vld [vmem:[%s595_s4] ss:$0 sm:$0xff] }
  0x13   : > { %445 = vmatmul.msk.f32.vlgmr.msra.gmra.mxu0 %vm283_vm0, %v274_v8  ;;  %335 = vmatpush.msra.mxu1 %v312_v7  ;;  %v463_v23 = vpop.eup %462  ;;  %v460_v43 = vld [vmem:[%s596_s5] ss:$0 sm:$0xff] }
  0x14   : > { %v349_v24 = vmul.f32 32.0, %v463_v23  ;;  %vm353_vm2 = vweird.f32 %v463_v23  ;;  %v461_v45 = vld [vmem:[%s597_s6] ss:$0 sm:$0xff] }
  0x15   : > { %336 = vmatpush.msra.mxu1 %v311_v9 }
  0x16   : > { %v350_v25 = vsub.f32 1.0, %v349_v24 }
  0x17   : > { %337 = vmatpush.msra.mxu1 %v310_v10 }
  0x18   : > { %v351_v26 = vmul.f32 %v463_v23, %v350_v25 }
  0x19   : > { %338 = vmatpush.msra.mxu1 %v309_v11 }
  0x1a   : > { %v352_v27 = vadd.f32 %v463_v23, %v351_v26 }
  0x1b   : > { %339 = vmatpush.msra.mxu1 %v308_v12 }
  0x1c   : > { %v354_v28 = vsel %vm353_vm2, %v463_v23, %v352_v27 }
  0x90   : > { %v304_v14 = vpop.f32.mrf.mxu0 }
  0x91   : > { %v305_v15 = vadd.f32 %v458_v13, %v304_v14 }
  0x93   : > { %v307_v16 = vmax.f32 %v305_v15, 0.0 }
  0x95   : > { %446 = vmatmul.msk.f32.vlgmr.msra.gmra.mxu1 %vm320_vm1, %v307_v16 }
 0x112   : > { %v341_v18 = vpop.f32.mrf.mxu1 }
 0x113   : > { %v342_v19 = vadd.f32 %v459_v17, %v341_v18 }
 0x115   : > { %v344_v20 = vadd.f32 %v342_v19, %v274_v8 }
 0x117   : > { %v345_v21 = vsel %vm283_vm0, %v344_v20, 0.0 }
 0x118   : > { %346 = vadd.xlane.f32.xlu0 %v345_v21 }
 0x18b   : > { %v347_v29 = vpop.xlane.xlu0 %346 }
 0x18c   : > { %v355_v30 = vmul.f32 %v354_v28, %v347_v29 }
 0x18e   : > { %v356_v31 = vsub.f32 %v344_v20, %v355_v30 }
 0x190   : > { %v357_v32 = vmul.f32 %v356_v31, %v356_v31 }
 0x192   : > { %v358_v33 = vsel %vm283_vm0, %v357_v32, 0.0 }
 0x193   : > { %359 = vadd.xlane.f32.xlu0 %v358_v33 }
 0x206   : > { %v360_v34 = vpop.xlane.xlu0 %359 }
 0x207   : > { %v361_v35 = vmul.f32 %v360_v34, %v354_v28 }
 0x209   : > { %v362_v36 = vadd.f32 1e-06, %v361_v35 }
 0x20b   : > { %464 = vrsqrt.f32 %v362_v36  ;;  %vm369_vm4 = vweird.f32 %v362_v36 }
 0x211   : > { %v465_v37 = vpop.eup %464 }
 0x212   : > { %v364_v38 = vmul.f32 %v465_v37, %v362_v36  ;;  %vm370_vm3 = vweird.f32 %v465_v37 }
 0x213   : > { %vm371_vm5 = vmor %vm369_vm4, %vm370_vm3 }
 0x214   : > { %v365_v39 = vmul.f32 %v465_v37, %v364_v38 }
 0x216   : > { %v366_v40 = vmul.f32 0.5, %v365_v39 }
 0x218   : > { %v367_v41 = vsub.f32 1.5, %v366_v40 }
 0x21a   : > { %v368_v42 = vmul.f32 %v465_v37, %v367_v41 }
 0x21c   : > { %v372_v44 = vsel %vm371_vm5, %v465_v37, %v368_v42 }
 0x21d   : > { %v373_v46 = vmul.f32 %v372_v44, %v356_v31 }
 0x21f   : > { %v378_v47 = vmul.f32 %v460_v43, %v373_v46 }
 0x221   : > { %v383_v48 = vadd.f32 %v461_v45, %v378_v47 }
 0x223   : > { %384 = vst.msk [vmem:[%s273_s21] sm:$0xff] %vm283_vm0, %v383_v48 }
 0x224 PF: > { %s17_s24 = sadd.s32 1, %s472_s24  }
 0x225   : > { %p14_p4 = scmp.ge.s32.totalorder %s17_s24, 4  }
 0x227   :  { %16 = sbr.rel (!%p14_p4) target bundleno = 1 (0x1), region = 78 }

// kernel: transformer_forward.25
= control target key start
LH: loop header
LB: loop body
LE: loop exit
PB: predicated region body
PF: predicated region fallthrough
CT: control target
= control target key end

     0   :  { %7 = vsyncpa [#allocation3], 0  ;;  %s493_s0 = inlined_call_operand.vmem [shape: f32[2,8,32], index: 0, kind: input, shape index: {}]   ;;  %s494_s1 = inlined_call_operand.vmem [shape: f32[32,32], index: 1, kind: input, shape index: {}]   ;;  %s495_s2 = inlined_call_operand.hbm [shape: f32[2,8,32], index: 2, kind: output, shape index: {}]  }
   0x1   :  { %9 = vsyncpa [#allocation3 + $0x1], 0  ;;  %s390_s9 = smov 0   ;;  %s392_s10 = smov 0  }
   0x2   :  { %s394_s11 = smov 0   ;;  %s396_s12 = smov 0  }
   0x3 LB: > { %s411_s13 = sadd.s32 4294967295, %s373_s12   ;;  %s257_s14 = sadd.s32 4294967294, %s373_s12   ;;  %s373_s12 = sphi %s396_s12, %s501_s12   ;;  %s369_s11 = sphi %s394_s11, %s500_s11   ;;  %s365_s10 = sphi %s392_s10, %s499_s10   ;;  %s361_s9 = sphi %s390_s9, %s498_s9  }
   0x4   : > { %s415_s15 = sadd.s32 1, %s373_s12   ;;  %s69_s16 = sadd.s32 1, %s369_s11 }
   0x5   : > { %s66_s17 = ssub.s32 %s373_s12, %s415_s15  ;;  %p79_p0 = scmp.ne.s32.totalorder %s369_s11, %s365_s10 }
   0x6   : > { %p67_p1 = scmp.eq.s32.totalorder %s66_s17, 0  ;;  %p80_p2 = scmp.eq.s32.totalorder %s411_s13, 1 }
   0x7   : > { %p85_p3 = scmp.ne.s32.totalorder %s365_s10, %s361_s9  ;;  %p86_p4 = scmp.eq.s32.totalorder %s257_s14, 1 }
   0x8   : > { %s426_s18 = scalar_select %p67_p1, %s369_s11, %s69_s16  }
   0x9   : > { %p428_p5 = por %p80_p2, %p79_p0  ;;  %p432_p6 = por %p86_p4, %p85_p3 }
   0xa   : > { %p260_p7 = scmp.ge.s32.totalorder %s373_s12, 1  ;;  %p114_p8 = scmp.lt.s32.totalorder %s373_s12, 3 }
   0xc   : > { %p115_p9 = pnand %p260_p7, %p114_p8 }
   0xd   : > { %p135_p10 = scmp.lt.s32.totalorder (!%p115_p9), %s411_s13, 1  ;;  %s132_s6 = sand.u32 (!%p115_p9), 1, %s365_s10  }
   0xe   : > { %118 = sbr.rel (%p115_p9) target bundleno = 166 (0xa6), region = 28  ;;  %s261_s7 = sshll.u32 (!%p115_p9), %s132_s6, 3 }
   0xf   : > { %s269_s8 = sshll.u32 (!%p115_p9), %s411_s13, 3  ;;  %s134_s21 = scalar_lea.vmem (!%p115_p9), [#allocation2], %s261_s7 }
  0x10   : > { %s193_s17 = scalar_lea.hbm (!%p115_p9), %s495_s2, %s269_s8  ;;  %s195_s22 = sshll.u32 (!%p115_p9), %s134_s21, 4  ;;  %s196_s22 = int_to_ptr.vmem [resolvable:$true] %s195_s22 }
  0x11   : > { %s197_s23 = sshll.u32 (!%p115_p9), %s193_s17, 4  ;;  %s183_s24 = scalar_lea.sflag (!%p115_p9), [#allocation3], %s132_s6  ;;  %s198_s23 = int_to_ptr.hbm [resolvable:$true] %s197_s23 }
  0x13   : > { %v143_v0 = vld [vmem:[%s494_s1 + $0x18] sm:$0xff]  ;;  %vm144_vm0 = vcmask 261120   ;;  %v142_v1 = vld [vmem:[%s494_s1 + $0x10] sm:$0xff]  ;;  %s136_s25 = scalar_select %p135_p10, %s411_s13, 1  ;;  %v141_v2 = vld [vmem:[%s494_s1 + $0x8] sm:$0xff] }
  0x14   : > { %263 = vmatpush.xpose.msk.msra.mxu0 %vm144_vm0, %v143_v0  ;;  %v140_v3 = vld [vmem:[%s494_s1] sm:$0xff] }
  0x15   : > { %s262_s28 = sshll.u32 %s136_s25, 3  ;;  %s325_s25 = sshra.s32 %s198_s23, 4  ;;  %s326_s25 = int_to_ptr.hbm [resolvable:$true] %s325_s25 }
  0x16   : > { %s138_s5 = scalar_lea.vmem %s493_s0, %s262_s28  ;;  %s327_s26 = scalar_lea.hbm %s326_s25, 8 }
  0x17   : > { %v139_v4 = vld [vmem:[%s138_s5] sm:$0xff]  ;;  %p328_p11 = scmp.ne.s32.totalorder %s326_s25, %s327_s26  ;;  %s331_s28 = scalar_lea.hbm %s495_s2, 16 }
  0x18   : > { %264 = vmatpush.xpose.msk.msra.mxu0 %vm144_vm0, %v142_v1  ;;  %p332_p0 = scmp.lt.s32.totalorder %s326_s25, %s495_s2  ;;  %p333_p1 = scmp.lt.s32.totalorder %s331_s28, %s327_s26 }
  0x19   : > { %p329_p12 = pnand %p328_p11, %p428_p5 }
  0x1a   : > { %p334_p2 = por %p333_p1, %p332_p0 }
  0x1b   : > { %p330_p13 = pneg %p329_p12 }
  0x1c   : > { %265 = vmatpush.xpose.msk.msra.mxu0 %vm144_vm0, %v141_v2 }
  0x1d   : > { %p335_p3 = pnand %p334_p2, %p330_p13 }
  0x20   : > { %266 = vmatpush.xpose.msk.msra.mxu0 %vm144_vm0, %v140_v3 }
  0x23   : > { %267 = vmatmul.msk.f32.vlgmr.msra.gmra.mxu0 %vm144_vm0, %v139_v4 }
  0xa0   : > { %v177_v5 = vpop.f32.mrf.mxu0 }
  0xa1   : > { %v180_v6 = vmul.f32 0.17677669, %v177_v5 }
  0xa3   : > { %181 = vst.msk [vmem:[%s134_s21] sm:$0xff] %vm144_vm0, %v180_v6 }
  0xa4   : > { %338 = shalt.err (!%p335_p3)
}
  0xa5   : > { %272 = dma.vmem_to_hbm [thread:$0]  (%p428_p5), %s196_s22, 128, %s198_s23, %s183_s24  }
  0xa6 PF: > { %p278_p4 = scmp.ge.s32.totalorder %s373_s12, 2  ;;  %s209_s3 = sand.u32 1, %s361_s9  }
  0xa7   : > { %s210_s4 = scalar_lea.sflag [#allocation3], %s209_s3 }
  0xa8   : > { %p275_p7 = pnand %p278_p4, %p432_p6 }
  0xaa   : > { %p276_p8 = pneg %p275_p7 }
  0xac   : > { %356 = dma.done.wait (%p276_p8), %s210_s4, 128  }
  0xad   : > { %358 = vsyncadd (%p276_p8), %s210_s4, 4294967168  ;;  %p12_p9 = scmp.ge.s32.totalorder %s415_s15, 4   ;;  %s498_s9 = smov %s365_s10 }
  0xae   : > { %s499_s10 = smov %s369_s11  ;;  %s500_s11 = smov %s426_s18 }
  0xaf   : > { %s501_s12 = smov %s415_s15  ;;  %14 = sbr.rel (!%p12_p9) target bundleno = 3 (0x3), region = 63 }
  0xb4   :  { %216 = vsyncpa [#allocation3], 1 }
  0xb5   :  { %218 = vsyncpa [#allocation3 + $0x1], 1 }

</bundles_post_ra>
